<compile_context>
chip_gen: v6e
topology: v6e:2x2x1
jax: 0.10.0
libtpu: 0.0.40
codegen_flags: <defaults>
</compile_context>

<pallas_src>
import functools

import jax
import jax.numpy as jnp
import numpy as np
from jax import lax
from jax.experimental import pallas as pl
from jax.experimental.pallas import tpu as pltpu


def _encoder_block_kernel(x_ref, w_ref, b_ref, mask_ref, o_ref,
                          actp_ref, col_ref, *, n_conv, C, S, NB, P, offsets):
    """Fused EncoderBlock forward for NB batch elements.

    x_ref    : (NB, C, S)          input, channel-major (conv + residual path)
    w_ref    : (n_conv, C, 27*C)   weights, [cout, tap*C + cin]
    b_ref    : (n_conv, C, 1)      biases, channel-major
    mask_ref : (27, NB*S)          per-tap validity mask (0/1 f32)
    o_ref    : (NB, C, S)          output, channel-major (lane-dense store)
    actp_ref : VMEM (C, NB*S+2P)   f32 zero-side-padded flattened activation
    col_ref  : VMEM (27*C, NB*S)   f32 transposed im2col matrix
    """
    f32 = jnp.float32
    L = NB * S

    # Zero only the two pad strips; the interior is fully overwritten below.
    actp_ref[:, pl.ds(0, P)] = jnp.zeros((C, P), f32)
    actp_ref[:, pl.ds(P + L, P)] = jnp.zeros((C, P), f32)

    # Stage the channel-major input slabs (lane-dense, one stream, reused as
    # the residual straight from x_ref at the end).
    for b in range(NB):
        actp_ref[:, pl.ds(P + b * S, S)] = x_ref[b].astype(f32)

    for layer in range(n_conv):
        # Transposed im2col: col[tap*C:(tap+1)*C, :] = shifted, masked act.
        # Shifts are static lane-window slices of the zero-padded activation;
        # the mask reproduces the 3D "SAME" zero-padding boundary.
        for tap, off in enumerate(offsets):
            sl = actp_ref[:, pl.ds(P + off, L)]                 # (C, L)
            m = mask_ref[pl.ds(tap, 1), :]                      # (1, L)
            col_ref[pl.ds(tap * C, C), :] = sl * m

        # Single K = 27*C contraction per layer; result is register-resident.
        res = jnp.dot(w_ref[layer], col_ref[...],
                      preferred_element_type=f32) + b_ref[layer]  # (C, L)

        if layer != n_conv - 1:
            actp_ref[:, pl.ds(P, L)] = jnp.maximum(res, 0.0)
        else:
            # relu(conv_stack(x) + x), stored lane-dense and already NCDHW.
            for b in range(NB):
                y = res[:, b * S:(b + 1) * S] + x_ref[b].astype(f32)
                o_ref[b] = jnp.maximum(y, 0.0).astype(o_ref.dtype)


def encoder_block_pallas(x_ncdhw, weights_dhwio, biases, *, nb=1):
    """EncoderBlock.forward: relu(conv_stack(x) + x).  NCDHW in/out."""
    N, C, D, H, W = x_ncdhw.shape
    n_conv = len(weights_dhwio)
    S = D * H * W
    for w in weights_dhwio:
        # Residual add requires n_filters_in == n_filters_out.
        assert w.shape == (3, 3, 3, C, C), w.shape
    assert N % nb == 0, (N, nb)
    L = nb * S
    P = H * W + W + 1                      # max |flattened tap offset|
    C27 = 27 * C

    # ---- weight / bias packing (tiny, wrapper-side) ------------------------
    # w_cm[l][cout, tap*C + cin] = W_l[kd, kh, kw, cin, cout], tap = kd*9+kh*3+kw
    w_cm = jnp.stack([
        jnp.transpose(w.reshape(27, C, C), (2, 0, 1)).reshape(C, C27)
        for w in weights_dhwio])                                   # (n_conv, C, 27C)
    b_cm = jnp.stack([b.reshape(C, 1) for b in biases])            # (n_conv, C, 1)

    # ---- static per-tap validity masks and flat offsets --------------------
    offsets = []
    mask_np = np.zeros((27, D, H, W), np.float32)
    dd, hh, ww = np.arange(D), np.arange(H), np.arange(W)
    for kd in range(3):
        for kh in range(3):
            for kw in range(3):
                tap = kd * 9 + kh * 3 + kw
                offsets.append((kd - 1) * H * W + (kh - 1) * W + (kw - 1))
                vd = ((dd + kd - 1 >= 0) & (dd + kd - 1 < D)).astype(np.float32)
                vh = ((hh + kh - 1 >= 0) & (hh + kh - 1 < H)).astype(np.float32)
                vw = ((ww + kw - 1 >= 0) & (ww + kw - 1 < W)).astype(np.float32)
                mask_np[tap] = vd[:, None, None] * vh[None, :, None] * vw[None, None, :]
    mask = jnp.asarray(np.tile(mask_np.reshape(27, S), (1, nb)))   # (27, L)

    # Single input stream: free reshape from the caller's NCDHW layout.
    x_cs = x_ncdhw.reshape(N, C, S)

    kern = functools.partial(_encoder_block_kernel, n_conv=n_conv, C=C, S=S,
                             NB=nb, P=P, offsets=tuple(offsets))

    out_cs = pl.pallas_call(
        kern,
        out_shape=jax.ShapeDtypeStruct((N, C, S), x_ncdhw.dtype),
        grid=(N // nb,),
        in_specs=[
            pl.BlockSpec((nb, C, S), lambda g: (g, 0, 0)),         # x (channel-major)
            pl.BlockSpec((n_conv, C, C27), lambda g: (0, 0, 0)),   # weights
            pl.BlockSpec((n_conv, C, 1), lambda g: (0, 0, 0)),     # biases
            pl.BlockSpec((27, L), lambda g: (0, 0)),               # tap masks
        ],
        out_specs=pl.BlockSpec((nb, C, S), lambda g: (g, 0, 0)),   # lane-dense output
        scratch_shapes=[
            pltpu.VMEM((C, L + 2 * P), jnp.float32),               # padded flat activation
            pltpu.VMEM((C27, L), jnp.float32),                     # transposed im2col
        ],
        compiler_params=pltpu.CompilerParams(
            dimension_semantics=("parallel",)),
    )(x_cs, w_cm, b_cm, mask)

    return out_cs.reshape(N, C, D, H, W)                           # already NCDHW


def encoder_block_ref(x_ncdhw, weights_dhwio, biases):
    """Pure-JAX reference for checking."""
    x = jnp.transpose(x_ncdhw, (0, 2, 3, 4, 1))
    n_conv = len(weights_dhwio)
    h = x
    for i, (w, b) in enumerate(zip(weights_dhwio, biases)):
        h = lax.conv_general_dilated(
            h, w, window_strides=(1, 1, 1), padding="SAME",
            dimension_numbers=("NDHWC", "DHWIO", "NDHWC"))
        h = h + b
        if i != n_conv - 1:
            h = jnp.maximum(h, 0.0)
    h = jnp.maximum(h + x, 0.0)
    return jnp.transpose(h, (0, 4, 1, 2, 3))


def init_params(key, n_conv, n_filters_in, n_filters_out):
    """Deterministic init matching PyTorch Conv3d shapes (kaiming-uniform-like bounds)."""
    weights, biases = [], []
    for i in range(n_conv):
        cin = n_filters_in if i == 0 else n_filters_out
        cout = n_filters_out
        key, kw_, kb_ = jax.random.split(key, 3)
        bound = 1.0 / np.sqrt(cin * 27)
        # stored DHWIO = (3,3,3,Cin,Cout); equivalent to PyTorch (Cout,Cin,3,3,3) transposed.
        w = jax.random.uniform(kw_, (3, 3, 3, cin, cout), jnp.float32, -bound, bound)
        b = jax.random.uniform(kb_, (cout,), jnp.float32, -bound, bound)
        weights.append(w)
        biases.append(b)
    return weights, biases


if __name__ == "__main__":
    key = jax.random.PRNGKey(0)
    kx, kp = jax.random.split(key)

    # small shapes: batch=2, channels=8 (in == out, required by the residual add),
    # spatial 8x8x8, n_conv=2, normalization='none'
    N, C, D, H, W = 2, 8, 8, 8, 8
    n_conv = 2

    x = jax.random.normal(kx, (N, C, D, H, W), jnp.float32)   # NCDHW, like PyTorch
    weights, biases = init_params(kp, n_conv, C, C)

    y_ref = jax.block_until_ready(encoder_block_ref(x, weights, biases))

    # nb=1: one batch element per grid step (keeps >=2 grid steps -> pipelining /
    # megacore sharding on v7x).
    y1 = jax.block_until_ready(encoder_block_pallas(x, weights, biases, nb=1))
    np.testing.assert_allclose(np.asarray(y1), np.asarray(y_ref), rtol=1e-3, atol=1e-3)

    # nb=2: whole batch per grid step (single K=27*C dot per layer for all of N).
    y2 = jax.block_until_ready(encoder_block_pallas(x, weights, biases, nb=2))
    np.testing.assert_allclose(np.asarray(y2), np.asarray(y_ref), rtol=1e-3, atol=1e-3)

    print("KERNEL_OK")
</pallas_src>

<mosaic_0001>
module attributes {stable_mosaic.version = 11 : i64} {
  func.func @_encoder_block_kernel(%arg0: i32, %arg1: memref<1x8x512xf32, #tpu.memory_space<vmem>>, %arg2: memref<2x8x216xf32, #tpu.memory_space<vmem>>, %arg3: memref<2x8x1xf32, #tpu.memory_space<vmem>>, %arg4: memref<27x512xf32, #tpu.memory_space<vmem>>, %arg5: memref<1x8x512xf32, #tpu.memory_space<vmem>>, %arg6: memref<8x658xf32, #tpu.memory_space<vmem>>, %arg7: memref<216x512xf32, #tpu.memory_space<vmem>>) attributes {dimension_semantics = [#tpu.dimension_semantics<parallel>], iteration_bounds = array<i64: 2>, scalar_prefetch = 0 : i64, scratch_operands = 2 : i64, tpu.core_type = #tpu.core_type<tc>, window_params = [{transform_indices = @transform_0, window_bounds = array<i64: 1, 8, 512>}, {pipeline_mode = #tpu.pipeline_mode<synchronous>, transform_indices = @transform_1, window_bounds = array<i64: 2, 8, 216>}, {pipeline_mode = #tpu.pipeline_mode<synchronous>, transform_indices = @transform_2, window_bounds = array<i64: 2, 8, 1>}, {pipeline_mode = #tpu.pipeline_mode<synchronous>, transform_indices = @transform_3, window_bounds = array<i64: 27, 512>}, {transform_indices = @transform_4, window_bounds = array<i64: 1, 8, 512>}]} {
    %cst = arith.constant 0.000000e+00 : f32
    %0 = vector.broadcast %cst : f32 to vector<8x73xf32>
    %c0 = arith.constant 0 : index
    %c0_0 = arith.constant 0 : index
    %1 = vector.load %arg6[%c0, %c0_0] : memref<8x658xf32, #tpu.memory_space<vmem>>, vector<8x73xf32>
    tpu.vector_store %arg6[%c0, %c0_0], %0 {strides = array<i32>} : memref<8x658xf32, #tpu.memory_space<vmem>>, vector<8x73xf32>,
    %cst_1 = arith.constant 0.000000e+00 : f32
    %2 = vector.broadcast %cst_1 : f32 to vector<8x73xf32>
    %c0_2 = arith.constant 0 : index
    %c585 = arith.constant 585 : index
    %3 = vector.load %arg6[%c0_2, %c585] : memref<8x658xf32, #tpu.memory_space<vmem>>, vector<8x73xf32>
    tpu.vector_store %arg6[%c0_2, %c585], %2 {strides = array<i32>} : memref<8x658xf32, #tpu.memory_space<vmem>>, vector<8x73xf32>,
    %c0_3 = arith.constant 0 : index
    %c0_4 = arith.constant 0 : index
    %c0_5 = arith.constant 0 : index
    %4 = vector.load %arg1[%c0_3, %c0_4, %c0_5] : memref<1x8x512xf32, #tpu.memory_space<vmem>>, vector<1x8x512xf32>
    %5 = vector.shape_cast %4 : vector<1x8x512xf32> to vector<8x512xf32>
    %c0_6 = arith.constant 0 : index
    %c73 = arith.constant 73 : index
    %6 = vector.load %arg6[%c0_6, %c73] : memref<8x658xf32, #tpu.memory_space<vmem>>, vector<8x512xf32>
    tpu.vector_store %arg6[%c0_6, %c73], %5 {strides = array<i32>} : memref<8x658xf32, #tpu.memory_space<vmem>>, vector<8x512xf32>,
    %c0_7 = arith.constant 0 : index
    %c0_8 = arith.constant 0 : index
    %7 = vector.load %arg6[%c0_7, %c0_8] : memref<8x658xf32, #tpu.memory_space<vmem>>, vector<8x512xf32>
    %c0_9 = arith.constant 0 : index
    %c0_10 = arith.constant 0 : index
    %8 = vector.load %arg4[%c0_9, %c0_10] : memref<27x512xf32, #tpu.memory_space<vmem>>, vector<1x512xf32>
    %9 = vector.broadcast %8 : vector<1x512xf32> to vector<8x512xf32>
    %10 = arith.mulf %7, %9 : vector<8x512xf32>
    %c0_11 = arith.constant 0 : index
    %c0_12 = arith.constant 0 : index
    %11 = vector.load %arg7[%c0_11, %c0_12] : memref<216x512xf32, #tpu.memory_space<vmem>>, vector<8x512xf32>
    tpu.vector_store %arg7[%c0_11, %c0_12], %10 {strides = array<i32>} : memref<216x512xf32, #tpu.memory_space<vmem>>, vector<8x512xf32>,
    %c0_13 = arith.constant 0 : index
    %c1 = arith.constant 1 : index
    %12 = vector.load %arg6[%c0_13, %c1] : memref<8x658xf32, #tpu.memory_space<vmem>>, vector<8x512xf32>
    %c1_14 = arith.constant 1 : index
    %c0_15 = arith.constant 0 : index
    %13 = vector.load %arg4[%c1_14, %c0_15] : memref<27x512xf32, #tpu.memory_space<vmem>>, vector<1x512xf32>
    %14 = vector.broadcast %13 : vector<1x512xf32> to vector<8x512xf32>
    %15 = arith.mulf %12, %14 : vector<8x512xf32>
    %c8 = arith.constant 8 : index
    %c0_16 = arith.constant 0 : index
    %16 = vector.load %arg7[%c8, %c0_16] : memref<216x512xf32, #tpu.memory_space<vmem>>, vector<8x512xf32>
    tpu.vector_store %arg7[%c8, %c0_16], %15 {strides = array<i32>} : memref<216x512xf32, #tpu.memory_space<vmem>>, vector<8x512xf32>,
    %c0_17 = arith.constant 0 : index
    %c2 = arith.constant 2 : index
    %17 = vector.load %arg6[%c0_17, %c2] : memref<8x658xf32, #tpu.memory_space<vmem>>, vector<8x512xf32>
    %c2_18 = arith.constant 2 : index
    %c0_19 = arith.constant 0 : index
    %18 = vector.load %arg4[%c2_18, %c0_19] : memref<27x512xf32, #tpu.memory_space<vmem>>, vector<1x512xf32>
    %19 = vector.broadcast %18 : vector<1x512xf32> to vector<8x512xf32>
    %20 = arith.mulf %17, %19 : vector<8x512xf32>
    %c16 = arith.constant 16 : index
    %c0_20 = arith.constant 0 : index
    %21 = vector.load %arg7[%c16, %c0_20] : memref<216x512xf32, #tpu.memory_space<vmem>>, vector<8x512xf32>
    tpu.vector_store %arg7[%c16, %c0_20], %20 {strides = array<i32>} : memref<216x512xf32, #tpu.memory_space<vmem>>, vector<8x512xf32>,
    %c0_21 = arith.constant 0 : index
    %c8_22 = arith.constant 8 : index
    %22 = vector.load %arg6[%c0_21, %c8_22] : memref<8x658xf32, #tpu.memory_space<vmem>>, vector<8x512xf32>
    %c3 = arith.constant 3 : index
    %c0_23 = arith.constant 0 : index
    %23 = vector.load %arg4[%c3, %c0_23] : memref<27x512xf32, #tpu.memory_space<vmem>>, vector<1x512xf32>
    %24 = vector.broadcast %23 : vector<1x512xf32> to vector<8x512xf32>
    %25 = arith.mulf %22, %24 : vector<8x512xf32>
    %c24 = arith.constant 24 : index
    %c0_24 = arith.constant 0 : index
    %26 = vector.load %arg7[%c24, %c0_24] : memref<216x512xf32, #tpu.memory_space<vmem>>, vector<8x512xf32>
    tpu.vector_store %arg7[%c24, %c0_24], %25 {strides = array<i32>} : memref<216x512xf32, #tpu.memory_space<vmem>>, vector<8x512xf32>,
    %c0_25 = arith.constant 0 : index
    %c9 = arith.constant 9 : index
    %27 = vector.load %arg6[%c0_25, %c9] : memref<8x658xf32, #tpu.memory_space<vmem>>, vector<8x512xf32>
    %c4 = arith.constant 4 : index
    %c0_26 = arith.constant 0 : index
    %28 = vector.load %arg4[%c4, %c0_26] : memref<27x512xf32, #tpu.memory_space<vmem>>, vector<1x512xf32>
    %29 = vector.broadcast %28 : vector<1x512xf32> to vector<8x512xf32>
    %30 = arith.mulf %27, %29 : vector<8x512xf32>
    %c32 = arith.constant 32 : index
    %c0_27 = arith.constant 0 : index
    %31 = vector.load %arg7[%c32, %c0_27] : memref<216x512xf32, #tpu.memory_space<vmem>>, vector<8x512xf32>
    tpu.vector_store %arg7[%c32, %c0_27], %30 {strides = array<i32>} : memref<216x512xf32, #tpu.memory_space<vmem>>, vector<8x512xf32>,
    %c0_28 = arith.constant 0 : index
    %c10 = arith.constant 10 : index
    %32 = vector.load %arg6[%c0_28, %c10] : memref<8x658xf32, #tpu.memory_space<vmem>>, vector<8x512xf32>
    %c5 = arith.constant 5 : index
    %c0_29 = arith.constant 0 : index
    %33 = vector.load %arg4[%c5, %c0_29] : memref<27x512xf32, #tpu.memory_space<vmem>>, vector<1x512xf32>
    %34 = vector.broadcast %33 : vector<1x512xf32> to vector<8x512xf32>
    %35 = arith.mulf %32, %34 : vector<8x512xf32>
    %c40 = arith.constant 40 : index
    %c0_30 = arith.constant 0 : index
    %36 = vector.load %arg7[%c40, %c0_30] : memref<216x512xf32, #tpu.memory_space<vmem>>, vector<8x512xf32>
    tpu.vector_store %arg7[%c40, %c0_30], %35 {strides = array<i32>} : memref<216x512xf32, #tpu.memory_space<vmem>>, vector<8x512xf32>,
    %c0_31 = arith.constant 0 : index
    %c16_32 = arith.constant 16 : index
    %37 = vector.load %arg6[%c0_31, %c16_32] : memref<8x658xf32, #tpu.memory_space<vmem>>, vector<8x512xf32>
    %c6 = arith.constant 6 : index
    %c0_33 = arith.constant 0 : index
    %38 = vector.load %arg4[%c6, %c0_33] : memref<27x512xf32, #tpu.memory_space<vmem>>, vector<1x512xf32>
    %39 = vector.broadcast %38 : vector<1x512xf32> to vector<8x512xf32>
    %40 = arith.mulf %37, %39 : vector<8x512xf32>
    %c48 = arith.constant 48 : index
    %c0_34 = arith.constant 0 : index
    %41 = vector.load %arg7[%c48, %c0_34] : memref<216x512xf32, #tpu.memory_space<vmem>>, vector<8x512xf32>
    tpu.vector_store %arg7[%c48, %c0_34], %40 {strides = array<i32>} : memref<216x512xf32, #tpu.memory_space<vmem>>, vector<8x512xf32>,
    %c0_35 = arith.constant 0 : index
    %c17 = arith.constant 17 : index
    %42 = vector.load %arg6[%c0_35, %c17] : memref<8x658xf32, #tpu.memory_space<vmem>>, vector<8x512xf32>
    %c7 = arith.constant 7 : index
    %c0_36 = arith.constant 0 : index
    %43 = vector.load %arg4[%c7, %c0_36] : memref<27x512xf32, #tpu.memory_space<vmem>>, vector<1x512xf32>
    %44 = vector.broadcast %43 : vector<1x512xf32> to vector<8x512xf32>
    %45 = arith.mulf %42, %44 : vector<8x512xf32>
    %c56 = arith.constant 56 : index
    %c0_37 = arith.constant 0 : index
    %46 = vector.load %arg7[%c56, %c0_37] : memref<216x512xf32, #tpu.memory_space<vmem>>, vector<8x512xf32>
    tpu.vector_store %arg7[%c56, %c0_37], %45 {strides = array<i32>} : memref<216x512xf32, #tpu.memory_space<vmem>>, vector<8x512xf32>,
    %c0_38 = arith.constant 0 : index
    %c18 = arith.constant 18 : index
    %47 = vector.load %arg6[%c0_38, %c18] : memref<8x658xf32, #tpu.memory_space<vmem>>, vector<8x512xf32>
    %c8_39 = arith.constant 8 : index
    %c0_40 = arith.constant 0 : index
    %48 = vector.load %arg4[%c8_39, %c0_40] : memref<27x512xf32, #tpu.memory_space<vmem>>, vector<1x512xf32>
    %49 = vector.broadcast %48 : vector<1x512xf32> to vector<8x512xf32>
    %50 = arith.mulf %47, %49 : vector<8x512xf32>
    %c64 = arith.constant 64 : index
    %c0_41 = arith.constant 0 : index
    %51 = vector.load %arg7[%c64, %c0_41] : memref<216x512xf32, #tpu.memory_space<vmem>>, vector<8x512xf32>
    tpu.vector_store %arg7[%c64, %c0_41], %50 {strides = array<i32>} : memref<216x512xf32, #tpu.memory_space<vmem>>, vector<8x512xf32>,
    %c0_42 = arith.constant 0 : index
    %c64_43 = arith.constant 64 : index
    %52 = vector.load %arg6[%c0_42, %c64_43] : memref<8x658xf32, #tpu.memory_space<vmem>>, vector<8x512xf32>
    %c9_44 = arith.constant 9 : index
    %c0_45 = arith.constant 0 : index
    %53 = vector.load %arg4[%c9_44, %c0_45] : memref<27x512xf32, #tpu.memory_space<vmem>>, vector<1x512xf32>
    %54 = vector.broadcast %53 : vector<1x512xf32> to vector<8x512xf32>
    %55 = arith.mulf %52, %54 : vector<8x512xf32>
    %c72 = arith.constant 72 : index
    %c0_46 = arith.constant 0 : index
    %56 = vector.load %arg7[%c72, %c0_46] : memref<216x512xf32, #tpu.memory_space<vmem>>, vector<8x512xf32>
    tpu.vector_store %arg7[%c72, %c0_46], %55 {strides = array<i32>} : memref<216x512xf32, #tpu.memory_space<vmem>>, vector<8x512xf32>,
    %c0_47 = arith.constant 0 : index
    %c65 = arith.constant 65 : index
    %57 = vector.load %arg6[%c0_47, %c65] : memref<8x658xf32, #tpu.memory_space<vmem>>, vector<8x512xf32>
    %c10_48 = arith.constant 10 : index
    %c0_49 = arith.constant 0 : index
    %58 = vector.load %arg4[%c10_48, %c0_49] : memref<27x512xf32, #tpu.memory_space<vmem>>, vector<1x512xf32>
    %59 = vector.broadcast %58 : vector<1x512xf32> to vector<8x512xf32>
    %60 = arith.mulf %57, %59 : vector<8x512xf32>
    %c80 = arith.constant 80 : index
    %c0_50 = arith.constant 0 : index
    %61 = vector.load %arg7[%c80, %c0_50] : memref<216x512xf32, #tpu.memory_space<vmem>>, vector<8x512xf32>
    tpu.vector_store %arg7[%c80, %c0_50], %60 {strides = array<i32>} : memref<216x512xf32, #tpu.memory_space<vmem>>, vector<8x512xf32>,
    %c0_51 = arith.constant 0 : index
    %c66 = arith.constant 66 : index
    %62 = vector.load %arg6[%c0_51, %c66] : memref<8x658xf32, #tpu.memory_space<vmem>>, vector<8x512xf32>
    %c11 = arith.constant 11 : index
    %c0_52 = arith.constant 0 : index
    %63 = vector.load %arg4[%c11, %c0_52] : memref<27x512xf32, #tpu.memory_space<vmem>>, vector<1x512xf32>
    %64 = vector.broadcast %63 : vector<1x512xf32> to vector<8x512xf32>
    %65 = arith.mulf %62, %64 : vector<8x512xf32>
    %c88 = arith.constant 88 : index
    %c0_53 = arith.constant 0 : index
    %66 = vector.load %arg7[%c88, %c0_53] : memref<216x512xf32, #tpu.memory_space<vmem>>, vector<8x512xf32>
    tpu.vector_store %arg7[%c88, %c0_53], %65 {strides = array<i32>} : memref<216x512xf32, #tpu.memory_space<vmem>>, vector<8x512xf32>,
    %c0_54 = arith.constant 0 : index
    %c72_55 = arith.constant 72 : index
    %67 = vector.load %arg6[%c0_54, %c72_55] : memref<8x658xf32, #tpu.memory_space<vmem>>, vector<8x512xf32>
    %c12 = arith.constant 12 : index
    %c0_56 = arith.constant 0 : index
    %68 = vector.load %arg4[%c12, %c0_56] : memref<27x512xf32, #tpu.memory_space<vmem>>, vector<1x512xf32>
    %69 = vector.broadcast %68 : vector<1x512xf32> to vector<8x512xf32>
    %70 = arith.mulf %67, %69 : vector<8x512xf32>
    %c96 = arith.constant 96 : index
    %c0_57 = arith.constant 0 : index
    %71 = vector.load %arg7[%c96, %c0_57] : memref<216x512xf32, #tpu.memory_space<vmem>>, vector<8x512xf32>
    tpu.vector_store %arg7[%c96, %c0_57], %70 {strides = array<i32>} : memref<216x512xf32, #tpu.memory_space<vmem>>, vector<8x512xf32>,
    %c0_58 = arith.constant 0 : index
    %c73_59 = arith.constant 73 : index
    %72 = vector.load %arg6[%c0_58, %c73_59] : memref<8x658xf32, #tpu.memory_space<vmem>>, vector<8x512xf32>
    %c13 = arith.constant 13 : index
    %c0_60 = arith.constant 0 : index
    %73 = vector.load %arg4[%c13, %c0_60] : memref<27x512xf32, #tpu.memory_space<vmem>>, vector<1x512xf32>
    %74 = vector.broadcast %73 : vector<1x512xf32> to vector<8x512xf32>
    %75 = arith.mulf %72, %74 : vector<8x512xf32>
    %c104 = arith.constant 104 : index
    %c0_61 = arith.constant 0 : index
    %76 = vector.load %arg7[%c104, %c0_61] : memref<216x512xf32, #tpu.memory_space<vmem>>, vector<8x512xf32>
    tpu.vector_store %arg7[%c104, %c0_61], %75 {strides = array<i32>} : memref<216x512xf32, #tpu.memory_space<vmem>>, vector<8x512xf32>,
    %c0_62 = arith.constant 0 : index
    %c74 = arith.constant 74 : index
    %77 = vector.load %arg6[%c0_62, %c74] : memref<8x658xf32, #tpu.memory_space<vmem>>, vector<8x512xf32>
    %c14 = arith.constant 14 : index
    %c0_63 = arith.constant 0 : index
    %78 = vector.load %arg4[%c14, %c0_63] : memref<27x512xf32, #tpu.memory_space<vmem>>, vector<1x512xf32>
    %79 = vector.broadcast %78 : vector<1x512xf32> to vector<8x512xf32>
    %80 = arith.mulf %77, %79 : vector<8x512xf32>
    %c112 = arith.constant 112 : index
    %c0_64 = arith.constant 0 : index
    %81 = vector.load %arg7[%c112, %c0_64] : memref<216x512xf32, #tpu.memory_space<vmem>>, vector<8x512xf32>
    tpu.vector_store %arg7[%c112, %c0_64], %80 {strides = array<i32>} : memref<216x512xf32, #tpu.memory_space<vmem>>, vector<8x512xf32>,
    %c0_65 = arith.constant 0 : index
    %c80_66 = arith.constant 80 : index
    %82 = vector.load %arg6[%c0_65, %c80_66] : memref<8x658xf32, #tpu.memory_space<vmem>>, vector<8x512xf32>
    %c15 = arith.constant 15 : index
    %c0_67 = arith.constant 0 : index
    %83 = vector.load %arg4[%c15, %c0_67] : memref<27x512xf32, #tpu.memory_space<vmem>>, vector<1x512xf32>
    %84 = vector.broadcast %83 : vector<1x512xf32> to vector<8x512xf32>
    %85 = arith.mulf %82, %84 : vector<8x512xf32>
    %c120 = arith.constant 120 : index
    %c0_68 = arith.constant 0 : index
    %86 = vector.load %arg7[%c120, %c0_68] : memref<216x512xf32, #tpu.memory_space<vmem>>, vector<8x512xf32>
    tpu.vector_store %arg7[%c120, %c0_68], %85 {strides = array<i32>} : memref<216x512xf32, #tpu.memory_space<vmem>>, vector<8x512xf32>,
    %c0_69 = arith.constant 0 : index
    %c81 = arith.constant 81 : index
    %87 = vector.load %arg6[%c0_69, %c81] : memref<8x658xf32, #tpu.memory_space<vmem>>, vector<8x512xf32>
    %c16_70 = arith.constant 16 : index
    %c0_71 = arith.constant 0 : index
    %88 = vector.load %arg4[%c16_70, %c0_71] : memref<27x512xf32, #tpu.memory_space<vmem>>, vector<1x512xf32>
    %89 = vector.broadcast %88 : vector<1x512xf32> to vector<8x512xf32>
    %90 = arith.mulf %87, %89 : vector<8x512xf32>
    %c128 = arith.constant 128 : index
    %c0_72 = arith.constant 0 : index
    %91 = vector.load %arg7[%c128, %c0_72] : memref<216x512xf32, #tpu.memory_space<vmem>>, vector<8x512xf32>
    tpu.vector_store %arg7[%c128, %c0_72], %90 {strides = array<i32>} : memref<216x512xf32, #tpu.memory_space<vmem>>, vector<8x512xf32>,
    %c0_73 = arith.constant 0 : index
    %c82 = arith.constant 82 : index
    %92 = vector.load %arg6[%c0_73, %c82] : memref<8x658xf32, #tpu.memory_space<vmem>>, vector<8x512xf32>
    %c17_74 = arith.constant 17 : index
    %c0_75 = arith.constant 0 : index
    %93 = vector.load %arg4[%c17_74, %c0_75] : memref<27x512xf32, #tpu.memory_space<vmem>>, vector<1x512xf32>
    %94 = vector.broadcast %93 : vector<1x512xf32> to vector<8x512xf32>
    %95 = arith.mulf %92, %94 : vector<8x512xf32>
    %c136 = arith.constant 136 : index
    %c0_76 = arith.constant 0 : index
    %96 = vector.load %arg7[%c136, %c0_76] : memref<216x512xf32, #tpu.memory_space<vmem>>, vector<8x512xf32>
    tpu.vector_store %arg7[%c136, %c0_76], %95 {strides = array<i32>} : memref<216x512xf32, #tpu.memory_space<vmem>>, vector<8x512xf32>,
    %c0_77 = arith.constant 0 : index
    %c128_78 = arith.constant 128 : index
    %97 = vector.load %arg6[%c0_77, %c128_78] : memref<8x658xf32, #tpu.memory_space<vmem>>, vector<8x512xf32>
    %c18_79 = arith.constant 18 : index
    %c0_80 = arith.constant 0 : index
    %98 = vector.load %arg4[%c18_79, %c0_80] : memref<27x512xf32, #tpu.memory_space<vmem>>, vector<1x512xf32>
    %99 = vector.broadcast %98 : vector<1x512xf32> to vector<8x512xf32>
    %100 = arith.mulf %97, %99 : vector<8x512xf32>
    %c144 = arith.constant 144 : index
    %c0_81 = arith.constant 0 : index
    %101 = vector.load %arg7[%c144, %c0_81] : memref<216x512xf32, #tpu.memory_space<vmem>>, vector<8x512xf32>
    tpu.vector_store %arg7[%c144, %c0_81], %100 {strides = array<i32>} : memref<216x512xf32, #tpu.memory_space<vmem>>, vector<8x512xf32>,
    %c0_82 = arith.constant 0 : index
    %c129 = arith.constant 129 : index
    %102 = vector.load %arg6[%c0_82, %c129] : memref<8x658xf32, #tpu.memory_space<vmem>>, vector<8x512xf32>
    %c19 = arith.constant 19 : index
    %c0_83 = arith.constant 0 : index
    %103 = vector.load %arg4[%c19, %c0_83] : memref<27x512xf32, #tpu.memory_space<vmem>>, vector<1x512xf32>
    %104 = vector.broadcast %103 : vector<1x512xf32> to vector<8x512xf32>
    %105 = arith.mulf %102, %104 : vector<8x512xf32>
    %c152 = arith.constant 152 : index
    %c0_84 = arith.constant 0 : index
    %106 = vector.load %arg7[%c152, %c0_84] : memref<216x512xf32, #tpu.memory_space<vmem>>, vector<8x512xf32>
    tpu.vector_store %arg7[%c152, %c0_84], %105 {strides = array<i32>} : memref<216x512xf32, #tpu.memory_space<vmem>>, vector<8x512xf32>,
    %c0_85 = arith.constant 0 : index
    %c130 = arith.constant 130 : index
    %107 = vector.load %arg6[%c0_85, %c130] : memref<8x658xf32, #tpu.memory_space<vmem>>, vector<8x512xf32>
    %c20 = arith.constant 20 : index
    %c0_86 = arith.constant 0 : index
    %108 = vector.load %arg4[%c20, %c0_86] : memref<27x512xf32, #tpu.memory_space<vmem>>, vector<1x512xf32>
    %109 = vector.broadcast %108 : vector<1x512xf32> to vector<8x512xf32>
    %110 = arith.mulf %107, %109 : vector<8x512xf32>
    %c160 = arith.constant 160 : index
    %c0_87 = arith.constant 0 : index
    %111 = vector.load %arg7[%c160, %c0_87] : memref<216x512xf32, #tpu.memory_space<vmem>>, vector<8x512xf32>
    tpu.vector_store %arg7[%c160, %c0_87], %110 {strides = array<i32>} : memref<216x512xf32, #tpu.memory_space<vmem>>, vector<8x512xf32>,
    %c0_88 = arith.constant 0 : index
    %c136_89 = arith.constant 136 : index
    %112 = vector.load %arg6[%c0_88, %c136_89] : memref<8x658xf32, #tpu.memory_space<vmem>>, vector<8x512xf32>
    %c21 = arith.constant 21 : index
    %c0_90 = arith.constant 0 : index
    %113 = vector.load %arg4[%c21, %c0_90] : memref<27x512xf32, #tpu.memory_space<vmem>>, vector<1x512xf32>
    %114 = vector.broadcast %113 : vector<1x512xf32> to vector<8x512xf32>
    %115 = arith.mulf %112, %114 : vector<8x512xf32>
    %c168 = arith.constant 168 : index
    %c0_91 = arith.constant 0 : index
    %116 = vector.load %arg7[%c168, %c0_91] : memref<216x512xf32, #tpu.memory_space<vmem>>, vector<8x512xf32>
    tpu.vector_store %arg7[%c168, %c0_91], %115 {strides = array<i32>} : memref<216x512xf32, #tpu.memory_space<vmem>>, vector<8x512xf32>,
    %c0_92 = arith.constant 0 : index
    %c137 = arith.constant 137 : index
    %117 = vector.load %arg6[%c0_92, %c137] : memref<8x658xf32, #tpu.memory_space<vmem>>, vector<8x512xf32>
    %c22 = arith.constant 22 : index
    %c0_93 = arith.constant 0 : index
    %118 = vector.load %arg4[%c22, %c0_93] : memref<27x512xf32, #tpu.memory_space<vmem>>, vector<1x512xf32>
    %119 = vector.broadcast %118 : vector<1x512xf32> to vector<8x512xf32>
    %120 = arith.mulf %117, %119 : vector<8x512xf32>
    %c176 = arith.constant 176 : index
    %c0_94 = arith.constant 0 : index
    %121 = vector.load %arg7[%c176, %c0_94] : memref<216x512xf32, #tpu.memory_space<vmem>>, vector<8x512xf32>
    tpu.vector_store %arg7[%c176, %c0_94], %120 {strides = array<i32>} : memref<216x512xf32, #tpu.memory_space<vmem>>, vector<8x512xf32>,
    %c0_95 = arith.constant 0 : index
    %c138 = arith.constant 138 : index
    %122 = vector.load %arg6[%c0_95, %c138] : memref<8x658xf32, #tpu.memory_space<vmem>>, vector<8x512xf32>
    %c23 = arith.constant 23 : index
    %c0_96 = arith.constant 0 : index
    %123 = vector.load %arg4[%c23, %c0_96] : memref<27x512xf32, #tpu.memory_space<vmem>>, vector<1x512xf32>
    %124 = vector.broadcast %123 : vector<1x512xf32> to vector<8x512xf32>
    %125 = arith.mulf %122, %124 : vector<8x512xf32>
    %c184 = arith.constant 184 : index
    %c0_97 = arith.constant 0 : index
    %126 = vector.load %arg7[%c184, %c0_97] : memref<216x512xf32, #tpu.memory_space<vmem>>, vector<8x512xf32>
    tpu.vector_store %arg7[%c184, %c0_97], %125 {strides = array<i32>} : memref<216x512xf32, #tpu.memory_space<vmem>>, vector<8x512xf32>,
    %c0_98 = arith.constant 0 : index
    %c144_99 = arith.constant 144 : index
    %127 = vector.load %arg6[%c0_98, %c144_99] : memref<8x658xf32, #tpu.memory_space<vmem>>, vector<8x512xf32>
    %c24_100 = arith.constant 24 : index
    %c0_101 = arith.constant 0 : index
    %128 = vector.load %arg4[%c24_100, %c0_101] : memref<27x512xf32, #tpu.memory_space<vmem>>, vector<1x512xf32>
    %129 = vector.broadcast %128 : vector<1x512xf32> to vector<8x512xf32>
    %130 = arith.mulf %127, %129 : vector<8x512xf32>
    %c192 = arith.constant 192 : index
    %c0_102 = arith.constant 0 : index
    %131 = vector.load %arg7[%c192, %c0_102] : memref<216x512xf32, #tpu.memory_space<vmem>>, vector<8x512xf32>
    tpu.vector_store %arg7[%c192, %c0_102], %130 {strides = array<i32>} : memref<216x512xf32, #tpu.memory_space<vmem>>, vector<8x512xf32>,
    %c0_103 = arith.constant 0 : index
    %c145 = arith.constant 145 : index
    %132 = vector.load %arg6[%c0_103, %c145] : memref<8x658xf32, #tpu.memory_space<vmem>>, vector<8x512xf32>
    %c25 = arith.constant 25 : index
    %c0_104 = arith.constant 0 : index
    %133 = vector.load %arg4[%c25, %c0_104] : memref<27x512xf32, #tpu.memory_space<vmem>>, vector<1x512xf32>
    %134 = vector.broadcast %133 : vector<1x512xf32> to vector<8x512xf32>
    %135 = arith.mulf %132, %134 : vector<8x512xf32>
    %c200 = arith.constant 200 : index
    %c0_105 = arith.constant 0 : index
    %136 = vector.load %arg7[%c200, %c0_105] : memref<216x512xf32, #tpu.memory_space<vmem>>, vector<8x512xf32>
    tpu.vector_store %arg7[%c200, %c0_105], %135 {strides = array<i32>} : memref<216x512xf32, #tpu.memory_space<vmem>>, vector<8x512xf32>,
    %c0_106 = arith.constant 0 : index
    %c146 = arith.constant 146 : index
    %137 = vector.load %arg6[%c0_106, %c146] : memref<8x658xf32, #tpu.memory_space<vmem>>, vector<8x512xf32>
    %c26 = arith.constant 26 : index
    %c0_107 = arith.constant 0 : index
    %138 = vector.load %arg4[%c26, %c0_107] : memref<27x512xf32, #tpu.memory_space<vmem>>, vector<1x512xf32>
    %139 = vector.broadcast %138 : vector<1x512xf32> to vector<8x512xf32>
    %140 = arith.mulf %137, %139 : vector<8x512xf32>
    %c208 = arith.constant 208 : index
    %c0_108 = arith.constant 0 : index
    %141 = vector.load %arg7[%c208, %c0_108] : memref<216x512xf32, #tpu.memory_space<vmem>>, vector<8x512xf32>
    tpu.vector_store %arg7[%c208, %c0_108], %140 {strides = array<i32>} : memref<216x512xf32, #tpu.memory_space<vmem>>, vector<8x512xf32>,
    %c0_109 = arith.constant 0 : index
    %c0_110 = arith.constant 0 : index
    %c0_111 = arith.constant 0 : index
    %142 = vector.load %arg2[%c0_109, %c0_110, %c0_111] : memref<2x8x216xf32, #tpu.memory_space<vmem>>, vector<1x8x216xf32>
    %143 = vector.shape_cast %142 : vector<1x8x216xf32> to vector<8x216xf32>
    %c0_112 = arith.constant 0 : index
    %c0_113 = arith.constant 0 : index
    %144 = vector.load %arg7[%c0_112, %c0_113] : memref<216x512xf32, #tpu.memory_space<vmem>>, vector<216x512xf32>
    %cst_114 = arith.constant dense<0.000000e+00> : vector<8x512xf32>
    %145 = tpu.matmul %143, %144, %cst_114 {dimension_numbers = #tpu.dot_dimension_numbers<[1], [0], [0], [1], [0, 0, 1, 1], [], []>} : vector<8x216xf32>, vector<216x512xf32>, vector<8x512xf32> -> vector<8x512xf32>
    %c0_115 = arith.constant 0 : index
    %c0_116 = arith.constant 0 : index
    %c0_117 = arith.constant 0 : index
    %146 = vector.load %arg3[%c0_115, %c0_116, %c0_117] : memref<2x8x1xf32, #tpu.memory_space<vmem>>, vector<1x8x1xf32>
    %147 = vector.shape_cast %146 : vector<1x8x1xf32> to vector<8x1xf32>
    %148 = vector.broadcast %147 : vector<8x1xf32> to vector<8x512xf32>
    %149 = arith.addf %145, %148 : vector<8x512xf32>
    %cst_118 = arith.constant 0.000000e+00 : f32
    %150 = vector.broadcast %cst_118 : f32 to vector<8x512xf32>
    %151 = arith.maximumf %149, %150 : vector<8x512xf32>
    %c0_119 = arith.constant 0 : index
    %c73_120 = arith.constant 73 : index
    %152 = vector.load %arg6[%c0_119, %c73_120] : memref<8x658xf32, #tpu.memory_space<vmem>>, vector<8x512xf32>
    tpu.vector_store %arg6[%c0_119, %c73_120], %151 {strides = array<i32>} : memref<8x658xf32, #tpu.memory_space<vmem>>, vector<8x512xf32>,
    %c0_121 = arith.constant 0 : index
    %c0_122 = arith.constant 0 : index
    %153 = vector.load %arg6[%c0_121, %c0_122] : memref<8x658xf32, #tpu.memory_space<vmem>>, vector<8x512xf32>
    %c0_123 = arith.constant 0 : index
    %c0_124 = arith.constant 0 : index
    %154 = vector.load %arg4[%c0_123, %c0_124] : memref<27x512xf32, #tpu.memory_space<vmem>>, vector<1x512xf32>
    %155 = vector.broadcast %154 : vector<1x512xf32> to vector<8x512xf32>
    %156 = arith.mulf %153, %155 : vector<8x512xf32>
    %c0_125 = arith.constant 0 : index
    %c0_126 = arith.constant 0 : index
    %157 = vector.load %arg7[%c0_125, %c0_126] : memref<216x512xf32, #tpu.memory_space<vmem>>, vector<8x512xf32>
    tpu.vector_store %arg7[%c0_125, %c0_126], %156 {strides = array<i32>} : memref<216x512xf32, #tpu.memory_space<vmem>>, vector<8x512xf32>,
    %c0_127 = arith.constant 0 : index
    %c1_128 = arith.constant 1 : index
    %158 = vector.load %arg6[%c0_127, %c1_128] : memref<8x658xf32, #tpu.memory_space<vmem>>, vector<8x512xf32>
    %c1_129 = arith.constant 1 : index
    %c0_130 = arith.constant 0 : index
    %159 = vector.load %arg4[%c1_129, %c0_130] : memref<27x512xf32, #tpu.memory_space<vmem>>, vector<1x512xf32>
    %160 = vector.broadcast %159 : vector<1x512xf32> to vector<8x512xf32>
    %161 = arith.mulf %158, %160 : vector<8x512xf32>
    %c8_131 = arith.constant 8 : index
    %c0_132 = arith.constant 0 : index
    %162 = vector.load %arg7[%c8_131, %c0_132] : memref<216x512xf32, #tpu.memory_space<vmem>>, vector<8x512xf32>
    tpu.vector_store %arg7[%c8_131, %c0_132], %161 {strides = array<i32>} : memref<216x512xf32, #tpu.memory_space<vmem>>, vector<8x512xf32>,
    %c0_133 = arith.constant 0 : index
    %c2_134 = arith.constant 2 : index
    %163 = vector.load %arg6[%c0_133, %c2_134] : memref<8x658xf32, #tpu.memory_space<vmem>>, vector<8x512xf32>
    %c2_135 = arith.constant 2 : index
    %c0_136 = arith.constant 0 : index
    %164 = vector.load %arg4[%c2_135, %c0_136] : memref<27x512xf32, #tpu.memory_space<vmem>>, vector<1x512xf32>
    %165 = vector.broadcast %164 : vector<1x512xf32> to vector<8x512xf32>
    %166 = arith.mulf %163, %165 : vector<8x512xf32>
    %c16_137 = arith.constant 16 : index
    %c0_138 = arith.constant 0 : index
    %167 = vector.load %arg7[%c16_137, %c0_138] : memref<216x512xf32, #tpu.memory_space<vmem>>, vector<8x512xf32>
    tpu.vector_store %arg7[%c16_137, %c0_138], %166 {strides = array<i32>} : memref<216x512xf32, #tpu.memory_space<vmem>>, vector<8x512xf32>,
    %c0_139 = arith.constant 0 : index
    %c8_140 = arith.constant 8 : index
    %168 = vector.load %arg6[%c0_139, %c8_140] : memref<8x658xf32, #tpu.memory_space<vmem>>, vector<8x512xf32>
    %c3_141 = arith.constant 3 : index
    %c0_142 = arith.constant 0 : index
    %169 = vector.load %arg4[%c3_141, %c0_142] : memref<27x512xf32, #tpu.memory_space<vmem>>, vector<1x512xf32>
    %170 = vector.broadcast %169 : vector<1x512xf32> to vector<8x512xf32>
    %171 = arith.mulf %168, %170 : vector<8x512xf32>
    %c24_143 = arith.constant 24 : index
    %c0_144 = arith.constant 0 : index
    %172 = vector.load %arg7[%c24_143, %c0_144] : memref<216x512xf32, #tpu.memory_space<vmem>>, vector<8x512xf32>
    tpu.vector_store %arg7[%c24_143, %c0_144], %171 {strides = array<i32>} : memref<216x512xf32, #tpu.memory_space<vmem>>, vector<8x512xf32>,
    %c0_145 = arith.constant 0 : index
    %c9_146 = arith.constant 9 : index
    %173 = vector.load %arg6[%c0_145, %c9_146] : memref<8x658xf32, #tpu.memory_space<vmem>>, vector<8x512xf32>
    %c4_147 = arith.constant 4 : index
    %c0_148 = arith.constant 0 : index
    %174 = vector.load %arg4[%c4_147, %c0_148] : memref<27x512xf32, #tpu.memory_space<vmem>>, vector<1x512xf32>
    %175 = vector.broadcast %174 : vector<1x512xf32> to vector<8x512xf32>
    %176 = arith.mulf %173, %175 : vector<8x512xf32>
    %c32_149 = arith.constant 32 : index
    %c0_150 = arith.constant 0 : index
    %177 = vector.load %arg7[%c32_149, %c0_150] : memref<216x512xf32, #tpu.memory_space<vmem>>, vector<8x512xf32>
    tpu.vector_store %arg7[%c32_149, %c0_150], %176 {strides = array<i32>} : memref<216x512xf32, #tpu.memory_space<vmem>>, vector<8x512xf32>,
    %c0_151 = arith.constant 0 : index
    %c10_152 = arith.constant 10 : index
    %178 = vector.load %arg6[%c0_151, %c10_152] : memref<8x658xf32, #tpu.memory_space<vmem>>, vector<8x512xf32>
    %c5_153 = arith.constant 5 : index
    %c0_154 = arith.constant 0 : index
    %179 = vector.load %arg4[%c5_153, %c0_154] : memref<27x512xf32, #tpu.memory_space<vmem>>, vector<1x512xf32>
    %180 = vector.broadcast %179 : vector<1x512xf32> to vector<8x512xf32>
    %181 = arith.mulf %178, %180 : vector<8x512xf32>
    %c40_155 = arith.constant 40 : index
    %c0_156 = arith.constant 0 : index
    %182 = vector.load %arg7[%c40_155, %c0_156] : memref<216x512xf32, #tpu.memory_space<vmem>>, vector<8x512xf32>
    tpu.vector_store %arg7[%c40_155, %c0_156], %181 {strides = array<i32>} : memref<216x512xf32, #tpu.memory_space<vmem>>, vector<8x512xf32>,
    %c0_157 = arith.constant 0 : index
    %c16_158 = arith.constant 16 : index
    %183 = vector.load %arg6[%c0_157, %c16_158] : memref<8x658xf32, #tpu.memory_space<vmem>>, vector<8x512xf32>
    %c6_159 = arith.constant 6 : index
    %c0_160 = arith.constant 0 : index
    %184 = vector.load %arg4[%c6_159, %c0_160] : memref<27x512xf32, #tpu.memory_space<vmem>>, vector<1x512xf32>
    %185 = vector.broadcast %184 : vector<1x512xf32> to vector<8x512xf32>
    %186 = arith.mulf %183, %185 : vector<8x512xf32>
    %c48_161 = arith.constant 48 : index
    %c0_162 = arith.constant 0 : index
    %187 = vector.load %arg7[%c48_161, %c0_162] : memref<216x512xf32, #tpu.memory_space<vmem>>, vector<8x512xf32>
    tpu.vector_store %arg7[%c48_161, %c0_162], %186 {strides = array<i32>} : memref<216x512xf32, #tpu.memory_space<vmem>>, vector<8x512xf32>,
    %c0_163 = arith.constant 0 : index
    %c17_164 = arith.constant 17 : index
    %188 = vector.load %arg6[%c0_163, %c17_164] : memref<8x658xf32, #tpu.memory_space<vmem>>, vector<8x512xf32>
    %c7_165 = arith.constant 7 : index
    %c0_166 = arith.constant 0 : index
    %189 = vector.load %arg4[%c7_165, %c0_166] : memref<27x512xf32, #tpu.memory_space<vmem>>, vector<1x512xf32>
    %190 = vector.broadcast %189 : vector<1x512xf32> to vector<8x512xf32>
    %191 = arith.mulf %188, %190 : vector<8x512xf32>
    %c56_167 = arith.constant 56 : index
    %c0_168 = arith.constant 0 : index
    %192 = vector.load %arg7[%c56_167, %c0_168] : memref<216x512xf32, #tpu.memory_space<vmem>>, vector<8x512xf32>
    tpu.vector_store %arg7[%c56_167, %c0_168], %191 {strides = array<i32>} : memref<216x512xf32, #tpu.memory_space<vmem>>, vector<8x512xf32>,
    %c0_169 = arith.constant 0 : index
    %c18_170 = arith.constant 18 : index
    %193 = vector.load %arg6[%c0_169, %c18_170] : memref<8x658xf32, #tpu.memory_space<vmem>>, vector<8x512xf32>
    %c8_171 = arith.constant 8 : index
    %c0_172 = arith.constant 0 : index
    %194 = vector.load %arg4[%c8_171, %c0_172] : memref<27x512xf32, #tpu.memory_space<vmem>>, vector<1x512xf32>
    %195 = vector.broadcast %194 : vector<1x512xf32> to vector<8x512xf32>
    %196 = arith.mulf %193, %195 : vector<8x512xf32>
    %c64_173 = arith.constant 64 : index
    %c0_174 = arith.constant 0 : index
    %197 = vector.load %arg7[%c64_173, %c0_174] : memref<216x512xf32, #tpu.memory_space<vmem>>, vector<8x512xf32>
    tpu.vector_store %arg7[%c64_173, %c0_174], %196 {strides = array<i32>} : memref<216x512xf32, #tpu.memory_space<vmem>>, vector<8x512xf32>,
    %c0_175 = arith.constant 0 : index
    %c64_176 = arith.constant 64 : index
    %198 = vector.load %arg6[%c0_175, %c64_176] : memref<8x658xf32, #tpu.memory_space<vmem>>, vector<8x512xf32>
    %c9_177 = arith.constant 9 : index
    %c0_178 = arith.constant 0 : index
    %199 = vector.load %arg4[%c9_177, %c0_178] : memref<27x512xf32, #tpu.memory_space<vmem>>, vector<1x512xf32>
    %200 = vector.broadcast %199 : vector<1x512xf32> to vector<8x512xf32>
    %201 = arith.mulf %198, %200 : vector<8x512xf32>
    %c72_179 = arith.constant 72 : index
    %c0_180 = arith.constant 0 : index
    %202 = vector.load %arg7[%c72_179, %c0_180] : memref<216x512xf32, #tpu.memory_space<vmem>>, vector<8x512xf32>
    tpu.vector_store %arg7[%c72_179, %c0_180], %201 {strides = array<i32>} : memref<216x512xf32, #tpu.memory_space<vmem>>, vector<8x512xf32>,
    %c0_181 = arith.constant 0 : index
    %c65_182 = arith.constant 65 : index
    %203 = vector.load %arg6[%c0_181, %c65_182] : memref<8x658xf32, #tpu.memory_space<vmem>>, vector<8x512xf32>
    %c10_183 = arith.constant 10 : index
    %c0_184 = arith.constant 0 : index
    %204 = vector.load %arg4[%c10_183, %c0_184] : memref<27x512xf32, #tpu.memory_space<vmem>>, vector<1x512xf32>
    %205 = vector.broadcast %204 : vector<1x512xf32> to vector<8x512xf32>
    %206 = arith.mulf %203, %205 : vector<8x512xf32>
    %c80_185 = arith.constant 80 : index
    %c0_186 = arith.constant 0 : index
    %207 = vector.load %arg7[%c80_185, %c0_186] : memref<216x512xf32, #tpu.memory_space<vmem>>, vector<8x512xf32>
    tpu.vector_store %arg7[%c80_185, %c0_186], %206 {strides = array<i32>} : memref<216x512xf32, #tpu.memory_space<vmem>>, vector<8x512xf32>,
    %c0_187 = arith.constant 0 : index
    %c66_188 = arith.constant 66 : index
    %208 = vector.load %arg6[%c0_187, %c66_188] : memref<8x658xf32, #tpu.memory_space<vmem>>, vector<8x512xf32>
    %c11_189 = arith.constant 11 : index
    %c0_190 = arith.constant 0 : index
    %209 = vector.load %arg4[%c11_189, %c0_190] : memref<27x512xf32, #tpu.memory_space<vmem>>, vector<1x512xf32>
    %210 = vector.broadcast %209 : vector<1x512xf32> to vector<8x512xf32>
    %211 = arith.mulf %208, %210 : vector<8x512xf32>
    %c88_191 = arith.constant 88 : index
    %c0_192 = arith.constant 0 : index
    %212 = vector.load %arg7[%c88_191, %c0_192] : memref<216x512xf32, #tpu.memory_space<vmem>>, vector<8x512xf32>
    tpu.vector_store %arg7[%c88_191, %c0_192], %211 {strides = array<i32>} : memref<216x512xf32, #tpu.memory_space<vmem>>, vector<8x512xf32>,
    %c0_193 = arith.constant 0 : index
    %c72_194 = arith.constant 72 : index
    %213 = vector.load %arg6[%c0_193, %c72_194] : memref<8x658xf32, #tpu.memory_space<vmem>>, vector<8x512xf32>
    %c12_195 = arith.constant 12 : index
    %c0_196 = arith.constant 0 : index
    %214 = vector.load %arg4[%c12_195, %c0_196] : memref<27x512xf32, #tpu.memory_space<vmem>>, vector<1x512xf32>
    %215 = vector.broadcast %214 : vector<1x512xf32> to vector<8x512xf32>
    %216 = arith.mulf %213, %215 : vector<8x512xf32>
    %c96_197 = arith.constant 96 : index
    %c0_198 = arith.constant 0 : index
    %217 = vector.load %arg7[%c96_197, %c0_198] : memref<216x512xf32, #tpu.memory_space<vmem>>, vector<8x512xf32>
    tpu.vector_store %arg7[%c96_197, %c0_198], %216 {strides = array<i32>} : memref<216x512xf32, #tpu.memory_space<vmem>>, vector<8x512xf32>,
    %c0_199 = arith.constant 0 : index
    %c73_200 = arith.constant 73 : index
    %218 = vector.load %arg6[%c0_199, %c73_200] : memref<8x658xf32, #tpu.memory_space<vmem>>, vector<8x512xf32>
    %c13_201 = arith.constant 13 : index
    %c0_202 = arith.constant 0 : index
    %219 = vector.load %arg4[%c13_201, %c0_202] : memref<27x512xf32, #tpu.memory_space<vmem>>, vector<1x512xf32>
    %220 = vector.broadcast %219 : vector<1x512xf32> to vector<8x512xf32>
    %221 = arith.mulf %218, %220 : vector<8x512xf32>
    %c104_203 = arith.constant 104 : index
    %c0_204 = arith.constant 0 : index
    %222 = vector.load %arg7[%c104_203, %c0_204] : memref<216x512xf32, #tpu.memory_space<vmem>>, vector<8x512xf32>
    tpu.vector_store %arg7[%c104_203, %c0_204], %221 {strides = array<i32>} : memref<216x512xf32, #tpu.memory_space<vmem>>, vector<8x512xf32>,
    %c0_205 = arith.constant 0 : index
    %c74_206 = arith.constant 74 : index
    %223 = vector.load %arg6[%c0_205, %c74_206] : memref<8x658xf32, #tpu.memory_space<vmem>>, vector<8x512xf32>
    %c14_207 = arith.constant 14 : index
    %c0_208 = arith.constant 0 : index
    %224 = vector.load %arg4[%c14_207, %c0_208] : memref<27x512xf32, #tpu.memory_space<vmem>>, vector<1x512xf32>
    %225 = vector.broadcast %224 : vector<1x512xf32> to vector<8x512xf32>
    %226 = arith.mulf %223, %225 : vector<8x512xf32>
    %c112_209 = arith.constant 112 : index
    %c0_210 = arith.constant 0 : index
    %227 = vector.load %arg7[%c112_209, %c0_210] : memref<216x512xf32, #tpu.memory_space<vmem>>, vector<8x512xf32>
    tpu.vector_store %arg7[%c112_209, %c0_210], %226 {strides = array<i32>} : memref<216x512xf32, #tpu.memory_space<vmem>>, vector<8x512xf32>,
    %c0_211 = arith.constant 0 : index
    %c80_212 = arith.constant 80 : index
    %228 = vector.load %arg6[%c0_211, %c80_212] : memref<8x658xf32, #tpu.memory_space<vmem>>, vector<8x512xf32>
    %c15_213 = arith.constant 15 : index
    %c0_214 = arith.constant 0 : index
    %229 = vector.load %arg4[%c15_213, %c0_214] : memref<27x512xf32, #tpu.memory_space<vmem>>, vector<1x512xf32>
    %230 = vector.broadcast %229 : vector<1x512xf32> to vector<8x512xf32>
    %231 = arith.mulf %228, %230 : vector<8x512xf32>
    %c120_215 = arith.constant 120 : index
    %c0_216 = arith.constant 0 : index
    %232 = vector.load %arg7[%c120_215, %c0_216] : memref<216x512xf32, #tpu.memory_space<vmem>>, vector<8x512xf32>
    tpu.vector_store %arg7[%c120_215, %c0_216], %231 {strides = array<i32>} : memref<216x512xf32, #tpu.memory_space<vmem>>, vector<8x512xf32>,
    %c0_217 = arith.constant 0 : index
    %c81_218 = arith.constant 81 : index
    %233 = vector.load %arg6[%c0_217, %c81_218] : memref<8x658xf32, #tpu.memory_space<vmem>>, vector<8x512xf32>
    %c16_219 = arith.constant 16 : index
    %c0_220 = arith.constant 0 : index
    %234 = vector.load %arg4[%c16_219, %c0_220] : memref<27x512xf32, #tpu.memory_space<vmem>>, vector<1x512xf32>
    %235 = vector.broadcast %234 : vector<1x512xf32> to vector<8x512xf32>
    %236 = arith.mulf %233, %235 : vector<8x512xf32>
    %c128_221 = arith.constant 128 : index
    %c0_222 = arith.constant 0 : index
    %237 = vector.load %arg7[%c128_221, %c0_222] : memref<216x512xf32, #tpu.memory_space<vmem>>, vector<8x512xf32>
    tpu.vector_store %arg7[%c128_221, %c0_222], %236 {strides = array<i32>} : memref<216x512xf32, #tpu.memory_space<vmem>>, vector<8x512xf32>,
    %c0_223 = arith.constant 0 : index
    %c82_224 = arith.constant 82 : index
    %238 = vector.load %arg6[%c0_223, %c82_224] : memref<8x658xf32, #tpu.memory_space<vmem>>, vector<8x512xf32>
    %c17_225 = arith.constant 17 : index
    %c0_226 = arith.constant 0 : index
    %239 = vector.load %arg4[%c17_225, %c0_226] : memref<27x512xf32, #tpu.memory_space<vmem>>, vector<1x512xf32>
    %240 = vector.broadcast %239 : vector<1x512xf32> to vector<8x512xf32>
    %241 = arith.mulf %238, %240 : vector<8x512xf32>
    %c136_227 = arith.constant 136 : index
    %c0_228 = arith.constant 0 : index
    %242 = vector.load %arg7[%c136_227, %c0_228] : memref<216x512xf32, #tpu.memory_space<vmem>>, vector<8x512xf32>
    tpu.vector_store %arg7[%c136_227, %c0_228], %241 {strides = array<i32>} : memref<216x512xf32, #tpu.memory_space<vmem>>, vector<8x512xf32>,
    %c0_229 = arith.constant 0 : index
    %c128_230 = arith.constant 128 : index
    %243 = vector.load %arg6[%c0_229, %c128_230] : memref<8x658xf32, #tpu.memory_space<vmem>>, vector<8x512xf32>
    %c18_231 = arith.constant 18 : index
    %c0_232 = arith.constant 0 : index
    %244 = vector.load %arg4[%c18_231, %c0_232] : memref<27x512xf32, #tpu.memory_space<vmem>>, vector<1x512xf32>
    %245 = vector.broadcast %244 : vector<1x512xf32> to vector<8x512xf32>
    %246 = arith.mulf %243, %245 : vector<8x512xf32>
    %c144_233 = arith.constant 144 : index
    %c0_234 = arith.constant 0 : index
    %247 = vector.load %arg7[%c144_233, %c0_234] : memref<216x512xf32, #tpu.memory_space<vmem>>, vector<8x512xf32>
    tpu.vector_store %arg7[%c144_233, %c0_234], %246 {strides = array<i32>} : memref<216x512xf32, #tpu.memory_space<vmem>>, vector<8x512xf32>,
    %c0_235 = arith.constant 0 : index
    %c129_236 = arith.constant 129 : index
    %248 = vector.load %arg6[%c0_235, %c129_236] : memref<8x658xf32, #tpu.memory_space<vmem>>, vector<8x512xf32>
    %c19_237 = arith.constant 19 : index
    %c0_238 = arith.constant 0 : index
    %249 = vector.load %arg4[%c19_237, %c0_238] : memref<27x512xf32, #tpu.memory_space<vmem>>, vector<1x512xf32>
    %250 = vector.broadcast %249 : vector<1x512xf32> to vector<8x512xf32>
    %251 = arith.mulf %248, %250 : vector<8x512xf32>
    %c152_239 = arith.constant 152 : index
    %c0_240 = arith.constant 0 : index
    %252 = vector.load %arg7[%c152_239, %c0_240] : memref<216x512xf32, #tpu.memory_space<vmem>>, vector<8x512xf32>
    tpu.vector_store %arg7[%c152_239, %c0_240], %251 {strides = array<i32>} : memref<216x512xf32, #tpu.memory_space<vmem>>, vector<8x512xf32>,
    %c0_241 = arith.constant 0 : index
    %c130_242 = arith.constant 130 : index
    %253 = vector.load %arg6[%c0_241, %c130_242] : memref<8x658xf32, #tpu.memory_space<vmem>>, vector<8x512xf32>
    %c20_243 = arith.constant 20 : index
    %c0_244 = arith.constant 0 : index
    %254 = vector.load %arg4[%c20_243, %c0_244] : memref<27x512xf32, #tpu.memory_space<vmem>>, vector<1x512xf32>
    %255 = vector.broadcast %254 : vector<1x512xf32> to vector<8x512xf32>
    %256 = arith.mulf %253, %255 : vector<8x512xf32>
    %c160_245 = arith.constant 160 : index
    %c0_246 = arith.constant 0 : index
    %257 = vector.load %arg7[%c160_245, %c0_246] : memref<216x512xf32, #tpu.memory_space<vmem>>, vector<8x512xf32>
    tpu.vector_store %arg7[%c160_245, %c0_246], %256 {strides = array<i32>} : memref<216x512xf32, #tpu.memory_space<vmem>>, vector<8x512xf32>,
    %c0_247 = arith.constant 0 : index
    %c136_248 = arith.constant 136 : index
    %258 = vector.load %arg6[%c0_247, %c136_248] : memref<8x658xf32, #tpu.memory_space<vmem>>, vector<8x512xf32>
    %c21_249 = arith.constant 21 : index
    %c0_250 = arith.constant 0 : index
    %259 = vector.load %arg4[%c21_249, %c0_250] : memref<27x512xf32, #tpu.memory_space<vmem>>, vector<1x512xf32>
    %260 = vector.broadcast %259 : vector<1x512xf32> to vector<8x512xf32>
    %261 = arith.mulf %258, %260 : vector<8x512xf32>
    %c168_251 = arith.constant 168 : index
    %c0_252 = arith.constant 0 : index
    %262 = vector.load %arg7[%c168_251, %c0_252] : memref<216x512xf32, #tpu.memory_space<vmem>>, vector<8x512xf32>
    tpu.vector_store %arg7[%c168_251, %c0_252], %261 {strides = array<i32>} : memref<216x512xf32, #tpu.memory_space<vmem>>, vector<8x512xf32>,
    %c0_253 = arith.constant 0 : index
    %c137_254 = arith.constant 137 : index
    %263 = vector.load %arg6[%c0_253, %c137_254] : memref<8x658xf32, #tpu.memory_space<vmem>>, vector<8x512xf32>
    %c22_255 = arith.constant 22 : index
    %c0_256 = arith.constant 0 : index
    %264 = vector.load %arg4[%c22_255, %c0_256] : memref<27x512xf32, #tpu.memory_space<vmem>>, vector<1x512xf32>
    %265 = vector.broadcast %264 : vector<1x512xf32> to vector<8x512xf32>
    %266 = arith.mulf %263, %265 : vector<8x512xf32>
    %c176_257 = arith.constant 176 : index
    %c0_258 = arith.constant 0 : index
    %267 = vector.load %arg7[%c176_257, %c0_258] : memref<216x512xf32, #tpu.memory_space<vmem>>, vector<8x512xf32>
    tpu.vector_store %arg7[%c176_257, %c0_258], %266 {strides = array<i32>} : memref<216x512xf32, #tpu.memory_space<vmem>>, vector<8x512xf32>,
    %c0_259 = arith.constant 0 : index
    %c138_260 = arith.constant 138 : index
    %268 = vector.load %arg6[%c0_259, %c138_260] : memref<8x658xf32, #tpu.memory_space<vmem>>, vector<8x512xf32>
    %c23_261 = arith.constant 23 : index
    %c0_262 = arith.constant 0 : index
    %269 = vector.load %arg4[%c23_261, %c0_262] : memref<27x512xf32, #tpu.memory_space<vmem>>, vector<1x512xf32>
    %270 = vector.broadcast %269 : vector<1x512xf32> to vector<8x512xf32>
    %271 = arith.mulf %268, %270 : vector<8x512xf32>
    %c184_263 = arith.constant 184 : index
    %c0_264 = arith.constant 0 : index
    %272 = vector.load %arg7[%c184_263, %c0_264] : memref<216x512xf32, #tpu.memory_space<vmem>>, vector<8x512xf32>
    tpu.vector_store %arg7[%c184_263, %c0_264], %271 {strides = array<i32>} : memref<216x512xf32, #tpu.memory_space<vmem>>, vector<8x512xf32>,
    %c0_265 = arith.constant 0 : index
    %c144_266 = arith.constant 144 : index
    %273 = vector.load %arg6[%c0_265, %c144_266] : memref<8x658xf32, #tpu.memory_space<vmem>>, vector<8x512xf32>
    %c24_267 = arith.constant 24 : index
    %c0_268 = arith.constant 0 : index
    %274 = vector.load %arg4[%c24_267, %c0_268] : memref<27x512xf32, #tpu.memory_space<vmem>>, vector<1x512xf32>
    %275 = vector.broadcast %274 : vector<1x512xf32> to vector<8x512xf32>
    %276 = arith.mulf %273, %275 : vector<8x512xf32>
    %c192_269 = arith.constant 192 : index
    %c0_270 = arith.constant 0 : index
    %277 = vector.load %arg7[%c192_269, %c0_270] : memref<216x512xf32, #tpu.memory_space<vmem>>, vector<8x512xf32>
    tpu.vector_store %arg7[%c192_269, %c0_270], %276 {strides = array<i32>} : memref<216x512xf32, #tpu.memory_space<vmem>>, vector<8x512xf32>,
    %c0_271 = arith.constant 0 : index
    %c145_272 = arith.constant 145 : index
    %278 = vector.load %arg6[%c0_271, %c145_272] : memref<8x658xf32, #tpu.memory_space<vmem>>, vector<8x512xf32>
    %c25_273 = arith.constant 25 : index
    %c0_274 = arith.constant 0 : index
    %279 = vector.load %arg4[%c25_273, %c0_274] : memref<27x512xf32, #tpu.memory_space<vmem>>, vector<1x512xf32>
    %280 = vector.broadcast %279 : vector<1x512xf32> to vector<8x512xf32>
    %281 = arith.mulf %278, %280 : vector<8x512xf32>
    %c200_275 = arith.constant 200 : index
    %c0_276 = arith.constant 0 : index
    %282 = vector.load %arg7[%c200_275, %c0_276] : memref<216x512xf32, #tpu.memory_space<vmem>>, vector<8x512xf32>
    tpu.vector_store %arg7[%c200_275, %c0_276], %281 {strides = array<i32>} : memref<216x512xf32, #tpu.memory_space<vmem>>, vector<8x512xf32>,
    %c0_277 = arith.constant 0 : index
    %c146_278 = arith.constant 146 : index
    %283 = vector.load %arg6[%c0_277, %c146_278] : memref<8x658xf32, #tpu.memory_space<vmem>>, vector<8x512xf32>
    %c26_279 = arith.constant 26 : index
    %c0_280 = arith.constant 0 : index
    %284 = vector.load %arg4[%c26_279, %c0_280] : memref<27x512xf32, #tpu.memory_space<vmem>>, vector<1x512xf32>
    %285 = vector.broadcast %284 : vector<1x512xf32> to vector<8x512xf32>
    %286 = arith.mulf %283, %285 : vector<8x512xf32>
    %c208_281 = arith.constant 208 : index
    %c0_282 = arith.constant 0 : index
    %287 = vector.load %arg7[%c208_281, %c0_282] : memref<216x512xf32, #tpu.memory_space<vmem>>, vector<8x512xf32>
    tpu.vector_store %arg7[%c208_281, %c0_282], %286 {strides = array<i32>} : memref<216x512xf32, #tpu.memory_space<vmem>>, vector<8x512xf32>,
    %c1_283 = arith.constant 1 : index
    %c0_284 = arith.constant 0 : index
    %c0_285 = arith.constant 0 : index
    %288 = vector.load %arg2[%c1_283, %c0_284, %c0_285] : memref<2x8x216xf32, #tpu.memory_space<vmem>>, vector<1x8x216xf32>
    %289 = vector.shape_cast %288 : vector<1x8x216xf32> to vector<8x216xf32>
    %c0_286 = arith.constant 0 : index
    %c0_287 = arith.constant 0 : index
    %290 = vector.load %arg7[%c0_286, %c0_287] : memref<216x512xf32, #tpu.memory_space<vmem>>, vector<216x512xf32>
    %cst_288 = arith.constant dense<0.000000e+00> : vector<8x512xf32>
    %291 = tpu.matmul %289, %290, %cst_288 {dimension_numbers = #tpu.dot_dimension_numbers<[1], [0], [0], [1], [0, 0, 1, 1], [], []>} : vector<8x216xf32>, vector<216x512xf32>, vector<8x512xf32> -> vector<8x512xf32>
    %c1_289 = arith.constant 1 : index
    %c0_290 = arith.constant 0 : index
    %c0_291 = arith.constant 0 : index
    %292 = vector.load %arg3[%c1_289, %c0_290, %c0_291] : memref<2x8x1xf32, #tpu.memory_space<vmem>>, vector<1x8x1xf32>
    %293 = vector.shape_cast %292 : vector<1x8x1xf32> to vector<8x1xf32>
    %294 = vector.broadcast %293 : vector<8x1xf32> to vector<8x512xf32>
    %295 = arith.addf %291, %294 : vector<8x512xf32>
    %c0_292 = arith.constant 0 : index
    %c0_293 = arith.constant 0 : index
    %c0_294 = arith.constant 0 : index
    %296 = vector.load %arg1[%c0_292, %c0_293, %c0_294] : memref<1x8x512xf32, #tpu.memory_space<vmem>>, vector<1x8x512xf32>
    %297 = vector.shape_cast %296 : vector<1x8x512xf32> to vector<8x512xf32>
    %298 = arith.addf %295, %297 : vector<8x512xf32>
    %cst_295 = arith.constant 0.000000e+00 : f32
    %299 = vector.broadcast %cst_295 : f32 to vector<8x512xf32>
    %300 = arith.maximumf %298, %299 : vector<8x512xf32>
    %c0_296 = arith.constant 0 : index
    %c0_297 = arith.constant 0 : index
    %c0_298 = arith.constant 0 : index
    %301 = vector.load %arg5[%c0_296, %c0_297, %c0_298] : memref<1x8x512xf32, #tpu.memory_space<vmem>>, vector<1x8x512xf32>
    %302 = vector.shape_cast %301 : vector<1x8x512xf32> to vector<8x512xf32>
    %303 = vector.shape_cast %300 : vector<8x512xf32> to vector<1x8x512xf32>
    tpu.vector_store %arg5[%c0_296, %c0_297, %c0_298], %303 {strides = array<i32>} : memref<1x8x512xf32, #tpu.memory_space<vmem>>, vector<1x8x512xf32>,
    return
  }
  func.func @transform_0(%arg0: i32) -> (i32, i32, i32) {
    %c0_i32 = arith.constant 0 : i32
    %c0_i32_0 = arith.constant 0 : i32
    %c0_i32_1 = arith.constant 0 : i32
    return %arg0, %c0_i32, %c0_i32_0 : i32, i32, i32
  }
  func.func @transform_1(%arg0: i32) -> (i32, i32, i32) {
    %c0_i32 = arith.constant 0 : i32
    %c0_i32_0 = arith.constant 0 : i32
    %c0_i32_1 = arith.constant 0 : i32
    %c0_i32_2 = arith.constant 0 : i32
    return %c0_i32, %c0_i32_0, %c0_i32_1 : i32, i32, i32
  }
  func.func @transform_2(%arg0: i32) -> (i32, i32, i32) {
    %c0_i32 = arith.constant 0 : i32
    %c0_i32_0 = arith.constant 0 : i32
    %c0_i32_1 = arith.constant 0 : i32
    %c0_i32_2 = arith.constant 0 : i32
    return %c0_i32, %c0_i32_0, %c0_i32_1 : i32, i32, i32
  }
  func.func @transform_3(%arg0: i32) -> (i32, i32) {
    %c0_i32 = arith.constant 0 : i32
    %c0_i32_0 = arith.constant 0 : i32
    %c0_i32_1 = arith.constant 0 : i32
    return %c0_i32, %c0_i32_0 : i32, i32
  }
  func.func @transform_4(%arg0: i32) -> (i32, i32, i32) {
    %c0_i32 = arith.constant 0 : i32
    %c0_i32_0 = arith.constant 0 : i32
    %c0_i32_1 = arith.constant 0 : i32
    return %arg0, %c0_i32, %c0_i32_0 : i32, i32, i32
  }
}

</mosaic_0001>

<bundles_post_ra>
// kernel: tpu_custom_call.1
= control target key start
LH: loop header
LB: loop body
LE: loop exit
PB: predicated region body
PF: predicated region fallthrough
CT: control target
= control target key end

     0   :  { %9 = vsyncpa [#allocation5], 0  ;;  %s7441_s0 = inlined_call_operand.hbm [shape: f32[2,8,512], index: 0, kind: input, shape index: {}]   ;;  %s7442_s1 = inlined_call_operand.hbm [shape: f32[2,8,216], index: 1, kind: input, shape index: {}]   ;;  %s7443_s2 = inlined_call_operand.vmem [shape: f32[2,8,1], index: 2, kind: input, shape index: {}]   ;;  %s7444_s3 = inlined_call_operand.hbm [shape: f32[27,512], index: 3, kind: input, shape index: {}]   ;;  %s7445_s4 = inlined_call_operand.hbm [shape: f32[2,8,512], index: 4, kind: output, shape index: {}]  }
   0x1   :  { %11 = vsyncpa [#allocation5 + $0x1], 0 }
   0x2   :  { %12 = vsyncpa [#allocation8], 0 }
   0x3   :  { %13 = vsyncpa [#allocation6], 0 }
   0x4   :  { %15 = vsyncpa [#allocation6 + $0x1], 0  ;;  %s5050_s15 = smov 0   ;;  %s5052_s16 = smov 0  }
   0x5   :  { %s5054_s17 = smov 0   ;;  %s5056_s18 = smov 0  }
   0x6 LB: > { %s5071_s19 = sadd.s32 4294967295, %s4980_s18   ;;  %s4695_s20 = sadd.s32 4294967294, %s4980_s18   ;;  %s4980_s18 = sphi %s5056_s18, %s7747_s18   ;;  %s4976_s17 = sphi %s5054_s17, %s7746_s17   ;;  %s4972_s16 = sphi %s5052_s16, %s7745_s16   ;;  %s4968_s15 = sphi %s5050_s15, %s7744_s15  }
   0x7   : > { %p41_p0 = scmp.ne.s32.totalorder %s4972_s16, %s4968_s15  ;;  %p7446_p1 = scmp.eq.s32.totalorder %s5071_s19, 0 }
   0x8   : > { %p134_p3 = scmp.eq.s32.totalorder %s4695_s20, 1  ;;  %p4696_p5 = scmp.ge.s32.totalorder %s4980_s18, 1 }
   0x9   : > { %p5080_p4 = por %p7446_p1, %p41_p0  ;;  %p141_p7 = scmp.lt.s32.totalorder %s4980_s18, 3 }
   0xa   : > { %p5085_p6 = por %p134_p3, %p41_p0  ;;  %s4982_s24 = smov [#allocation7]  }
   0xb   : > { %s7544_s21 = scalar_select %p5080_p4, 1, 0 }
   0xc   : > { %s7545_s22 = scalar_select %p5085_p6, 1, 0 }
   0xd   : > { %p5090_p8 = pnand %p4696_p5, %p141_p7  ;;  %s153_s25 = sshll.u32 %s4982_s24, 4  ;;  %s154_s25 = int_to_ptr.vmem [resolvable:$true] %s153_s25 }
   0xe   : > { %s4983_s27 = smov [#allocation9]   ;;  %s4843_s29 = scalar_lea.vmem %s154_s25, 512 }
   0xf   : > { %s7546_s23 = scalar_select %p5090_p8, 1, 0 }
  0x10   : > { %p4732_p9 = pneg %p5090_p8  ;;  %s169_s28 = sshll.u32 %s4983_s27, 4  ;;  %s170_s28 = int_to_ptr.vmem [resolvable:$true] %s169_s28 }
  0x11   : > { %p4844_p13 = scmp.ne.s32.totalorder %s154_s25, %s4843_s29  ;;  %p4851_p5 = scmp.lt.s32.totalorder %s154_s25, %s154_s25 }
  0x12   : > { %p5099_p11 = pnand %p4732_p9, %p7446_p1  ;;  %p4852_p7 = scmp.lt.s32.totalorder %s4843_s29, %s4843_s29 }
  0x14   : > { %p4834_p12 = pneg %p5099_p11  ;;  %p4853_p10 = por %p4852_p7, %p4851_p5 }
  0x16   : > { %p4846_p0 = pnand %p4844_p13, %p4834_p12 }
  0x18   : > { %p4847_p3 = pneg %p4846_p0 }
  0x1a   : > { %p4854_p9 = pnand %p4853_p10, %p4847_p3 }
  0x1c   : > { %4857 = shalt.err (!%p4854_p9)
}
  0x1d   : > { %s4984_s30 = smov 256   ;;  %s4985_s5 = smov 16  }
  0x1e   : > { %4735 = dma.hbm_to_vmem [thread:$0]  (!%p5099_p11), %s7442_s1, 512, %s154_s25, [#allocation8], %s4984_s30, %s4984_s30, %s4985_s5  }
  0x1f   : > { %s4869_s8 = scalar_lea.vmem %s170_s28, 2048  ;;  %p4877_p2 = scmp.lt.s32.totalorder %s170_s28, %s170_s28 }
  0x20   : > { %p4870_p1 = scmp.ne.s32.totalorder %s170_s28, %s4869_s8  ;;  %p4878_p6 = scmp.lt.s32.totalorder %s4869_s8, %s4869_s8 }
  0x22   : > { %p4872_p13 = pnand %p4870_p1, %p4834_p12  ;;  %p4879_p5 = por %p4878_p6, %p4877_p2 }
  0x24   : > { %p4873_p0 = pneg %p4872_p13 }
  0x26   : > { %p4880_p10 = pnand %p4879_p5, %p4873_p0 }
  0x28   : > { %4883 = shalt.err (!%p4880_p10)
}
  0x29   : > { %s4986_s9 = smov 512   ;;  %s4987_s10 = smov 32  }
  0x2a   : > { %4738 = dma.hbm_to_vmem [thread:$0]  (!%p5099_p11), %s7444_s3, 2048, %s170_s28, [#allocation8], %s4986_s9, %s4986_s9, %s4987_s10  }
  0x2b   : > { %s5122_s13 = sadd.s32 1, %s4980_s18   ;;  %s28_s20 = sadd.s32 1, %s4976_s17 }
  0x2c   : > { %s25_s14 = ssub.s32 %s4980_s18, %s5122_s13  ;;  %p35_p2 = scmp.ne.s32.totalorder %s4976_s17, %s4972_s16 }
  0x2d   : > { %p26_p1 = scmp.eq.s32.totalorder %s25_s14, 0  ;;  %p36_p6 = scmp.eq.s32.totalorder %s4980_s18, 0 }
  0x2e   : > { %p7548_p3 = scmp.eq.s32.totalorder %s5071_s19, 1  ;;  %p4749_p9 = scmp.lt.s32.totalorder %s4980_s18, 2 }
  0x2f   : > { %s5131_s24 = scalar_select %p26_p1, %s4976_s17, %s28_s20  }
  0x30   : > { %p37_p12 = por %p36_p6, %p35_p2  ;;  %p5135_p7 = por %p7548_p3, %p35_p2 }
  0x31   : > { %s183_s26 = sand.u32 1, %s4976_s17   ;;  %s4718_s28 = sshll.u32 %s4980_s18, 9 }
  0x32   : > { %s7549_s25 = scalar_select %p5135_p7, 1, 0 }
  0x33   : > { %s4700_s27 = sshll.u32 %s183_s26, 5  ;;  %s5145_s5 = scalar_lea.hbm %s7441_s0, %s4718_s28 }
  0x34   : > { %s187_s6 = scalar_lea.vmem [#allocation4], %s4700_s27  ;;  %p5147_p11 = pnand %p4749_p9, %p37_p12 }
  0x35   : > { %s195_s7 = sshll.u32 %s187_s6, 4  ;;  %s184_s9 = scalar_lea.sflag [#allocation5], %s183_s26  ;;  %s196_s7 = int_to_ptr.vmem [resolvable:$true] %s195_s7 }
  0x36   : > { %s4884_s10 = scalar_lea.hbm %s5145_s5, 512  ;;  %p4886_p0 = pneg %p5147_p11 }
  0x37   : > { %p4885_p13 = scmp.ne.s32.totalorder %s5145_s5, %s4884_s10  ;;  %s4889_s14 = scalar_lea.hbm %s7441_s0, 1024 }
  0x38   : > { %p4890_p1 = scmp.lt.s32.totalorder %s5145_s5, %s7441_s0  ;;  %p4891_p2 = scmp.lt.s32.totalorder %s4889_s14, %s4884_s10 }
  0x39   : > { %p4887_p5 = pnand %p4886_p0, %p4885_p13 }
  0x3a   : > { %p4892_p6 = por %p4891_p2, %p4890_p1 }
  0x3b   : > { %p4888_p10 = pneg %p4887_p5 }
  0x3d   : > { %p4893_p12 = pnand %p4892_p6, %p4888_p10 }
  0x3f   : > { %4896 = shalt.err (!%p4893_p12)
}
  0x40   : > { %s4897_s28 = scalar_lea.vmem %s196_s7, 512  ;;  %s4988_s26 = smov [#allocation4]  }
  0x41   : > { %p4898_p3 = scmp.ne.s32.totalorder %s196_s7, %s4897_s28  ;;  %s4902_s29 = sshll.u32 %s4988_s26, 4  ;;  %s4903_s29 = int_to_ptr.vmem [resolvable:$false] %s4902_s29 }
  0x42   : > { %s4904_s30 = scalar_lea.vmem %s4903_s29, 1024  ;;  %p4905_p13 = scmp.lt.s32.totalorder %s196_s7, %s4903_s29 }
  0x43   : > { %p4900_p9 = pnand %p4898_p3, %p4886_p0  ;;  %p4906_p5 = scmp.lt.s32.totalorder %s4904_s30, %s4897_s28 }
  0x45   : > { %p4901_p7 = pneg %p4900_p9  ;;  %p4907_p4 = por %p4906_p5, %p4905_p13 }
  0x47   : > { %p4908_p8 = pnand %p4907_p4, %p4901_p7 }
  0x49   : > { %4911 = shalt.err (!%p4908_p8)
}
  0x4a   : > { %4742 = dma.hbm_to_vmem [thread:$0]  (!%p5147_p11), %s5145_s5, 512, %s196_s7, %s184_s9  }
  0x4b   : > { %p7551_p10 = scmp.ne.s32.totalorder %s7546_s23, 0 }
  0x4d   : > { %204 = sbr.rel (%p7551_p10) target bundleno = 1945 (0x799), region = 36 }
  0x52   : > { %s5168_s6 = sand.u32 1, %s4972_s16   ;;  %p7552_p4 = scmp.ne.s32.totalorder %s7544_s21, 0 }
  0x53   : > { %s7450_s10 = sshll.u32 %s5168_s6, 5  ;;  %s207_s11 = scalar_lea.sflag [#allocation5], %s5168_s6 }
  0x54   : > { %s5174_s12 = scalar_lea.vmem [#allocation4], %s7450_s10 }
  0x55   : > { %4955 = dma.done.wait (%p7552_p4), %s207_s11, 512  }
  0x56   : > { %4957 = vsyncadd (%p7552_p4), %s207_s11, 4294966784  ;;  %p7553_p8 = scmp.eq.s32.totalorder %s5071_s19, 0 }
  0x58   : > { %4959 = dma.done.wait (%p7553_p8), [#allocation8], 2560   ;;  %p7554_p7 = pmov %p7553_p8 }
  0x59   : > { %v284_v0 = vlaneseq  ;;  %vm243_vm0 = vcmask 596992   ;;  %vm245_vm1 = vcmask 1048136   ;;  %v4989_v1 = vmov 0.0   ;;  %v251_v3 = vld [vmem:[%s5174_s12 + $0x10] sm:$0xff]  ;;  %v249_v4 = vld [vmem:[%s5174_s12] sm:$0xff]  ;;  %s4990_s21 = smov 73  }
  0x5a   : > { %4961 = vsyncadd (%p7554_p7), [#allocation8], 4294964736  ;;  %244 = vst.msk [vmem:[#allocation2] sm:$0xff] %vm243_vm0, %v4989_v1  ;;  %261 = vrot.lane.b32.xlu1 %v251_v3, %s4990_s21  ;;  %257 = vrot.lane.b32.xlu0 %v249_v4, %s4990_s21  ;;  %v252_v7 = vld [vmem:[%s5174_s12 + $0x18] sm:$0xff]  ;;  %v250_v8 = vld [vmem:[%s5174_s12 + $0x8] sm:$0xff]  ;;  %s7451_s23 = smov 1  }
  0x5b   : > { %246 = vst.msk [vmem:[#allocation2 + $0x20] sm:$0xff] %vm245_vm1, %v4989_v1  ;;  %v285_v2 = vshrl.u32 %v284_v0, 7  ;;  %v318_v9 = vld [vmem:[#allocation9 + $0x1] ss:$8 sm:$0xf]  ;;  %s4992_s5 = smov 2  }
  0x5c   : > { %v392_v16 = vld [vmem:[#allocation9 + $0x2] ss:$8 sm:$0xf]  ;;  %v466_v21 = vld [vmem:[#allocation9 + $0x3] ss:$8 sm:$0xf] }
  0x5d   : > { %v5192_v5 = vsub.s32 1, %v285_v2  ;;  %v5194_v6 = vsub.s32 0, %v285_v2  ;;  %v5202_v12 = vsub.s32 3, %v285_v2  ;;  %v5204_v13 = vsub.s32 2, %v285_v2  ;;  %s4993_s7 = smov 8   ;;  %s4994_s8 = smov 9  }
  0x5e   : > { %263 = vrot.lane.b32.xlu1 %v252_v7, %s4990_s21  ;;  %259 = vrot.lane.b32.xlu0 %v250_v8, %s4990_s21  ;;  %v540_v26 = vld [vmem:[#allocation9 + $0x4] ss:$8 sm:$0xf]  ;;  %v614_v31 = vld [vmem:[#allocation9 + $0x5] ss:$8 sm:$0xf] }
  0x5f   : > { %7555 = vst [vmem:[#allocation14_spill] sm:$0xff] %v5192_v5  ;;  %7556 = vst [vmem:[#allocation15_spill] sm:$0xff] %v5194_v6  ;;  %v327_v10 = vrot.slane %v318_v9, %v5192_v5  ;;  %v323_v11 = vrot.slane %v318_v9, %v5194_v6  ;;  %v335_v14 = vrot.slane %v318_v9, %v5202_v12  ;;  %s4995_s9 = smov 10   ;;  %v688_v36 = vld [vmem:[#allocation9 + $0x6] ss:$8 sm:$0xf] }
  0x60   : > { %7557 = vst [vmem:[#allocation16_spill] sm:$0xff] %v5204_v13  ;;  %v331_v15 = vrot.slane %v318_v9, %v5204_v13  ;;  %v397_v17 = vrot.slane %v392_v16, %v5194_v6  ;;  %v401_v18 = vrot.slane %v392_v16, %v5192_v5  ;;  %v405_v19 = vrot.slane %v392_v16, %v5204_v13  ;;  %s7467_s14 = smov 16   ;;  %v762_v41 = vld [vmem:[#allocation9 + $0x7] ss:$8 sm:$0xf]  ;;  %s7469_s20 = smov 17  }
  0x61   : > { %v409_v20 = vrot.slane %v392_v16, %v5202_v12  ;;  %v475_v22 = vrot.slane %v466_v21, %v5192_v5  ;;  %v471_v23 = vrot.slane %v466_v21, %v5194_v6  ;;  %v483_v24 = vrot.slane %v466_v21, %v5202_v12  ;;  %v5258_v46 = vld [vmem:[#allocation9 + $0x20] ss:$8 sm:$0xf]  ;;  %s7472_s27 = smov 18   ;;  %s7453_s28 = smov 127  }
  0x62   : > { %338 = vrot.lane.b32.xlu1 %v327_v10, %s7451_s23  ;;  %336 = vrot.lane.b32.xlu0 %v323_v11, %s7451_s23  ;;  %v479_v25 = vrot.slane %v466_v21, %v5204_v13  ;;  %v545_v27 = vrot.slane %v540_v26, %v5194_v6  ;;  %v549_v28 = vrot.slane %v540_v26, %v5192_v5  ;;  %s7455_s26 = smov 126   ;;  %s7457_s29 = smov 120   ;;  %vm344_vm2 = vcmask 7168  }
  0x63   : > { %v553_v29 = vrot.slane %v540_v26, %v5204_v13  ;;  %v557_v30 = vrot.slane %v540_v26, %v5202_v12  ;;  %v623_v32 = vrot.slane %v614_v31, %v5192_v5  ;;  %v619_v33 = vrot.slane %v614_v31, %v5194_v6  ;;  %s7459_s30 = smov 119   ;;  %s7497_s11 = smov 118  }
  0x64   : > { %v631_v34 = vrot.slane %v614_v31, %v5202_v12  ;;  %v627_v35 = vrot.slane %v614_v31, %v5204_v13  ;;  %v693_v37 = vrot.slane %v688_v36, %v5194_v6  ;;  %v697_v38 = vrot.slane %v688_v36, %v5192_v5  ;;  %s7494_s10 = smov 112   ;;  %p7741_p0 = scmp.ne.s32.totalorder %s7549_s25, 0 }
  0x65   : > { %v701_v39 = vrot.slane %v688_v36, %v5204_v13  ;;  %v705_v40 = vrot.slane %v688_v36, %v5202_v12  ;;  %v771_v42 = vrot.slane %v762_v41, %v5192_v5  ;;  %v767_v43 = vrot.slane %v762_v41, %v5194_v6 }
  0x66   : > { %342 = vrot.lane.b32.xlu1 %v335_v14, %s7451_s23  ;;  %340 = vrot.lane.b32.xlu0 %v331_v15, %s7451_s23  ;;  %v779_v44 = vrot.slane %v762_v41, %v5202_v12  ;;  %v775_v45 = vrot.slane %v762_v41, %v5204_v13  ;;  %v841_v47 = vrot.slane %v5258_v46, %v5194_v6  ;;  %s7501_s23 = smov 111   ;;  %vm418_vm3 = vcmask 15360  }
  0x67   : > { %vm492_vm4 = vcmask 64512   ;;  %vm566_vm5 = vcmask 72704   ;;  %vm7499_vm6 = vcmask 80896   ;;  %vm7503_vm7 = vcmask 130048  }
  0x68   : > { %vm7507_vm8 = vcmask 138240   ;;  %vm7512_vm9 = vcmask 146432   ;;  %vm7525_vm10 = vcmask 523264   ;;  %vm1377_vm11 = vcmask 654336  }
  0x69   : > { %248 = vst.msk [vmem:[#allocation2 + $0x28] sm:$0xff] %vm7512_vm9, %v4989_v1  ;;  %vm1303_vm12 = vcmask 605184   ;;  %vm7528_vm13 = vcmask 588800   ;;  %vm7527_vm14 = vcmask 539648   ;;  %vm7526_vm15 = vcmask 531456  }
  0x6a   : > { %410 = vrot.lane.b32.xlu1 %v397_v17, %s4992_s5  ;;  %412 = vrot.lane.b32.xlu0 %v401_v18, %s4992_s5 }
  0x6e   : > { %414 = vrot.lane.b32.xlu1 %v405_v19, %s4992_s5  ;;  %416 = vrot.lane.b32.xlu0 %v409_v20, %s4992_s5 }
  0x72   : > { %486 = vrot.lane.b32.xlu1 %v475_v22, %s4993_s7  ;;  %484 = vrot.lane.b32.xlu0 %v471_v23, %s4993_s7 }
  0x76   : > { %490 = vrot.lane.b32.xlu1 %v483_v24, %s4993_s7  ;;  %488 = vrot.lane.b32.xlu0 %v479_v25, %s4993_s7 }
  0x7a   : > { %558 = vrot.lane.b32.xlu1 %v545_v27, %s4994_s8  ;;  %560 = vrot.lane.b32.xlu0 %v549_v28, %s4994_s8 }
  0x7e   : > { %562 = vrot.lane.b32.xlu1 %v553_v29, %s4994_s8  ;;  %564 = vrot.lane.b32.xlu0 %v557_v30, %s4994_s8 }
  0x82   : > { %634 = vrot.lane.b32.xlu1 %v623_v32, %s4995_s9  ;;  %632 = vrot.lane.b32.xlu0 %v619_v33, %s4995_s9 }
  0x86   : > { %638 = vrot.lane.b32.xlu1 %v631_v34, %s4995_s9  ;;  %636 = vrot.lane.b32.xlu0 %v627_v35, %s4995_s9 }
  0x8a   : > { %706 = vrot.lane.b32.xlu1 %v693_v37, %s7467_s14  ;;  %708 = vrot.lane.b32.xlu0 %v697_v38, %s7467_s14 }
  0x8e   : > { %710 = vrot.lane.b32.xlu1 %v701_v39, %s7467_s14  ;;  %712 = vrot.lane.b32.xlu0 %v705_v40, %s7467_s14 }
  0x92   : > { %782 = vrot.lane.b32.xlu1 %v771_v42, %s7469_s20  ;;  %780 = vrot.lane.b32.xlu0 %v767_v43, %s7469_s20 }
  0x96   : > { %786 = vrot.lane.b32.xlu1 %v779_v44, %s7469_s20  ;;  %784 = vrot.lane.b32.xlu0 %v775_v45, %s7469_s20 }
  0x9a   : > { %854 = vrot.lane.b32.xlu1 %v841_v47, %s7472_s27 }
  0xcc   : > { %v262_v48 = vpop.permute.xlu1 %261  ;;  %v258_v49 = vpop.permute.xlu0 %257 }
  0xcd   : > { %273 = vst.msk [vmem:[#allocation2] sm:$0xff] %vm245_vm1, %v258_v49 }
  0xd0   : > { %v264_v50 = vpop.permute.xlu1 %263  ;;  %v260_v51 = vpop.permute.xlu0 %259 }
  0xd1   : > { %v5267_v52 = vsel %vm243_vm0, %v262_v48, %v264_v50  ;;  %277 = vst.msk [vmem:[#allocation2 + $0x20] sm:$0xff] %vm243_vm0, %v264_v50  ;;  %v5271_v53 = vsel %vm243_vm0, %v258_v49, %v260_v51  ;;  %v5274_v54 = vsel %vm243_vm0, %v260_v51, %v262_v48 }
  0xd2   : > { %276 = vst [vmem:[#allocation2 + $0x18] sm:$0xff] %v5267_v52  ;;  %274 = vst [vmem:[#allocation2 + $0x8] sm:$0xff] %v5271_v53 }
  0xd3   : > { %275 = vst [vmem:[#allocation2 + $0x10] sm:$0xff] %v5274_v54 }
  0xd4   : > { %v5279_v55 = vpop.permute.xlu1 %338  ;;  %v337_v56 = vpop.permute.xlu0 %336  ;;  %v5281_v57 = vld [vmem:[#allocation2] sm:$0xff] }
  0xd5   : > { %v353_v58 = vmul.f32 %v337_v56, %v5281_v57  ;;  %v345_v34 = vsel %vm344_vm2, %v337_v56, %v5279_v55 }
  0xd6   : > { %v354_v38 = vmul.f32 %v345_v34, %v5271_v53 }
  0xd7   : > { %363 = vrot.lane.b32.xlu0 %v353_v58, %s7453_s28 }
  0xd8   : > { %v343_v59 = vpop.permute.xlu1 %342  ;;  %v5285_v60 = vld [vmem:[#allocation2 + $0x20] sm:$0xff]  ;;  %v5287_v61 = vpop.permute.xlu0 %340 }
  0xd9   : > { %v357_v62 = vmul.f32 %v343_v59, %v5285_v60  ;;  %v347_v39 = vsel %vm344_vm2, %v5287_v61, %v343_v59  ;;  %v346_v43 = vsel %vm344_vm2, %v5279_v55, %v5287_v61 }
  0xda   : > { %v356_v42 = vmul.f32 %v347_v39, %v5267_v52  ;;  %v355_v47 = vmul.f32 %v346_v43, %v5274_v54 }
  0xdb   : > { %371 = vrot.lane.b32.xlu0 %v357_v62, %s7453_s28 }
  0xdc   : > { %v5291_v63 = vpop.permute.xlu1 %410  ;;  %v5293_v0 = vpop.permute.xlu0 %412 }
  0xdd   : > { %v427_v2 = vmul.f32 %v5291_v63, %v5281_v57  ;;  %v419_v48 = vsel %vm418_vm3, %v5291_v63, %v5293_v0 }
  0xde   : > { %v428_v51 = vmul.f32 %v419_v48, %v5271_v53 }
  0xdf   : > { %437 = vrot.lane.b32.xlu1 %v427_v2, %s7455_s26 }
  0xe0   : > { %v5298_v3 = vpop.permute.xlu1 %414  ;;  %v5300_v4 = vpop.permute.xlu0 %416 }
  0xe1   : > { %v431_v7 = vmul.f32 %v5300_v4, %v5285_v60  ;;  %v420_v44 = vsel %vm418_vm3, %v5293_v0, %v5298_v3  ;;  %v421_v55 = vsel %vm418_vm3, %v5298_v3, %v5300_v4 }
  0xe2   : > { %v429_v45 = vmul.f32 %v420_v44, %v5274_v54  ;;  %v430_v59 = vmul.f32 %v421_v55, %v5267_v52 }
  0xe3   : > { %445 = vrot.lane.b32.xlu1 %v431_v7, %s7455_s26 }
  0xe4   : > { %v5305_v8 = vpop.permute.xlu1 %486  ;;  %v485_v9 = vpop.permute.xlu0 %484 }
  0xe5   : > { %v501_v10 = vmul.f32 %v485_v9, %v5281_v57  ;;  %v493_v49 = vsel %vm492_vm4, %v485_v9, %v5305_v8 }
  0xe6   : > { %v502_v50 = vmul.f32 %v493_v49, %v5271_v53 }
  0xe7   : > { %511 = vrot.lane.b32.xlu0 %v501_v10, %s7457_s29 }
  0xe8   : > { %v491_v11 = vpop.permute.xlu1 %490  ;;  %v5309_v14 = vpop.permute.xlu0 %488 }
  0xe9   : > { %v505_v15 = vmul.f32 %v491_v11, %v5285_v60  ;;  %v495_v56 = vsel %vm492_vm4, %v5309_v14, %v491_v11  ;;  %v494_v61 = vsel %vm492_vm4, %v5305_v8, %v5309_v14 }
  0xea   : > { %v504_v58 = vmul.f32 %v495_v56, %v5267_v52  ;;  %v503_v0 = vmul.f32 %v494_v61, %v5274_v54 }
  0xeb   : > { %519 = vrot.lane.b32.xlu0 %v505_v15, %s7457_s29 }
  0xec   : > { %v5313_v16 = vpop.permute.xlu1 %558  ;;  %v5315_v17 = vpop.permute.xlu0 %560 }
  0xed   : > { %v575_v18 = vmul.f32 %v5313_v16, %v5281_v57  ;;  %v567_v2 = vsel %vm566_vm5, %v5313_v16, %v5315_v17 }
  0xee   : > { %v576_v7 = vmul.f32 %v567_v2, %v5271_v53 }
  0xef   : > { %585 = vrot.lane.b32.xlu1 %v575_v18, %s7459_s30 }
  0xf0   : > { %v5320_v19 = vpop.permute.xlu1 %562  ;;  %v5322_v20 = vpop.permute.xlu0 %564 }
  0xf1   : > { %v579_v21 = vmul.f32 %v5322_v20, %v5285_v60  ;;  %v568_v62 = vsel %vm566_vm5, %v5315_v17, %v5320_v19  ;;  %v569_v8 = vsel %vm566_vm5, %v5320_v19, %v5322_v20 }
  0xf2   : > { %v577_v63 = vmul.f32 %v568_v62, %v5274_v54  ;;  %v578_v11 = vmul.f32 %v569_v8, %v5267_v52 }
  0xf3   : > { %593 = vrot.lane.b32.xlu1 %v579_v21, %s7459_s30 }
  0xf4   : > { %v5327_v22 = vpop.permute.xlu1 %634  ;;  %v633_v23 = vpop.permute.xlu0 %632 }
  0xf5   : > { %v649_v24 = vmul.f32 %v633_v23, %v5281_v57  ;;  %v641_v3 = vsel %vm7499_vm6, %v633_v23, %v5327_v22 }
  0xf6   : > { %v650_v4 = vmul.f32 %v641_v3, %v5271_v53 }
  0xf7   : > { %659 = vrot.lane.b32.xlu0 %v649_v24, %s7497_s11 }
  0xf8   : > { %v639_v25 = vpop.permute.xlu1 %638  ;;  %v5331_v26 = vpop.permute.xlu0 %636 }
  0xf9   : > { %v653_v27 = vmul.f32 %v639_v25, %v5285_v60  ;;  %v643_v9 = vsel %vm7499_vm6, %v5331_v26, %v639_v25  ;;  %v642_v14 = vsel %vm7499_vm6, %v5327_v22, %v5331_v26 }
  0xfa   : > { %v652_v10 = vmul.f32 %v643_v9, %v5267_v52  ;;  %v651_v17 = vmul.f32 %v642_v14, %v5274_v54 }
  0xfb   : > { %667 = vrot.lane.b32.xlu0 %v653_v27, %s7497_s11 }
  0xfc   : > { %v5335_v28 = vpop.permute.xlu1 %706  ;;  %v5337_v29 = vpop.permute.xlu0 %708 }
  0xfd   : > { %v723_v30 = vmul.f32 %v5335_v28, %v5281_v57  ;;  %v715_v18 = vsel %vm7503_vm7, %v5335_v28, %v5337_v29  ;;  %v849_v28 = vrot.slane %v5258_v46, %v5204_v13 }
  0xfe   : > { %v724_v22 = vmul.f32 %v715_v18, %v5271_v53 }
  0xff   : > { %733 = vrot.lane.b32.xlu1 %v723_v30, %s7494_s10  ;;  %v845_v30 = vrot.slane %v5258_v46, %v5192_v5 }
 0x100   : > { %v5342_v31 = vpop.permute.xlu1 %710  ;;  %v5344_v32 = vpop.permute.xlu0 %712 }
 0x101   : > { %v727_v33 = vmul.f32 %v5344_v32, %v5285_v60  ;;  %v716_v15 = vsel %vm7503_vm7, %v5337_v29, %v5342_v31  ;;  %v717_v23 = vsel %vm7503_vm7, %v5342_v31, %v5344_v32  ;;  %v853_v32 = vrot.slane %v5258_v46, %v5202_v12 }
 0x102   : > { %v725_v16 = vmul.f32 %v716_v15, %v5274_v54  ;;  %v726_v26 = vmul.f32 %v717_v23, %v5267_v52  ;;  %v909_v23 = vld [vmem:[#allocation9 + $0x21] ss:$8 sm:$0xf] }
 0x103   : > { %741 = vrot.lane.b32.xlu1 %v727_v33, %s7494_s10 }
 0x104   : > { %v5351_v35 = vpop.permute.xlu1 %782  ;;  %v781_v36 = vpop.permute.xlu0 %780 }
 0x105   : > { %v797_v37 = vmul.f32 %v781_v36, %v5281_v57  ;;  %v789_v19 = vsel %vm7507_vm8, %v781_v36, %v5351_v35 }
 0x106   : > { %v798_v21 = vmul.f32 %v789_v19, %v5271_v53 }
 0x107   : > { %365 = vrot.lane.b32.xlu1 %v354_v38, %s7453_s28  ;;  %807 = vrot.lane.b32.xlu0 %v797_v37, %s7501_s23 }
 0x108   : > { %v787_v40 = vpop.permute.xlu1 %786  ;;  %v785_v20 = vpop.permute.xlu0 %784 }
 0x109   : > { %v801_v41 = vmul.f32 %v787_v40, %v5285_v60  ;;  %v791_v24 = vsel %vm7507_vm8, %v785_v20, %v787_v40  ;;  %v790_v27 = vsel %vm7507_vm8, %v5351_v35, %v785_v20 }
 0x10a   : > { %v800_v25 = vmul.f32 %v791_v24, %v5267_v52  ;;  %v799_v1 = vmul.f32 %v790_v27, %v5274_v54  ;;  %v926_v27 = vrot.slane %v909_v23, %v5202_v12 }
 0x10b   : > { %369 = vrot.lane.b32.xlu1 %v356_v42, %s7453_s28  ;;  %815 = vrot.lane.b32.xlu0 %v801_v41, %s7501_s23 }
 0x10c   : > { %v855_v29 = vpop.permute.xlu1 %854 }
 0x10d   : > { %v870_v31 = vmul.f32 %v855_v29, %v5281_v57 }
 0x10f   : > { %441 = vrot.lane.b32.xlu1 %v429_v45, %s7455_s26  ;;  %367 = vrot.lane.b32.xlu0 %v355_v47, %s7453_s28  ;;  %s7505_s28 = smov 110  }
 0x113   : > { %513 = vrot.lane.b32.xlu1 %v502_v50, %s7457_s29  ;;  %439 = vrot.lane.b32.xlu0 %v428_v51, %s7455_s26 }
 0x117   : > { %517 = vrot.lane.b32.xlu1 %v504_v58, %s7457_s29  ;;  %443 = vrot.lane.b32.xlu0 %v430_v59, %s7455_s26  ;;  %s7518_s26 = smov 64  }
 0x11b   : > { %589 = vrot.lane.b32.xlu1 %v577_v63, %s7459_s30  ;;  %515 = vrot.lane.b32.xlu0 %v503_v0, %s7457_s29  ;;  %s7463_s29 = smov 80  }
 0x11f   : > { %661 = vrot.lane.b32.xlu1 %v650_v4, %s7497_s11  ;;  %587 = vrot.lane.b32.xlu0 %v576_v7, %s7459_s30 }
 0x123   : > { %665 = vrot.lane.b32.xlu1 %v652_v10, %s7497_s11  ;;  %591 = vrot.lane.b32.xlu0 %v578_v11, %s7459_s30  ;;  %s7461_s30 = smov 74  }
 0x127   : > { %737 = vrot.lane.b32.xlu1 %v725_v16, %s7494_s10  ;;  %663 = vrot.lane.b32.xlu0 %v651_v17, %s7497_s11 }
 0x12b   : > { %809 = vrot.lane.b32.xlu1 %v798_v21, %s7501_s23  ;;  %735 = vrot.lane.b32.xlu0 %v724_v22, %s7494_s10 }
 0x12f   : > { %813 = vrot.lane.b32.xlu1 %v800_v25, %s7501_s23  ;;  %739 = vrot.lane.b32.xlu0 %v726_v26, %s7494_s10  ;;  %v918_v25 = vrot.slane %v909_v23, %v5192_v5  ;;  %v914_v26 = vrot.slane %v909_v23, %v5194_v6 }
 0x133   : > { %858 = vrot.lane.b32.xlu1 %v849_v28, %s7472_s27  ;;  %811 = vrot.lane.b32.xlu0 %v799_v1, %s7501_s23  ;;  %v922_v28 = vrot.slane %v909_v23, %v5204_v13  ;;  %v1351_v23 = vld [vmem:[#allocation9 + $0x27] ss:$8 sm:$0xf] }
 0x137   : > { %880 = vrot.lane.b32.xlu1 %v870_v31, %s7505_s28  ;;  %856 = vrot.lane.b32.xlu0 %v845_v30, %s7472_s27 }
 0x13b   : > { %860 = vrot.lane.b32.xlu0 %v853_v32, %s7472_s27 }
 0x149   : > { %v5463_v33 = vpop.permute.xlu0 %363 }
 0x14a   : > { %7558 = vst [vmem:[#allocation17_spill] sm:$0xff] %v5463_v33 }
 0x14d   : > { %v5467_v35 = vpop.permute.xlu0 %371 }
 0x14e   : > { %7560 = vst [vmem:[#allocation19_spill] sm:$0xff] %v5467_v35 }
 0x151   : > { %v5465_v34 = vpop.permute.xlu1 %437 }
 0x152   : > { %7559 = vst [vmem:[#allocation18_spill] sm:$0xff] %v5465_v34 }
 0x155   : > { %v5469_v36 = vpop.permute.xlu1 %445 }
 0x156   : > { %7561 = vst [vmem:[#allocation20_spill] sm:$0xff] %v5469_v36 }
 0x159   : > { %v5471_v37 = vpop.permute.xlu0 %511 }
 0x15a   : > { %7562 = vst [vmem:[#allocation21_spill] sm:$0xff] %v5471_v37 }
 0x15d   : > { %v5475_v39 = vpop.permute.xlu0 %519 }
 0x15e   : > { %7564 = vst [vmem:[#allocation23_spill] sm:$0xff] %v5475_v39 }
 0x161   : > { %v5473_v38 = vpop.permute.xlu1 %585 }
 0x162   : > { %7563 = vst [vmem:[#allocation22_spill] sm:$0xff] %v5473_v38 }
 0x165   : > { %v5477_v40 = vpop.permute.xlu1 %593 }
 0x166   : > { %7565 = vst [vmem:[#allocation24_spill] sm:$0xff] %v5477_v40 }
 0x169   : > { %v5479_v41 = vpop.permute.xlu0 %659 }
 0x16d   : > { %v5483_v42 = vpop.permute.xlu0 %667 }
 0x16e   : > { %7566 = vst [vmem:[#allocation25_spill] sm:$0xff] %v5483_v42 }
 0x171   : > { %v5481_v46 = vpop.permute.xlu1 %733 }
 0x175   : > { %v5485_v43 = vpop.permute.xlu1 %741 }
 0x179   : > { %v5487_v44 = vpop.permute.xlu1 %365  ;;  %v5489_v45 = vpop.permute.xlu0 %807 }
 0x17a   : > { %7567 = vst [vmem:[#allocation26_spill] sm:$0xff] %v5487_v44 }
 0x17d   : > { %v5491_v47 = vpop.permute.xlu1 %369  ;;  %v5493_v48 = vpop.permute.xlu0 %815 }
 0x17e   : > { %7568 = vst [vmem:[#allocation27_spill] sm:$0xff] %v5491_v47 }
 0x181   : > { %v5495_v49 = vpop.permute.xlu1 %441  ;;  %v5497_v50 = vpop.permute.xlu0 %367 }
 0x182   : > { %7569 = vst [vmem:[#allocation28_spill] sm:$0xff] %v5495_v49  ;;  %7570 = vst [vmem:[#allocation29_spill] sm:$0xff] %v5497_v50 }
 0x185   : > { %v5499_v51 = vpop.permute.xlu1 %513  ;;  %v5501_v55 = vpop.permute.xlu0 %439 }
 0x186   : > { %7571 = vst [vmem:[#allocation30_spill] sm:$0xff] %v5499_v51  ;;  %7572 = vst [vmem:[#allocation31_spill] sm:$0xff] %v5501_v55 }
 0x189   : > { %v5503_v56 = vpop.permute.xlu1 %517  ;;  %v5505_v58 = vpop.permute.xlu0 %443 }
 0x18a   : > { %7573 = vst [vmem:[#allocation32_spill] sm:$0xff] %v5503_v56  ;;  %7574 = vst [vmem:[#allocation33_spill] sm:$0xff] %v5505_v58 }
 0x18d   : > { %v5507_v59 = vpop.permute.xlu1 %589  ;;  %v5509_v61 = vpop.permute.xlu0 %515 }
 0x18e   : > { %7575 = vst [vmem:[#allocation34_spill] sm:$0xff] %v5509_v61 }
 0x191   : > { %v5511_v62 = vpop.permute.xlu1 %661  ;;  %v5513_v63 = vpop.permute.xlu0 %587 }
 0x195   : > { %v5515_v0 = vpop.permute.xlu1 %665  ;;  %v5517_v2 = vpop.permute.xlu0 %591 }
 0x196   : > { %7576 = vst [vmem:[#allocation35_spill] sm:$0xff] %v5515_v0  ;;  %7577 = vst [vmem:[#allocation36_spill] sm:$0xff] %v5517_v2 }
 0x199   : > { %v5519_v3 = vpop.permute.xlu1 %737  ;;  %v5521_v4 = vpop.permute.xlu0 %663 }
 0x19d   : > { %v5523_v7 = vpop.permute.xlu1 %809  ;;  %v5525_v8 = vpop.permute.xlu0 %735 }
 0x1a1   : > { %v5527_v9 = vpop.permute.xlu0 %739  ;;  %v5529_v10 = vpop.permute.xlu1 %813 }
 0x1a5   : > { %v5531_v11 = vpop.permute.xlu0 %811  ;;  %v859_v14 = vpop.permute.xlu1 %858 }
 0x1a9   : > { %v857_v15 = vpop.permute.xlu0 %856  ;;  %v5552_v1 = vpop.permute.xlu1 %880 }
 0x1aa   : > { %v862_v16 = vsel %vm7512_vm9, %v855_v29, %v857_v15  ;;  %v863_v17 = vsel %vm7512_vm9, %v857_v15, %v859_v14 }
 0x1ab   : > { %v872_v18 = vmul.f32 %v863_v17, %v5274_v54  ;;  %v871_v19 = vmul.f32 %v862_v16, %v5271_v53 }
 0x1ad   : > { %884 = vrot.lane.b32.xlu1 %v872_v18, %s7505_s28  ;;  %882 = vrot.lane.b32.xlu0 %v871_v19, %s7505_s28  ;;  %v861_v20 = vpop.permute.xlu0 %860 }
 0x1ae   : > { %v864_v21 = vsel %vm7512_vm9, %v859_v14, %v861_v20  ;;  %v874_v22 = vmul.f32 %v861_v20, %v5285_v60 }
 0x1af   : > { %v873_v24 = vmul.f32 %v864_v21, %v5267_v52 }
 0x1b1   : > { %888 = vrot.lane.b32.xlu1 %v874_v22, %s7505_s28  ;;  %886 = vrot.lane.b32.xlu0 %v873_v24, %s7505_s28 }
 0x1b5   : > { %929 = vrot.lane.b32.xlu1 %v918_v25, %s7518_s26  ;;  %927 = vrot.lane.b32.xlu0 %v914_v26, %s7518_s26  ;;  %v1360_v26 = vrot.slane %v1351_v23, %v5192_v5 }
 0x1b9   : > { %933 = vrot.lane.b32.xlu1 %v926_v27, %s7518_s26  ;;  %931 = vrot.lane.b32.xlu0 %v922_v28, %s7518_s26  ;;  %v1356_v27 = vrot.slane %v1351_v23, %v5194_v6  ;;  %v1368_v28 = vrot.slane %v1351_v23, %v5202_v12 }
 0x21f   : > { %v5554_v29 = vpop.permute.xlu1 %884  ;;  %v5556_v30 = vpop.permute.xlu0 %882 }
 0x223   : > { %v5558_v31 = vpop.permute.xlu1 %888  ;;  %v5560_v32 = vpop.permute.xlu0 %886 }
 0x227   : > { %v930_v14 = vpop.permute.xlu1 %929  ;;  %v928_v15 = vpop.permute.xlu0 %927 }
 0x228   : > { %v936_v16 = vsel %vm7525_vm10, %v928_v15, %v930_v14  ;;  %v944_v17 = vmul.f32 %v928_v15, %v5281_v57  ;;  %v1277_v15 = vld [vmem:[#allocation9 + $0x26] ss:$8 sm:$0xf] }
 0x229   : > { %v945_v18 = vmul.f32 %v936_v16, %v5271_v53  ;;  %v1286_v16 = vrot.slane %v1277_v15, %v5192_v5 }
 0x22a   : > { %954 = vrot.lane.b32.xlu0 %v944_v17, %s7518_s26  ;;  %v1282_v17 = vrot.slane %v1277_v15, %v5194_v6 }
 0x22b   : > { %v5566_v19 = vpop.permute.xlu1 %933  ;;  %956 = vrot.lane.b32.xlu1 %v945_v18, %s7518_s26  ;;  %v932_v20 = vpop.permute.xlu0 %931  ;;  %v1294_v18 = vrot.slane %v1277_v15, %v5202_v12 }
 0x22c   : > { %v937_v21 = vsel %vm7525_vm10, %v930_v14, %v932_v20  ;;  %v938_v22 = vsel %vm7525_vm10, %v932_v20, %v5566_v19  ;;  %v1364_v14 = vrot.slane %v1351_v23, %v5204_v13  ;;  %v1290_v20 = vrot.slane %v1277_v15, %v5204_v13 }
 0x22d   : > { %v947_v24 = vmul.f32 %v938_v22, %v5267_v52  ;;  %v946_v25 = vmul.f32 %v937_v21, %v5274_v54  ;;  %v1204_v21 = vld [vmem:[#allocation9 + $0x25] ss:$8 sm:$0xf] }
 0x22e   : > { %v1213_v22 = vrot.slane %v1204_v21, %v5192_v5  ;;  %v1209_v23 = vrot.slane %v1204_v21, %v5194_v6 }
 0x22f   : > { %960 = vrot.lane.b32.xlu1 %v947_v24, %s7518_s26  ;;  %958 = vrot.lane.b32.xlu0 %v946_v25, %s7518_s26  ;;  %v1221_v24 = vrot.slane %v1204_v21, %v5202_v12  ;;  %v1217_v25 = vrot.slane %v1204_v21, %v5204_v13 }
 0x233   : > { %1371 = vrot.lane.b32.xlu1 %v1360_v26, %s7463_s29  ;;  %1369 = vrot.lane.b32.xlu0 %v1356_v27, %s7463_s29  ;;  %v1130_v26 = vld [vmem:[#allocation9 + $0x24] ss:$8 sm:$0xf] }
 0x234   : > { %v1139_v27 = vrot.slane %v1130_v26, %v5192_v5  ;;  %v1143_v15 = vrot.slane %v1130_v26, %v5204_v13 }
 0x237   : > { %1375 = vrot.lane.b32.xlu1 %v1368_v28, %s7463_s29  ;;  %1373 = vrot.lane.b32.xlu0 %v1364_v14, %s7463_s29  ;;  %v1135_v28 = vrot.slane %v1130_v26, %v5194_v6  ;;  %v1147_v14 = vrot.slane %v1130_v26, %v5202_v12  ;;  %s5011_s29 = smov 66  }
 0x23b   : > { %1297 = vrot.lane.b32.xlu1 %v1286_v16, %s7461_s30  ;;  %1295 = vrot.lane.b32.xlu0 %v1282_v17, %s7461_s30  ;;  %v1056_v16 = vld [vmem:[#allocation9 + $0x23] ss:$8 sm:$0xf] }
 0x23c   : > { %v1065_v17 = vrot.slane %v1056_v16, %v5192_v5  ;;  %v1069_v21 = vrot.slane %v1056_v16, %v5204_v13 }
 0x23f   : > { %1301 = vrot.lane.b32.xlu1 %v1294_v18, %s7461_s30  ;;  %1299 = vrot.lane.b32.xlu0 %v1290_v20, %s7461_s30  ;;  %s7465_s30 = smov 72   ;;  %v1061_v18 = vrot.slane %v1056_v16, %v5194_v6  ;;  %v1073_v20 = vrot.slane %v1056_v16, %v5202_v12 }
 0x243   : > { %1224 = vrot.lane.b32.xlu1 %v1213_v22, %s4990_s21  ;;  %1222 = vrot.lane.b32.xlu0 %v1209_v23, %s4990_s21  ;;  %v982_v22 = vld [vmem:[#allocation9 + $0x22] ss:$8 sm:$0xf] }
 0x244   : > { %v991_v23 = vrot.slane %v982_v22, %v5192_v5  ;;  %v995_v26 = vrot.slane %v982_v22, %v5204_v13 }
 0x247   : > { %1228 = vrot.lane.b32.xlu1 %v1221_v24, %s4990_s21  ;;  %1226 = vrot.lane.b32.xlu0 %v1217_v25, %s4990_s21  ;;  %v987_v24 = vrot.slane %v982_v22, %v5194_v6  ;;  %v999_v25 = vrot.slane %v982_v22, %v5202_v12 }
 0x24b   : > { %1150 = vrot.lane.b32.xlu1 %v1139_v27, %s7465_s30  ;;  %1148 = vrot.lane.b32.xlu0 %v1135_v28, %s7465_s30  ;;  %v2112_v27 = vld [vmem:[#allocation9 + $0x62] ss:$8 sm:$0xf] }
 0x24c   : > { %v2121_v28 = vrot.slane %v2112_v27, %v5192_v5  ;;  %v2125_v16 = vrot.slane %v2112_v27, %v5204_v13 }
 0x24f   : > { %1154 = vrot.lane.b32.xlu1 %v1147_v14, %s7465_s30  ;;  %1152 = vrot.lane.b32.xlu0 %v1143_v15, %s7465_s30  ;;  %s5012_s30 = smov 65   ;;  %v2117_v14 = vrot.slane %v2112_v27, %v5194_v6  ;;  %v2129_v15 = vrot.slane %v2112_v27, %v5202_v12 }
 0x253   : > { %1076 = vrot.lane.b32.xlu1 %v1065_v17, %s5011_s29  ;;  %1074 = vrot.lane.b32.xlu0 %v1061_v18, %s5011_s29  ;;  %v2040_v17 = vld [vmem:[#allocation9 + $0x61] ss:$8 sm:$0xf] }
 0x254   : > { %v2049_v18 = vrot.slane %v2040_v17, %v5192_v5  ;;  %v2053_v22 = vrot.slane %v2040_v17, %v5204_v13 }
 0x257   : > { %1080 = vrot.lane.b32.xlu1 %v1073_v20, %s5011_s29  ;;  %1078 = vrot.lane.b32.xlu0 %v1069_v21, %s5011_s29  ;;  %v2045_v20 = vrot.slane %v2040_v17, %v5194_v6  ;;  %v2057_v21 = vrot.slane %v2040_v17, %v5202_v12 }
 0x25b   : > { %1002 = vrot.lane.b32.xlu1 %v991_v23, %s5012_s30  ;;  %1000 = vrot.lane.b32.xlu0 %v987_v24, %s5012_s30  ;;  %v1968_v23 = vld [vmem:[#allocation9 + $0x60] ss:$8 sm:$0xf] }
 0x25c   : > { %v1977_v24 = vrot.slane %v1968_v23, %v5192_v5  ;;  %v1981_v27 = vrot.slane %v1968_v23, %v5204_v13 }
 0x25f   : > { %1006 = vrot.lane.b32.xlu1 %v999_v25, %s5012_s30  ;;  %1004 = vrot.lane.b32.xlu0 %v995_v26, %s5012_s30  ;;  %v1973_v25 = vrot.slane %v1968_v23, %v5194_v6  ;;  %v1985_v26 = vrot.slane %v1968_v23, %v5202_v12 }
 0x263   : > { %2132 = vrot.lane.b32.xlu1 %v2121_v28, %s7472_s27  ;;  %2130 = vrot.lane.b32.xlu0 %v2117_v14, %s7472_s27  ;;  %v1896_v28 = vld [vmem:[#allocation9 + $0x47] ss:$8 sm:$0xf] }
 0x264   : > { %v1905_v14 = vrot.slane %v1896_v28, %v5192_v5  ;;  %v1909_v17 = vrot.slane %v1896_v28, %v5204_v13 }
 0x267   : > { %2136 = vrot.lane.b32.xlu1 %v2129_v15, %s7472_s27  ;;  %2134 = vrot.lane.b32.xlu0 %v2125_v16, %s7472_s27  ;;  %v1901_v15 = vrot.slane %v1896_v28, %v5194_v6  ;;  %v1913_v16 = vrot.slane %v1896_v28, %v5202_v12  ;;  %s7479_s27 = smov 81  }
 0x26b   : > { %2060 = vrot.lane.b32.xlu1 %v2049_v18, %s7469_s20  ;;  %2058 = vrot.lane.b32.xlu0 %v2045_v20, %s7469_s20  ;;  %v1824_v18 = vld [vmem:[#allocation9 + $0x46] ss:$8 sm:$0xf] }
 0x26c   : > { %v1833_v20 = vrot.slane %v1824_v18, %v5192_v5  ;;  %v1837_v23 = vrot.slane %v1824_v18, %v5204_v13 }
 0x26f   : > { %2064 = vrot.lane.b32.xlu1 %v2057_v21, %s7469_s20  ;;  %2062 = vrot.lane.b32.xlu0 %v2053_v22, %s7469_s20  ;;  %v1829_v21 = vrot.slane %v1824_v18, %v5194_v6  ;;  %v1841_v22 = vrot.slane %v1824_v18, %v5202_v12  ;;  %s7476_s20 = smov 82  }
 0x273   : > { %1988 = vrot.lane.b32.xlu1 %v1977_v24, %s7467_s14  ;;  %1986 = vrot.lane.b32.xlu0 %v1973_v25, %s7467_s14  ;;  %v1752_v24 = vld [vmem:[#allocation9 + $0x45] ss:$8 sm:$0xf] }
 0x274   : > { %v1761_v25 = vrot.slane %v1752_v24, %v5192_v5  ;;  %v1765_v28 = vrot.slane %v1752_v24, %v5204_v13 }
 0x277   : > { %1992 = vrot.lane.b32.xlu1 %v1985_v26, %s7467_s14  ;;  %1990 = vrot.lane.b32.xlu0 %v1981_v27, %s7467_s14  ;;  %v1757_v26 = vrot.slane %v1752_v24, %v5194_v6  ;;  %v1769_v27 = vrot.slane %v1752_v24, %v5202_v12  ;;  %s7578_s14 = smov 1  }
 0x27b   : > { %1916 = vrot.lane.b32.xlu1 %v1905_v14, %s4995_s9  ;;  %1914 = vrot.lane.b32.xlu0 %v1901_v15, %s4995_s9  ;;  %v1680_v14 = vld [vmem:[#allocation9 + $0x44] ss:$8 sm:$0xf] }
 0x27c   : > { %v1689_v15 = vrot.slane %v1680_v14, %v5192_v5  ;;  %v1693_v18 = vrot.slane %v1680_v14, %v5204_v13 }
 0x27f   : > { %1920 = vrot.lane.b32.xlu1 %v1913_v16, %s4995_s9  ;;  %1918 = vrot.lane.b32.xlu0 %v1909_v17, %s4995_s9  ;;  %v1685_v16 = vrot.slane %v1680_v14, %v5194_v6  ;;  %v1697_v17 = vrot.slane %v1680_v14, %v5202_v12 }
 0x283   : > { %1844 = vrot.lane.b32.xlu1 %v1833_v20, %s4994_s8  ;;  %1842 = vrot.lane.b32.xlu0 %v1829_v21, %s4994_s8  ;;  %v1608_v20 = vld [vmem:[#allocation9 + $0x43] ss:$8 sm:$0xf] }
 0x284   : > { %v1617_v21 = vrot.slane %v1608_v20, %v5192_v5  ;;  %v1621_v24 = vrot.slane %v1608_v20, %v5204_v13 }
 0x287   : > { %1848 = vrot.lane.b32.xlu1 %v1841_v22, %s4994_s8  ;;  %1846 = vrot.lane.b32.xlu0 %v1837_v23, %s4994_s8  ;;  %v1613_v22 = vrot.slane %v1608_v20, %v5194_v6  ;;  %v1625_v23 = vrot.slane %v1608_v20, %v5202_v12  ;;  %v1425_v20 = vld [vmem:[#allocation9 + $0x40] ss:$8 sm:$0xf] }
 0x28b   : > { %1772 = vrot.lane.b32.xlu1 %v1761_v25, %s4993_s7  ;;  %1770 = vrot.lane.b32.xlu0 %v1757_v26, %s4993_s7  ;;  %v1499_v26 = vld [vmem:[#allocation9 + $0x41] ss:$8 sm:$0xf] }
 0x28c   : > { %v1504_v14 = vrot.slane %v1499_v26, %v5194_v6 }
 0x28f   : > { %1776 = vrot.lane.b32.xlu1 %v1769_v27, %s4993_s7  ;;  %1774 = vrot.lane.b32.xlu0 %v1765_v28, %s4993_s7  ;;  %v1508_v28 = vrot.slane %v1499_v26, %v5192_v5 }
 0x293   : > { %1700 = vrot.lane.b32.xlu1 %v1689_v15, %s4992_s5  ;;  %1698 = vrot.lane.b32.xlu0 %v1685_v16, %s4992_s5 }
 0x297   : > { %1704 = vrot.lane.b32.xlu1 %v1697_v17, %s4992_s5  ;;  %1702 = vrot.lane.b32.xlu0 %v1693_v18, %s4992_s5  ;;  %v1516_v17 = vrot.slane %v1499_v26, %v5202_v12  ;;  %v1512_v18 = vrot.slane %v1499_v26, %v5204_v13  ;;  %v1442_v26 = vrot.slane %v1425_v20, %v5202_v12 }
 0x29b   : > { %1628 = vrot.lane.b32.xlu1 %v1617_v21, %s7578_s14  ;;  %1626 = vrot.lane.b32.xlu0 %v1613_v22, %s7578_s14 }
 0x29c   : > { %v5686_v25 = vpop.permute.xlu0 %954 }
 0x29d   : > { %v5688_v27 = vpop.permute.xlu1 %956 }
 0x29f   : > { %1632 = vrot.lane.b32.xlu1 %v1625_v23, %s7578_s14  ;;  %1630 = vrot.lane.b32.xlu0 %v1621_v24, %s7578_s14  ;;  %v1434_v23 = vrot.slane %v1425_v20, %v5192_v5  ;;  %v1430_v24 = vrot.slane %v1425_v20, %v5194_v6 }
 0x2a1   : > { %v5694_v15 = vpop.permute.xlu1 %960  ;;  %v5696_v16 = vpop.permute.xlu0 %958 }
 0x2a3   : > { %1519 = vrot.lane.b32.xlu1 %v1508_v28, %s7476_s20  ;;  %1517 = vrot.lane.b32.xlu0 %v1504_v14, %s7476_s20  ;;  %v1438_v28 = vrot.slane %v1425_v20, %v5204_v13 }
 0x2a5   : > { %v1372_v21 = vpop.permute.xlu1 %1371  ;;  %v1370_v22 = vpop.permute.xlu0 %1369 }
 0x2a7   : > { %1523 = vrot.lane.b32.xlu1 %v1516_v17, %s7476_s20  ;;  %1521 = vrot.lane.b32.xlu0 %v1512_v18, %s7476_s20  ;;  %v1378_v18 = vsel %vm1377_vm11, %v1370_v22, %v1372_v21  ;;  %s7482_s20 = smov 48  }
 0x2a8   : > { %v1387_v36 = vmul.f32 %v1378_v18, %v5271_v53 }
 0x2a9   : > { %v1376_v47 = vpop.permute.xlu1 %1375  ;;  %v1374_v35 = vpop.permute.xlu0 %1373 }
 0x2aa   : > { %v1379_v58 = vsel %vm1377_vm11, %v1372_v21, %v1374_v35  ;;  %v1380_v44 = vsel %vm1377_vm11, %v1374_v35, %v1376_v47  ;;  %v1390_v20 = vmul.f32 %v1376_v47, %v5285_v60  ;;  %v1386_v35 = vmul.f32 %v1370_v22, %v5281_v57 }
 0x2ab   : > { %1445 = vrot.lane.b32.xlu1 %v1434_v23, %s7479_s27  ;;  %1443 = vrot.lane.b32.xlu0 %v1430_v24, %s7479_s27  ;;  %v1388_v23 = vmul.f32 %v1379_v58, %v5274_v54  ;;  %v1389_v21 = vmul.f32 %v1380_v44, %v5267_v52 }
 0x2ad   : > { %v1298_v14 = vpop.permute.xlu1 %1297  ;;  %v1296_v17 = vpop.permute.xlu0 %1295 }
 0x2ae   : > { %v1304_v18 = vsel %vm1303_vm12, %v1296_v17, %v1298_v14  ;;  %v1312_v22 = vmul.f32 %v1296_v17, %v5281_v57 }
 0x2af   : > { %1449 = vrot.lane.b32.xlu1 %v1442_v26, %s7479_s27  ;;  %1447 = vrot.lane.b32.xlu0 %v1438_v28, %s7479_s27  ;;  %v1313_v58 = vmul.f32 %v1304_v18, %v5271_v53  ;;  %s7484_s27 = smov 54  }
 0x2b1   : > { %v1302_v33 = vpop.permute.xlu1 %1301  ;;  %v1300_v24 = vpop.permute.xlu0 %1299 }
 0x2b2   : > { %v1306_v47 = vsel %vm1303_vm12, %v1300_v24, %v1302_v33 }
 0x2b3   : > { %1398 = vrot.lane.b32.xlu0 %v1387_v36, %s7482_s20  ;;  %1400 = vrot.lane.b32.xlu1 %v1388_v23, %s7482_s20  ;;  %v1305_v23 = vsel %vm1303_vm12, %v1298_v14, %v1300_v24  ;;  %v1316_v14 = vmul.f32 %v1302_v33, %v5285_v60 }
 0x2b4   : > { %v1314_v44 = vmul.f32 %v1305_v23, %v5274_v54 }
 0x2b5   : > { %v1225_v26 = vpop.permute.xlu1 %1224  ;;  %v1223_v28 = vpop.permute.xlu0 %1222 }
 0x2b7   : > { %1402 = vrot.lane.b32.xlu0 %v1389_v21, %s7482_s20  ;;  %1404 = vrot.lane.b32.xlu1 %v1390_v20, %s7482_s20  ;;  %v1315_v21 = vmul.f32 %v1306_v47, %v5267_v52 }
 0x2b9   : > { %v1229_v50 = vpop.permute.xlu1 %1228  ;;  %v1227_v36 = vpop.permute.xlu0 %1226 }
 0x2ba   : > { %v1232_v17 = vsel %vm243_vm0, %v1227_v36, %v1229_v50  ;;  %v1242_v33 = vmul.f32 %v1229_v50, %v5285_v60 }
 0x2bb   : > { %1396 = vrot.lane.b32.xlu0 %v1386_v35, %s7482_s20  ;;  %1324 = vrot.lane.b32.xlu1 %v1313_v58, %s7484_s27  ;;  %v1230_v35 = vsel %vm243_vm0, %v1223_v28, %v1225_v26  ;;  %v1231_v58 = vsel %vm243_vm0, %v1225_v26, %v1227_v36  ;;  %s7486_s20 = smov 55   ;;  %v1241_v26 = vmul.f32 %v1232_v17, %v5267_v52 }
 0x2bc   : > { %v1239_v23 = vmul.f32 %v1230_v35, %v5271_v53  ;;  %v1240_v47 = vmul.f32 %v1231_v58, %v5274_v54  ;;  %v1238_v36 = vmul.f32 %v1223_v28, %v5281_v57 }
 0x2bd   : > { %v1151_v20 = vpop.permute.xlu1 %1150  ;;  %v1149_v56 = vpop.permute.xlu0 %1148 }
 0x2be   : > { %v1157_v35 = vsel %vm7528_vm13, %v1149_v56, %v1151_v20 }
 0x2bf   : > { %1328 = vrot.lane.b32.xlu1 %v1315_v21, %s7484_s27  ;;  %1326 = vrot.lane.b32.xlu0 %v1314_v44, %s7484_s27  ;;  %v1166_v58 = vmul.f32 %v1157_v35, %v5271_v53  ;;  %v1165_v53 = vmul.f32 %v1149_v56, %v5281_v57 }
 0x2c1   : > { %v1155_v24 = vpop.permute.xlu1 %1154  ;;  %v1153_v18 = vpop.permute.xlu0 %1152 }
 0x2c2   : > { %v1159_v50 = vsel %vm7528_vm13, %v1153_v18, %v1155_v24  ;;  %v1169_v28 = vmul.f32 %v1155_v24, %v5285_v60 }
 0x2c3   : > { %1322 = vrot.lane.b32.xlu1 %v1312_v22, %s7484_s27  ;;  %1330 = vrot.lane.b32.xlu0 %v1316_v14, %s7484_s27  ;;  %s7489_s27 = smov 56  }
 0x2c5   : > { %v1077_v21 = vpop.permute.xlu1 %1076  ;;  %v1075_v44 = vpop.permute.xlu0 %1074 }
 0x2c6   : > { %v1083_v35 = vsel %vm7527_vm14, %v1075_v44, %v1077_v21 }
 0x2c7   : > { %1250 = vrot.lane.b32.xlu0 %v1239_v23, %s7486_s20  ;;  %1252 = vrot.lane.b32.xlu1 %v1240_v47, %s7486_s20  ;;  %v1158_v47 = vsel %vm7528_vm13, %v1151_v20, %v1153_v18  ;;  %vm7530_vm13 = vcmask 1039360  }
 0x2c8   : > { %v1167_v17 = vmul.f32 %v1158_v47, %v5274_v54 }
 0x2c9   : > { %v1081_v22 = vpop.permute.xlu1 %1080  ;;  %v1079_v14 = vpop.permute.xlu0 %1078 }
 0x2ca   : > { %v1084_v54 = vsel %vm7527_vm14, %v1077_v21, %v1079_v14  ;;  %v5777_v21 = vld [vmem:[#allocation2 + $0x18] sm:$0xff] }
 0x2cb   : > { %1254 = vrot.lane.b32.xlu0 %v1241_v26, %s7486_s20  ;;  %1256 = vrot.lane.b32.xlu1 %v1242_v33, %s7486_s20  ;;  %v1168_v26 = vmul.f32 %v1159_v50, %v5267_v52  ;;  %v5768_v52 = vld [vmem:[#allocation2 + $0x8] sm:$0xff]  ;;  %v1085_v50 = vsel %vm7527_vm14, %v1079_v14, %v1081_v22  ;;  %v1091_v14 = vmul.f32 %v1075_v44, %v5281_v57  ;;  %v5798_v57 = vld [vmem:[#allocation2] sm:$0xff]  ;;  %vm7529_vm14 = vcmask 1031168  }
 0x2cd   : > { %v1003_v39 = vpop.permute.xlu1 %1002  ;;  %v1001_v23 = vpop.permute.xlu0 %1000 }
 0x2cf   : > { %1248 = vrot.lane.b32.xlu0 %v1238_v36, %s7486_s20  ;;  %1177 = vrot.lane.b32.xlu1 %v1166_v58, %s7489_s27  ;;  %v5770_v36 = vld [vmem:[#allocation2 + $0x10] sm:$0xff]  ;;  %v1092_v58 = vmul.f32 %v1083_v35, %v5768_v52  ;;  %s7513_s20 = smov 62   ;;  %v1009_v35 = vsel %vm7526_vm15, %v1001_v23, %v1003_v39 }
 0x2d0   : > { %v1093_v56 = vmul.f32 %v1084_v54, %v5770_v36  ;;  %v1018_v54 = vmul.f32 %v5768_v52, %v1009_v35 }
 0x2d1   : > { %v1007_v33 = vpop.permute.xlu1 %1006  ;;  %v1005_v34 = vpop.permute.xlu0 %1004 }
 0x2d2   : > { %v1010_v55 = vsel %vm7526_vm15, %v1003_v39, %v1005_v34  ;;  %v5800_v39 = vld [vmem:[#allocation2 + $0x20] sm:$0xff] }
 0x2d3   : > { %1181 = vrot.lane.b32.xlu1 %v1168_v26, %s7489_s27  ;;  %1179 = vrot.lane.b32.xlu0 %v1167_v17, %s7489_s27  ;;  %v1095_v17 = vmul.f32 %v1081_v22, %v5285_v60  ;;  %v1094_v26 = vmul.f32 %v1085_v50, %v5777_v21  ;;  %v1011_v22 = vsel %vm7526_vm15, %v1005_v34, %v1007_v33  ;;  %vm521_vm15 = vcmask 982016  }
 0x2d4   : > { %v1019_v50 = vmul.f32 %v5770_v36, %v1010_v55  ;;  %v1017_v34 = vmul.f32 %v1001_v23, %v5798_v57  ;;  %v1021_v44 = vmul.f32 %v1007_v33, %v5800_v39 }
 0x2d5   : > { %v2133_v20 = vpop.permute.xlu1 %2132  ;;  %v5762_v18 = vpop.permute.xlu0 %2130 }
 0x2d6   : > { %v2138_v55 = vsel %vm7512_vm9, %v5762_v18, %v2133_v20 }
 0x2d7   : > { %1175 = vrot.lane.b32.xlu1 %v1165_v53, %s7489_s27  ;;  %1183 = vrot.lane.b32.xlu0 %v1169_v28, %s7489_s27  ;;  %s7508_s27 = smov 63  }
 0x2d9   : > { %v2137_v24 = vpop.permute.xlu1 %2136  ;;  %v2135_v47 = vpop.permute.xlu0 %2134 }
 0x2da   : > { %v2139_v23 = vsel %vm7512_vm9, %v2133_v20, %v2135_v47  ;;  %v2140_v33 = vsel %vm7512_vm9, %v2135_v47, %v2137_v24  ;;  %vm7515_vm9 = vcmask 719872  }
 0x2db   : > { %1103 = vrot.lane.b32.xlu0 %v1092_v58, %s7513_s20  ;;  %1105 = vrot.lane.b32.xlu1 %v1093_v56, %s7513_s20 }
 0x2dd   : > { %v2061_v53 = vpop.permute.xlu1 %2060  ;;  %v5781_v28 = vpop.permute.xlu0 %2058 }
 0x2df   : > { %1107 = vrot.lane.b32.xlu0 %v1094_v26, %s7513_s20  ;;  %1109 = vrot.lane.b32.xlu1 %v1095_v17, %s7513_s20  ;;  %v1020_v26 = vmul.f32 %v5777_v21, %v1011_v22  ;;  %v2147_v22 = vmul.f32 %v2138_v55, %v5770_v36 }
 0x2e1   : > { %v2065_v58 = vpop.permute.xlu1 %2064  ;;  %v2063_v56 = vpop.permute.xlu0 %2062 }
 0x2e3   : > { %1101 = vrot.lane.b32.xlu0 %v1091_v14, %s7513_s20  ;;  %1029 = vrot.lane.b32.xlu1 %v1018_v54, %s7508_s27  ;;  %v948_v54 = vmul.f32 %v5566_v19, %v5285_v60  ;;  %v5819_v60 = vld [vmem:[#allocation2 + $0x28] sm:$0xff]  ;;  %v2146_v19 = vmul.f32 %v5762_v18, %v5768_v52  ;;  %s5023_s20 = smov 47  }
 0x2e4   : > { %v2150_v20 = vmul.f32 %v2137_v24, %v5819_v60  ;;  %v2068_v24 = vsel %vm7507_vm8, %v2063_v56, %v2065_v58 }
 0x2e5   : > { %v1989_v17 = vpop.permute.xlu1 %1988  ;;  %v5794_v49 = vpop.permute.xlu0 %1986 }
 0x2e7   : > { %1033 = vrot.lane.b32.xlu1 %v1020_v26, %s7508_s27  ;;  %1031 = vrot.lane.b32.xlu0 %v1019_v50, %s7508_s27 }
 0x2e9   : > { %v1993_v35 = vpop.permute.xlu1 %1992  ;;  %v1991_v14 = vpop.permute.xlu0 %1990 }
 0x2eb   : > { %1027 = vrot.lane.b32.xlu1 %v1017_v34, %s7508_s27  ;;  %1035 = vrot.lane.b32.xlu0 %v1021_v44, %s7508_s27  ;;  %v2148_v34 = vmul.f32 %v2139_v23, %v5777_v21  ;;  %v2149_v44 = vmul.f32 %v2140_v33, %v5800_v39  ;;  %s7516_s27 = smov 46  }
 0x2ed   : > { %v1917_v50 = vpop.permute.xlu1 %1916  ;;  %v5811_v26 = vpop.permute.xlu0 %1914 }
 0x2ef   : > { %962 = vrot.lane.b32.xlu0 %v948_v54, %s7518_s26  ;;  %2158 = vrot.lane.b32.xlu1 %v2147_v22, %s7505_s28  ;;  %v2066_v54 = vsel %vm7507_vm8, %v5781_v28, %v2061_v53  ;;  %v2067_v22 = vsel %vm7507_vm8, %v2061_v53, %v2063_v56  ;;  %v2077_v53 = vmul.f32 %v2068_v24, %v5800_v39  ;;  %vm7524_vm8 = vcmask 449536   ;;  %s7604_s26 = smov 74  }
 0x2f0   : > { %v2075_v23 = vmul.f32 %v2066_v54, %v5770_v36  ;;  %v2076_v33 = vmul.f32 %v2067_v22, %v5777_v21  ;;  %v2074_v56 = vmul.f32 %v5781_v28, %v5768_v52 }
 0x2f1   : > { %v1921_v2 = vpop.permute.xlu1 %1920  ;;  %v1919_v40 = vpop.permute.xlu0 %1918 }
 0x2f3   : > { %2162 = vrot.lane.b32.xlu1 %v2149_v44, %s7505_s28  ;;  %2160 = vrot.lane.b32.xlu0 %v2148_v34, %s7505_s28  ;;  %v2078_v44 = vmul.f32 %v5819_v60, %v2065_v58 }
 0x2f5   : > { %v1845_v47 = vpop.permute.xlu1 %1844  ;;  %v5826_v55 = vpop.permute.xlu0 %1842 }
 0x2f7   : > { %2156 = vrot.lane.b32.xlu1 %v2146_v19, %s7505_s28  ;;  %2164 = vrot.lane.b32.xlu0 %v2150_v20, %s7505_s28  ;;  %v1994_v20 = vsel %vm7503_vm7, %v5794_v49, %v1989_v17  ;;  %s7582_s28 = smov 127  }
 0x2f8   : > { %v2003_v54 = vmul.f32 %v1994_v20, %v5770_v36 }
 0x2f9   : > { %v5835_v34 = vpop.permute.xlu1 %1848  ;;  %v1847_v18 = vpop.permute.xlu0 %1846 }
 0x2fb   : > { %2086 = vrot.lane.b32.xlu0 %v2075_v23, %s7501_s23  ;;  %2088 = vrot.lane.b32.xlu1 %v2076_v33, %s7501_s23  ;;  %v1995_v23 = vsel %vm7503_vm7, %v1989_v17, %v1991_v14  ;;  %v1996_v33 = vsel %vm7503_vm7, %v1991_v14, %v1993_v35  ;;  %v2002_v17 = vmul.f32 %v5794_v49, %v5768_v52  ;;  %vm7511_vm7 = vcmask 441344  }
 0x2fc   : > { %v2004_v24 = vmul.f32 %v1995_v23, %v5777_v21  ;;  %v2006_v14 = vmul.f32 %v5819_v60, %v1993_v35  ;;  %v1923_v23 = vsel %vm7499_vm6, %v1917_v50, %v1919_v40 }
 0x2fd   : > { %v1773_v19 = vpop.permute.xlu1 %1772  ;;  %v5842_v37 = vpop.permute.xlu0 %1770 }
 0x2ff   : > { %2090 = vrot.lane.b32.xlu0 %v2077_v53, %s7501_s23  ;;  %2092 = vrot.lane.b32.xlu1 %v2078_v44, %s7501_s23  ;;  %v2005_v44 = vmul.f32 %v1996_v33, %v5800_v39 }
 0x301   : > { %v5851_v22 = vpop.permute.xlu1 %1776  ;;  %v1775_v58 = vpop.permute.xlu0 %1774 }
 0x302   : > { %v1780_v61 = vsel %vm492_vm4, %v1775_v58, %v5851_v22 }
 0x303   : > { %2084 = vrot.lane.b32.xlu0 %v2074_v56, %s7501_s23  ;;  %2014 = vrot.lane.b32.xlu1 %v2003_v54, %s7494_s10  ;;  %v1922_v54 = vsel %vm7499_vm6, %v5811_v26, %v1917_v50  ;;  %v1934_v50 = vmul.f32 %v5819_v60, %v1921_v2  ;;  %s7581_s23 = smov 126  }
 0x304   : > { %v1931_v33 = vmul.f32 %v1922_v54, %v5770_v36  ;;  %v1850_v54 = vsel %vm566_vm5, %v5826_v55, %v1845_v47 }
 0x305   : > { %v5859_v53 = vpop.permute.xlu1 %1700  ;;  %v5861_v28 = vpop.permute.xlu0 %1698 }
 0x307   : > { %2018 = vrot.lane.b32.xlu1 %v2005_v44, %s7494_s10  ;;  %2016 = vrot.lane.b32.xlu0 %v2004_v24, %s7494_s10  ;;  %v1932_v24 = vmul.f32 %v1923_v23, %v5777_v21  ;;  %v1924_v44 = vsel %vm7499_vm6, %v1919_v40, %v1921_v2  ;;  %v1930_v40 = vmul.f32 %v5811_v26, %v5768_v52  ;;  %vm7504_vm6 = vcmask 392192  }
 0x308   : > { %v1859_v23 = vmul.f32 %v1850_v54, %v5770_v36 }
 0x309   : > { %v5868_v20 = vpop.permute.xlu1 %1704  ;;  %v5870_v56 = vpop.permute.xlu0 %1702 }
 0x30a   : > { %v1708_v42 = vsel %vm418_vm3, %v5870_v56, %v5868_v20 }
 0x30b   : > { %2012 = vrot.lane.b32.xlu1 %v2002_v17, %s7494_s10  ;;  %2020 = vrot.lane.b32.xlu0 %v2006_v14, %s7494_s10  ;;  %v1933_v17 = vmul.f32 %v1924_v44, %v5800_v39  ;;  %v1852_v44 = vsel %vm566_vm5, %v1847_v18, %v5835_v34  ;;  %s7579_s10 = smov 119  }
 0x30d   : > { %v5879_v49 = vpop.permute.xlu1 %1628  ;;  %v5881_v35 = vpop.permute.xlu0 %1626 }
 0x30f   : > { %1942 = vrot.lane.b32.xlu0 %v1931_v33, %s7497_s11  ;;  %1944 = vrot.lane.b32.xlu1 %v1932_v24, %s7497_s11  ;;  %v1851_v24 = vsel %vm566_vm5, %v1845_v47, %v1847_v18  ;;  %v1858_v47 = vmul.f32 %v5826_v55, %v5768_v52  ;;  %v1862_v18 = vmul.f32 %v5819_v60, %v5835_v34 }
 0x311   : > { %v5888_v51 = vpop.permute.xlu1 %1632  ;;  %v5890_v14 = vpop.permute.xlu0 %1630 }
 0x313   : > { %1946 = vrot.lane.b32.xlu0 %v1933_v17, %s7497_s11  ;;  %1948 = vrot.lane.b32.xlu1 %v1934_v50, %s7497_s11  ;;  %v1860_v50 = vmul.f32 %v1851_v24, %v5777_v21  ;;  %v1861_v17 = vmul.f32 %v1852_v44, %v5800_v39  ;;  %v1778_v24 = vsel %vm492_vm4, %v5842_v37, %v1773_v19 }
 0x314   : > { %v1779_v44 = vsel %vm492_vm4, %v1773_v19, %v1775_v58  ;;  %v1790_v19 = vmul.f32 %v5819_v60, %v5851_v22  ;;  %v1786_v58 = vmul.f32 %v5842_v37, %v5768_v52 }
 0x315   : > { %v5899_v33 = vpop.permute.xlu1 %1519  ;;  %v5901_v2 = vpop.permute.xlu0 %1517  ;;  %v1788_v55 = vmul.f32 %v1779_v44, %v5777_v21  ;;  %v1706_v44 = vsel %vm418_vm3, %v5861_v28, %v5859_v53 }
 0x316   : > { %v1715_v22 = vmul.f32 %v1706_v44, %v5770_v36 }
 0x317   : > { %1940 = vrot.lane.b32.xlu0 %v1930_v40, %s7497_s11  ;;  %1870 = vrot.lane.b32.xlu1 %v1859_v23, %s7579_s10  ;;  %s7580_s11 = smov 120  }
 0x319   : > { %v5910_v26 = vpop.permute.xlu1 %1523  ;;  %v5912_v54 = vpop.permute.xlu0 %1521 }
 0x31b   : > { %1874 = vrot.lane.b32.xlu1 %v1861_v17, %s7579_s10  ;;  %1872 = vrot.lane.b32.xlu0 %v1860_v50, %s7579_s10  ;;  %v1787_v50 = vmul.f32 %v1778_v24, %v5770_v36 }
 0x31d   : > { %v5920_v40 = vpop.permute.xlu1 %1445  ;;  %v5922_v23 = vpop.permute.xlu0 %1443 }
 0x31f   : > { %1868 = vrot.lane.b32.xlu1 %v1858_v47, %s7579_s10  ;;  %1876 = vrot.lane.b32.xlu0 %v1862_v18, %s7579_s10  ;;  %v1789_v47 = vmul.f32 %v1780_v61, %v5800_v39 }
 0x321   : > { %v5931_v17 = vpop.permute.xlu1 %1449  ;;  %v5933_v34 = vpop.permute.xlu0 %1447 }
 0x323   : > { %1798 = vrot.lane.b32.xlu0 %v1787_v50, %s7580_s11  ;;  %1800 = vrot.lane.b32.xlu1 %v1788_v55, %s7580_s11  ;;  %v1707_v55 = vsel %vm418_vm3, %v5859_v53, %v5870_v56  ;;  %v1714_v56 = vmul.f32 %v5861_v28, %v5768_v52 }
 0x324   : > { %v1716_v37 = vmul.f32 %v1707_v55, %v5777_v21  ;;  %v1636_v55 = vsel %vm344_vm2, %v5890_v14, %v5888_v51 }
 0x325   : > { %v1401_v18 = vpop.permute.xlu1 %1400  ;;  %v1399_v24 = vpop.permute.xlu0 %1398 }
 0x326   : > { %v1408_v0 = vsel %vm7504_vm6, %v1399_v24, %v1401_v18 }
 0x327   : > { %1802 = vrot.lane.b32.xlu0 %v1789_v47, %s7580_s11  ;;  %1804 = vrot.lane.b32.xlu1 %v1790_v19, %s7580_s11 }
 0x328   : > { %2298 = vmatprep.subr.mxu0 %v1408_v0  ;;  %v1717_v0 = vmul.f32 %v1708_v42, %v5800_v39  ;;  %v1634_v42 = vsel %vm344_vm2, %v5881_v35, %v5879_v49 }
 0x329   : > { %v1405_v50 = vpop.permute.xlu1 %1404  ;;  %v1403_v61 = vpop.permute.xlu0 %1402 }
 0x32a   : > { %v1410_v47 = vsel %vm7504_vm6, %v1403_v61, %v1405_v50  ;;  %v1409_v19 = vsel %vm7504_vm6, %v1401_v18, %v1403_v61  ;;  %v1718_v18 = vmul.f32 %v5819_v60, %v5868_v20 }
 0x32b   : > { %1796 = vrot.lane.b32.xlu0 %v1786_v58, %s7580_s11  ;;  %1726 = vrot.lane.b32.xlu1 %v1715_v22, %s7581_s23 }
 0x32c   : > { %2369 = vmatprep.subr.mxu1 %v1410_v47 }
 0x32d   : > { %2370 = vmatpush1.msra.mxu1 %v1409_v19  ;;  %v1325_v44 = vpop.permute.xlu1 %1324  ;;  %v1397_v53 = vpop.permute.xlu0 %1396 }
 0x32e   : > { %v1407_v38 = vsel %vm7504_vm6, %v1397_v53, %v1399_v24  ;;  %v1635_v24 = vsel %vm344_vm2, %v5879_v49, %v5890_v14  ;;  %vm7510_vm6 = vcmask 670720  }
 0x32f   : > { %1730 = vrot.lane.b32.xlu1 %v1717_v0, %s7581_s23  ;;  %1728 = vrot.lane.b32.xlu0 %v1716_v37, %s7581_s23  ;;  %v1644_v28 = vmul.f32 %v1635_v24, %v5777_v21  ;;  %v1646_v37 = vmul.f32 %v5819_v60, %v5888_v51  ;;  %v1645_v0 = vmul.f32 %v1636_v55, %v5800_v39 }
 0x330   : > { %2299 = vmatpush1.msra.mxu0 %v1407_v38  ;;  %v1643_v38 = vmul.f32 %v1634_v42, %v5770_v36  ;;  %v1526_v53 = vsel %vm7510_vm6, %v5901_v2, %v5899_v33  ;;  %v1528_v42 = vsel %vm7510_vm6, %v5912_v54, %v5910_v26  ;;  %v1538_v55 = vmul.f32 %v5910_v26, %v5800_v39 }
 0x331   : > { %v1329_v58 = vpop.permute.xlu1 %1328  ;;  %v1327_v22 = vpop.permute.xlu0 %1326  ;;  %v1535_v51 = vmul.f32 %v1526_v53, %v5768_v52  ;;  %v5022_v53 = vmov 0  }
 0x332   : > { %v1334_v50 = vsel %vm7511_vm7, %v1325_v44, %v1327_v22  ;;  %v1335_v19 = vsel %vm7511_vm7, %v1327_v22, %v1329_v58  ;;  %v1527_v22 = vsel %vm7510_vm6, %v5899_v33, %v5912_v54  ;;  %vm7520_vm6 = vcmask 662528   ;;  %v2179_v54 = vld [vmem:[#allocation7 + $0x8] sm:$0xff]  ;;  %4826 = vset.pattern.permute.xlu1 %v5022_v53  ;;  %4827 = vset.pattern.permute.xlu0 %v5022_v53 }
 0x333   : > { %1724 = vrot.lane.b32.xlu1 %v1714_v56, %s7581_s23  ;;  %1732 = vrot.lane.b32.xlu0 %v1718_v18, %s7581_s23  ;;  %v1642_v18 = vmul.f32 %v5881_v35, %v5768_v52  ;;  %v1536_v35 = vmul.f32 %v1527_v22, %v5770_v36 }
 0x334   : > { %2300 = vmatprep.subr.mxu0 %v1334_v50  ;;  %4709 = vmatprep.mubr.msk.f32.mxu1 %vm7515_vm9, %v2179_v54 }
 0x335   : > { %v1323_v20 = vpop.permute.xlu1 %1322  ;;  %v1331_v61 = vpop.permute.xlu0 %1330  ;;  %4708 = vmatprep.mubr.msk.f32.mxu0 %vm7515_vm9, %v2179_v54  ;;  %vm7521_vm9 = vcmask 506880  }
 0x336   : > { %v1333_v47 = vsel %vm7511_vm7, %v1323_v20, %v1325_v44  ;;  %v1336_v49 = vsel %vm7511_vm7, %v1329_v58, %v1331_v61  ;;  %vm7522_vm7 = vcmask 457728   ;;  %v1534_v61 = vmul.f32 %v5901_v2, %v5798_v57 }
 0x337   : > { %1654 = vrot.lane.b32.xlu0 %v1643_v38, %s7582_s28  ;;  %1656 = vrot.lane.b32.xlu1 %v1644_v28, %s7582_s28  ;;  %v1537_v38 = vmul.f32 %v1528_v42, %v5777_v21 }
 0x338   : > { %2301 = vmatpush1.msra.mxu0 %v1333_v47  ;;  %2371 = vmatprep.subr.mxu1 %v1336_v49 }
 0x339   : > { %2372 = vmatpush1.msra.mxu1 %v1335_v19  ;;  %v1253_v14 = vpop.permute.xlu1 %1252  ;;  %v1251_v44 = vpop.permute.xlu0 %1250  ;;  %v1452_v19 = vsel %vm7520_vm6, %v5922_v23, %v5920_v40 }
 0x33a   : > { %v1260_v56 = vsel %vm7524_vm8, %v1251_v44, %v1253_v14  ;;  %v1461_v2 = vmul.f32 %v1452_v19, %v5768_v52 }
 0x33b   : > { %1658 = vrot.lane.b32.xlu0 %v1645_v0, %s7582_s28  ;;  %1660 = vrot.lane.b32.xlu1 %v1646_v37, %s7582_s28  ;;  %v1453_v37 = vsel %vm7520_vm6, %v5920_v40, %v5933_v34 }
 0x33c   : > { %2302 = vmatprep.subr.mxu0 %v1260_v56  ;;  %v1462_v26 = vmul.f32 %v1453_v37, %v5770_v36  ;;  %v1454_v56 = vsel %vm7520_vm6, %v5933_v34, %v5931_v17  ;;  %vm7523_vm6 = vcmask 515072  }
 0x33d   : > { %v1257_v60 = vpop.permute.xlu1 %1256  ;;  %v1255_v58 = vpop.permute.xlu0 %1254  ;;  %v1463_v34 = vmul.f32 %v1454_v56, %v5777_v21 }
 0x33e   : > { %v1262_v24 = vsel %vm7524_vm8, %v1255_v58, %v1257_v60  ;;  %v1261_v50 = vsel %vm7524_vm8, %v1253_v14, %v1255_v58  ;;  %v1464_v60 = vmul.f32 %v5931_v17, %v5800_v39  ;;  %v2288_v39 = vld [vmem:[%s7443_s2] sm:$0xff] }
 0x33f   : > { %1652 = vrot.lane.b32.xlu0 %v1642_v18, %s7582_s28  ;;  %1546 = vrot.lane.b32.xlu1 %v1535_v51, %s7516_s27  ;;  %v2508_v17 = vld [vmem:[#allocation9 + $0x1] ss:$8 sm:$0xf] }
 0x340   : > { %2373 = vmatprep.subr.mxu1 %v1262_v24  ;;  %v1460_v24 = vmul.f32 %v5922_v23, %v5798_v57  ;;  %v2517_v23 = vrot.slane %v2508_v17, %v5192_v5 }
 0x341   : > { %2374 = vmatpush1.msra.mxu1 %v1261_v50  ;;  %v1178_v33 = vpop.permute.xlu1 %1177  ;;  %v1249_v28 = vpop.permute.xlu0 %1248 }
 0x342   : > { %v1259_v20 = vsel %vm7524_vm8, %v1249_v28, %v1251_v44  ;;  %v2513_v28 = vrot.slane %v2508_v17, %v5194_v6  ;;  %vm669_vm8 = vcmask 965632  }
 0x343   : > { %1550 = vrot.lane.b32.xlu1 %v1537_v38, %s7516_s27  ;;  %1548 = vrot.lane.b32.xlu0 %v1536_v35, %s7516_s27 }
 0x344   : > { %2303 = vmatpush1.msra.mxu0 %v1259_v20 }
 0x345   : > { %v1182_v47 = vpop.permute.xlu1 %1181  ;;  %v1180_v49 = vpop.permute.xlu0 %1179 }
 0x346   : > { %v1187_v0 = vsel %vm7522_vm7, %v1178_v33, %v1180_v49  ;;  %v1188_v51 = vsel %vm7522_vm7, %v1180_v49, %v1182_v47 }
 0x347   : > { %1544 = vrot.lane.b32.xlu1 %v1534_v61, %s7516_s27  ;;  %1552 = vrot.lane.b32.xlu0 %v1538_v55, %s7516_s27  ;;  %v2521_v55 = vrot.slane %v2508_v17, %v5204_v13  ;;  %s7603_s27 = smov 80  }
 0x348   : > { %2304 = vmatprep.subr.mxu0 %v1187_v0  ;;  %v6063_v0 = vld [vmem:[#allocation9 + $0x2] ss:$8 sm:$0xf] }
 0x349   : > { %v1176_v14 = vpop.permute.xlu1 %1175  ;;  %v1184_v44 = vpop.permute.xlu0 %1183  ;;  %v2588_v56 = vrot.slane %v6063_v0, %v5192_v5 }
 0x34a   : > { %v1186_v40 = vsel %vm7522_vm7, %v1176_v14, %v1178_v33  ;;  %v1189_v18 = vsel %vm7522_vm7, %v1182_v47, %v1184_v44  ;;  %v2525_v47 = vrot.slane %v2508_v17, %v5202_v12  ;;  %v2584_v14 = vrot.slane %v6063_v0, %v5194_v6  ;;  %v282_v17 = vld [vmem:[#allocation9] ss:$8 sm:$0xf] }
 0x34b   : > { %1472 = vrot.lane.b32.xlu0 %v1461_v2, %s5023_s20  ;;  %1474 = vrot.lane.b32.xlu1 %v1462_v26, %s5023_s20  ;;  %vm817_vm7 = vcmask 908288  }
 0x34c   : > { %2305 = vmatpush1.msra.mxu0 %v1186_v40  ;;  %2375 = vmatprep.subr.mxu1 %v1189_v18  ;;  %v965_v40 = vsel %vm7525_vm10, %v5688_v27, %v5696_v16 }
 0x34d   : > { %2376 = vmatpush1.msra.mxu1 %v1188_v51  ;;  %v1106_v58 = vpop.permute.xlu1 %1105  ;;  %v1104_v22 = vpop.permute.xlu0 %1103  ;;  %v964_v51 = vsel %vm7525_vm10, %v5686_v25, %v5688_v27  ;;  %v819_v25 = vsel %vm817_vm7, %v5523_v7, %v5531_v11  ;;  %v966_v27 = vsel %vm7525_vm10, %v5696_v16, %v5694_v15 }
 0x34e   : > { %v1113_v42 = vsel %vm7521_vm9, %v1104_v22, %v1106_v58 }
 0x34f   : > { %1476 = vrot.lane.b32.xlu0 %v1463_v34, %s5023_s20  ;;  %1478 = vrot.lane.b32.xlu1 %v1464_v60, %s5023_s20 }
 0x350   : > { %2306 = vmatprep.subr.mxu0 %v1113_v42 }
 0x351   : > { %v1110_v50 = vpop.permute.xlu1 %1109  ;;  %v1108_v35 = vpop.permute.xlu0 %1107 }
 0x352   : > { %v1115_v38 = vsel %vm7521_vm9, %v1108_v35, %v1110_v50  ;;  %v1114_v33 = vsel %vm7521_vm9, %v1106_v58, %v1108_v35 }
 0x353   : > { %1470 = vrot.lane.b32.xlu0 %v1460_v24, %s5023_s20  ;;  %2377 = vmatprep.subr.mxu1 %v1115_v38  ;;  %v7586_v38 = vld [vmem:[#allocation34_spill] sm:$0xff] }
 0x354   : > { %2378 = vmatpush1.msra.mxu1 %v1114_v33  ;;  %2291 = vperm.xlu1 %4826, %v2288_v39   ;;  %v7587_v33 = vld [vmem:[#allocation30_spill] sm:$0xff] }
 0x355   : > { %v1030_v20 = vpop.permute.xlu1 %1029  ;;  %v1102_v54 = vpop.permute.xlu0 %1101 }
 0x356   : > { %v1112_v61 = vsel %vm7521_vm9, %v1102_v54, %v1104_v22  ;;  %vm890_vm9 = vcmask 900096  }
 0x357   : > { %2307 = vmatpush1.msra.mxu0 %v1112_v61  ;;  %2526 = vrot.lane.b32.xlu0 %v2513_v28, %s7578_s14  ;;  %v892_v58 = vsel %vm890_vm9, %v5556_v30, %v5554_v29  ;;  %v891_v22 = vsel %vm890_vm9, %v5552_v1, %v5556_v30  ;;  %v818_v1 = vsel %vm817_vm7, %v5489_v45, %v5523_v7 }
 0x358   : > { %2528 = vrot.lane.b32.xlu1 %v2517_v23, %s7578_s14  ;;  %v894_v30 = vsel %vm890_vm9, %v5560_v32, %v5558_v31  ;;  %v893_v16 = vsel %vm890_vm9, %v5554_v29, %v5560_v32  ;;  %v821_v7 = vsel %vm817_vm7, %v5529_v10, %v5493_v48  ;;  %v671_v31 = vsel %vm669_vm8, %v5511_v62, %v5521_v4  ;;  %v7589_v23 = vld [vmem:[#allocation24_spill] sm:$0xff] }
 0x359   : > { %v1034_v49 = vpop.permute.xlu1 %1033  ;;  %v1032_v19 = vpop.permute.xlu0 %1031  ;;  %v820_v29 = vsel %vm817_vm7, %v5531_v11, %v5529_v10  ;;  %v7585_v11 = vld [vmem:[#allocation35_spill] sm:$0xff]  ;;  %v523_v28 = vsel %vm521_vm15, %v7587_v33, %v7586_v38  ;;  %v291_v61 = vrot.slane %v282_v17, %v5192_v5 }
 0x35a   : > { %v1039_v37 = vsel %vm7523_vm6, %v1030_v20, %v1032_v19  ;;  %v1040_v18 = vsel %vm7523_vm6, %v1032_v19, %v1034_v49  ;;  %v7592_v19 = vld [vmem:[#allocation31_spill] sm:$0xff] }
 0x35b   : > { %2308 = vmatprep.subr.mxu0 %v1039_v37  ;;  %2530 = vrot.lane.b32.xlu0 %v2521_v55, %s7578_s14 }
 0x35c   : > { %2532 = vrot.lane.b32.xlu1 %v2525_v47, %s7578_s14 }
 0x35d   : > { %v1028_v2 = vpop.permute.xlu1 %1027  ;;  %v1036_v26 = vpop.permute.xlu0 %1035 }
 0x35e   : > { %v1038_v44 = vsel %vm7523_vm6, %v1028_v2, %v1030_v20  ;;  %v1041_v53 = vsel %vm7523_vm6, %v1034_v49, %v1036_v26  ;;  %vm743_vm6 = vcmask 916480   ;;  %v7590_v20 = vld [vmem:[#allocation36_spill] sm:$0xff]  ;;  %v287_v2 = vrot.slane %v282_v17, %v5194_v6  ;;  %v7593_v26 = vld [vmem:[#allocation18_spill] sm:$0xff] }
 0x35f   : > { %2309 = vmatpush1.msra.mxu0 %v1038_v44  ;;  %2379 = vmatprep.subr.mxu1 %v1041_v53  ;;  %v744_v45 = vsel %vm743_vm6, %v5481_v46, %v5525_v8  ;;  %v670_v46 = vsel %vm669_vm8, %v5479_v41, %v5511_v62  ;;  %v747_v48 = vsel %vm743_vm6, %v5527_v9, %v5485_v43  ;;  %v7583_v41 = vld [vmem:[#allocation22_spill] sm:$0xff]  ;;  %v7584_v62 = vld [vmem:[#allocation25_spill] sm:$0xff]  ;;  %v7591_v49 = vld [vmem:[#allocation28_spill] sm:$0xff] }
 0x360   : > { %2310 = vmatprep.subr.mxu0 %v965_v40  ;;  %2380 = vmatpush1.msra.mxu1 %v1040_v18  ;;  %v746_v10 = vsel %vm743_vm6, %v5519_v3, %v5527_v9  ;;  %v673_v39 = vsel %vm669_vm8, %v7585_v11, %v7584_v62  ;;  %v7594_v44 = vld [vmem:[#allocation23_spill] sm:$0xff]  ;;  %v7595_v53 = vld [vmem:[#allocation32_spill] sm:$0xff]  ;;  %v299_v40 = vrot.slane %v282_v17, %v5202_v12  ;;  %v7596_v18 = vld [vmem:[#allocation29_spill] sm:$0xff] }
 0x361   : > { %v6080_v60 = vpop.permute.xlu1 %2158  ;;  %2311 = vmatpush1.msra.mxu0 %v964_v51  ;;  %v963_v34 = vpop.permute.xlu0 %962  ;;  %2597 = vrot.lane.b32.xlu1 %v2584_v14, %s4992_s5  ;;  %v448_v14 = vsel %vm7529_vm14, %v7593_v26, %v7592_v19  ;;  %v7597_v51 = vld [vmem:[#allocation26_spill] sm:$0xff] }
 0x362   : > { %2312 = vmatprep.subr.mxu0 %v892_v58  ;;  %v967_v42 = vsel %vm7525_vm10, %v5694_v15, %v963_v34  ;;  %2599 = vrot.lane.b32.xlu0 %v2588_v56, %s4992_s5  ;;  %v745_v15 = vsel %vm743_vm6, %v5525_v8, %v5519_v3  ;;  %vm595_vm10 = vcmask 973824   ;;  %v672_v3 = vsel %vm669_vm8, %v5521_v4, %v7585_v11 }
 0x363   : > { %2313 = vmatpush1.msra.mxu0 %v891_v22  ;;  %2381 = vmatprep.subr.mxu1 %v967_v42  ;;  %v597_v35 = vsel %vm595_vm10, %v5513_v63, %v5507_v59  ;;  %v596_v43 = vsel %vm595_vm10, %v7583_v41, %v5513_v63  ;;  %v7588_v63 = vld [vmem:[#allocation21_spill] sm:$0xff]  ;;  %v599_v54 = vsel %vm595_vm10, %v7590_v20, %v7589_v23 }
 0x364   : > { %2314 = vmatprep.subr.mxu0 %v819_v25  ;;  %2382 = vmatpush1.msra.mxu1 %v966_v27  ;;  %v522_v9 = vsel %vm521_vm15, %v7588_v63, %v7587_v33  ;;  %v449_v4 = vsel %vm7529_vm14, %v7592_v19, %v7591_v49  ;;  %v598_v37 = vsel %vm595_vm10, %v5507_v59, %v7590_v20  ;;  %v7598_v22 = vld [vmem:[#allocation17_spill] sm:$0xff]  ;;  %v7599_v25 = vld [vmem:[#allocation20_spill] sm:$0xff] }
 0x365   : > { %v6104_v24 = vpop.permute.xlu1 %2162  ;;  %2315 = vmatpush1.msra.mxu0 %v818_v1  ;;  %2383 = vmatprep.subr.mxu1 %v894_v30  ;;  %v6106_v50 = vpop.permute.xlu0 %2160  ;;  %v525_v56 = vsel %vm521_vm15, %v7595_v53, %v7594_v44  ;;  %v375_v59 = vsel %vm7530_vm13, %v7597_v51, %v7596_v18  ;;  %v524_v34 = vsel %vm521_vm15, %v7586_v38, %v7595_v53  ;;  %v7600_v27 = vld [vmem:[#allocation33_spill] sm:$0xff] }
 0x366   : > { %2316 = vmatprep.subr.mxu0 %v745_v15  ;;  %2384 = vmatpush1.msra.mxu1 %v893_v16  ;;  %v295_v58 = vrot.slane %v282_v17, %v5204_v13  ;;  %v374_v42 = vsel %vm7530_vm13, %v7598_v22, %v7597_v51  ;;  %v451_v1 = vsel %vm7529_vm14, %v7600_v27, %v7599_v25  ;;  %v2721_v23 = vld [vmem:[#allocation9 + $0x4] ss:$8 sm:$0xf] }
 0x367   : > { %2317 = vmatpush1.msra.mxu0 %v744_v45  ;;  %2385 = vmatprep.subr.mxu1 %v821_v7  ;;  %v305_v30 = vmul.f32 %v5768_v52, %v291_v61  ;;  %v450_v45 = vsel %vm7529_vm14, %v7591_v49, %v7600_v27  ;;  %v304_v7 = vmul.f32 %v5798_v57, %v287_v2 }
 0x368   : > { %2318 = vmatprep.subr.mxu0 %v671_v31  ;;  %2386 = vmatpush1.msra.mxu1 %v820_v29  ;;  %v7601_v31 = vld [vmem:[#allocation19_spill] sm:$0xff]  ;;  %v2167_v52 = vsel %vm890_vm9, %v6080_v60, %v6106_v50  ;;  %v2592_v41 = vrot.slane %v6063_v0, %v5204_v13  ;;  %v2730_v19 = vrot.slane %v2721_v23, %v5192_v5 }
 0x369   : > { %v2157_v8 = vpop.permute.xlu1 %2156  ;;  %2319 = vmatpush1.msra.mxu0 %v670_v46  ;;  %2387 = vmatprep.subr.mxu1 %v747_v48  ;;  %v6132_v32 = vpop.permute.xlu0 %2164  ;;  %v7602_v29 = vld [vmem:[#allocation27_spill] sm:$0xff] }
 0x36a   : > { %2320 = vmatprep.subr.mxu0 %v597_v35  ;;  %2388 = vmatpush1.msra.mxu1 %v746_v10  ;;  %v377_v46 = vsel %vm7530_vm13, %v7602_v29, %v7601_v31  ;;  %v376_v48 = vsel %vm7530_vm13, %v7596_v18, %v7602_v29  ;;  %v307_v35 = vmul.f32 %v5777_v21, %v299_v40 }
 0x36b   : > { %2321 = vmatpush1.msra.mxu0 %v596_v43  ;;  %2389 = vmatprep.subr.mxu1 %v673_v39  ;;  %v2166_v57 = vsel %vm890_vm9, %v2157_v8, %v6080_v60  ;;  %v306_v10 = vmul.f32 %v5770_v36, %v295_v58  ;;  %v2596_v21 = vrot.slane %v6063_v0, %v5202_v12  ;;  %v2650_v39 = vld [vmem:[#allocation9 + $0x3] ss:$8 sm:$0xf] }
 0x36c   : > { %2322 = vmatprep.subr.mxu0 %v523_v28  ;;  %2390 = vmatpush1.msra.mxu1 %v672_v3  ;;  %v2169_v36 = vsel %vm890_vm9, %v6104_v24, %v6132_v32  ;;  %v2168_v8 = vsel %vm890_vm9, %v6106_v50, %v6104_v24  ;;  %v2659_v0 = vrot.slane %v2650_v39, %v5192_v5 }
 0x36d   : > { %v6159_v55 = vpop.permute.xlu1 %2088  ;;  %2323 = vmatpush1.msra.mxu0 %v522_v9  ;;  %2391 = vmatprep.subr.mxu1 %v599_v54  ;;  %v2087_v47 = vpop.permute.xlu0 %2086  ;;  %v2655_v32 = vrot.slane %v2650_v39, %v5194_v6  ;;  %v2667_v50 = vrot.slane %v2650_v39, %v5202_v12  ;;  %v2663_v9 = vrot.slane %v2650_v39, %v5204_v13 }
 0x36e   : > { %2324 = vmatprep.subr.mxu0 %v449_v4  ;;  %2392 = vmatpush1.msra.mxu1 %v598_v37  ;;  %v2095_v11 = vsel %vm817_vm7, %v2087_v47, %v6159_v55  ;;  %v2734_v37 = vrot.slane %v2721_v23, %v5204_v13 }
 0x36f   : > { %2325 = vmatpush1.msra.mxu0 %v448_v14  ;;  %2393 = vmatprep.subr.mxu1 %v525_v56  ;;  %v2738_v14 = vrot.slane %v2721_v23, %v5202_v12 }
 0x370   : > { %2326 = vmatprep.subr.mxu0 %v375_v59  ;;  %2394 = vmatpush1.msra.mxu1 %v524_v34 }
 0x371   : > { %v2093_v15 = vpop.permute.xlu1 %2092  ;;  %2327 = vmatpush1.msra.mxu0 %v374_v42  ;;  %2395 = vmatprep.subr.mxu1 %v451_v1  ;;  %v2091_v16 = vpop.permute.xlu0 %2090 }
 0x372   : > { %2328 = vmatprep.subr.mxu0 %v305_v30  ;;  %2396 = vmatpush1.msra.mxu1 %v450_v45  ;;  %v2097_v17 = vsel %vm817_vm7, %v2091_v16, %v2093_v15  ;;  %v2096_v28 = vsel %vm817_vm7, %v6159_v55, %v2091_v16  ;;  %v2726_v55 = vrot.slane %v2721_v23, %v5194_v6 }
 0x373   : > { %2329 = vmatpush1.msra.mxu0 %v304_v7  ;;  %2397 = vmatprep.subr.mxu1 %v377_v46 }
 0x374   : > { %2340 = vmatprep.subr.mxu0 %v2167_v52  ;;  %2398 = vmatpush1.msra.mxu1 %v376_v48 }
 0x375   : > { %v2015_v43 = vpop.permute.xlu1 %2014  ;;  %2399 = vmatprep.subr.mxu1 %v307_v35  ;;  %v2085_v62 = vpop.permute.xlu0 %2084  ;;  %2341 = vmatpush2.msra.mxu0 %v2166_v57 }
 0x376   : > { %2342 = vmatprep.subr.mxu0 %v2095_v11  ;;  %2400 = vmatpush1.msra.mxu1 %v306_v10  ;;  %v2094_v60 = vsel %vm817_vm7, %v2085_v62, %v2087_v47 }
 0x377   : > { %2343 = vmatpush2.msra.mxu0 %v2094_v60  ;;  %2411 = vmatprep.subr.mxu1 %v2169_v36 }
 0x378   : > { %2412 = vmatpush2.msra.mxu1 %v2168_v8  ;;  %2601 = vrot.lane.b32.xlu1 %v2592_v41, %s4992_s5 }
 0x379   : > { %v2019_v38 = vpop.permute.xlu1 %2018  ;;  %2413 = vmatprep.subr.mxu1 %v2097_v17  ;;  %v2017_v33 = vpop.permute.xlu0 %2016  ;;  %2603 = vrot.lane.b32.xlu0 %v2596_v21, %s4992_s5  ;;  %v1572_v21 = vld [vmem:[#allocation9 + $0x42] ss:$8 sm:$0xf] }
 0x37a   : > { %2414 = vmatpush2.msra.mxu1 %v2096_v28  ;;  %v2023_v24 = vsel %vm743_vm6, %v2015_v43, %v2017_v33  ;;  %v2024_v61 = vsel %vm743_vm6, %v2017_v33, %v2019_v38  ;;  %v1589_v8 = vrot.slane %v1572_v21, %v5202_v12  ;;  %v1570_v17 = vld [vmem:[#allocation2 + $0x20] sm:$0xff]  ;;  %v1569_v28 = vld [vmem:[#allocation2 + $0x18] sm:$0xff] }
 0x37b   : > { %2344 = vmatprep.subr.mxu0 %v2023_v24 }
 0x37c   : > { %2670 = vrot.lane.b32.xlu1 %v2659_v0, %s4993_s7  ;;  %v1585_v0 = vrot.slane %v1572_v21, %v5204_v13 }
 0x37d   : > { %v2013_v3 = vpop.permute.xlu1 %2012  ;;  %v2021_v63 = vpop.permute.xlu0 %2020  ;;  %2668 = vrot.lane.b32.xlu0 %v2655_v32, %s4993_s7 }
 0x37e   : > { %v2022_v20 = vsel %vm743_vm6, %v2013_v3, %v2015_v43  ;;  %v2025_v54 = vsel %vm743_vm6, %v2019_v38, %v2021_v63  ;;  %v1597_v3 = vmul.f32 %v1589_v8, %v1570_v17  ;;  %v1568_v63 = vld [vmem:[#allocation2 + $0x10] sm:$0xff]  ;;  %v1596_v23 = vmul.f32 %v1585_v0, %v1569_v28 }
 0x37f   : > { %2345 = vmatpush2.msra.mxu0 %v2022_v20  ;;  %2415 = vmatprep.subr.mxu1 %v2025_v54  ;;  %v1567_v20 = vld [vmem:[#allocation2 + $0x8] sm:$0xff] }
 0x380   : > { %2416 = vmatpush2.msra.mxu1 %v2024_v61  ;;  %2674 = vrot.lane.b32.xlu1 %v2667_v50, %s4993_s7  ;;  %v1581_v50 = vrot.slane %v1572_v21, %v5192_v5 }
 0x381   : > { %v1945_v47 = vpop.permute.xlu1 %1944  ;;  %v1943_v49 = vpop.permute.xlu0 %1942  ;;  %2672 = vrot.lane.b32.xlu0 %v2663_v9, %s4993_s7  ;;  %v1577_v9 = vrot.slane %v1572_v21, %v5194_v6 }
 0x382   : > { %v1951_v4 = vsel %vm669_vm8, %v1943_v49, %v1945_v47 }
 0x383   : > { %2346 = vmatprep.subr.mxu0 %v1951_v4 }
 0x384   : > { %2739 = vrot.lane.b32.xlu1 %v2726_v55, %s4994_s8 }
 0x385   : > { %v1949_v2 = vpop.permute.xlu1 %1948  ;;  %v1947_v26 = vpop.permute.xlu0 %1946  ;;  %2741 = vrot.lane.b32.xlu0 %v2730_v19, %s4994_s8 }
 0x386   : > { %v1953_v44 = vsel %vm669_vm8, %v1947_v26, %v1949_v2  ;;  %v1952_v53 = vsel %vm669_vm8, %v1945_v47, %v1947_v26  ;;  %v1595_v47 = vmul.f32 %v1581_v50, %v1568_v63  ;;  %v3289_v50 = vld [vmem:[#allocation9 + $0x24] ss:$8 sm:$0xf] }
 0x387   : > { %2417 = vmatprep.subr.mxu1 %v1953_v44  ;;  %v3294_v63 = vrot.slane %v3289_v50, %v5194_v6 }
 0x388   : > { %2418 = vmatpush2.msra.mxu1 %v1952_v53  ;;  %2743 = vrot.lane.b32.xlu1 %v2734_v37, %s4994_s8 }
 0x389   : > { %v1871_v56 = vpop.permute.xlu1 %1870  ;;  %v1941_v40 = vpop.permute.xlu0 %1940  ;;  %2745 = vrot.lane.b32.xlu0 %v2738_v14, %s4994_s8 }
 0x38a   : > { %v1950_v18 = vsel %vm669_vm8, %v1941_v40, %v1943_v49  ;;  %v1594_v49 = vmul.f32 %v1577_v9, %v1567_v20  ;;  %v3298_v9 = vrot.slane %v3289_v50, %v5192_v5  ;;  %v3218_v20 = vld [vmem:[#allocation9 + $0x23] ss:$8 sm:$0xf] }
 0x38b   : > { %2347 = vmatpush2.msra.mxu0 %v1950_v18 }
 0x38d   : > { %v1875_v51 = vpop.permute.xlu1 %1874  ;;  %v1873_v59 = vpop.permute.xlu0 %1872 }
 0x38e   : > { %v1879_v34 = vsel %vm595_vm10, %v1871_v56, %v1873_v59  ;;  %v1880_v27 = vsel %vm595_vm10, %v1873_v59, %v1875_v51 }
 0x38f   : > { %2348 = vmatprep.subr.mxu0 %v1879_v34 }
 0x391   : > { %v1869_v58 = vpop.permute.xlu1 %1868  ;;  %v1877_v22 = vpop.permute.xlu0 %1876 }
 0x392   : > { %v1878_v42 = vsel %vm595_vm10, %v1869_v58, %v1871_v56  ;;  %v1881_v25 = vsel %vm595_vm10, %v1875_v51, %v1877_v22  ;;  %v2178_v22 = vld [vmem:[#allocation7] sm:$0xff] }
 0x393   : > { %2349 = vmatpush2.msra.mxu0 %v1878_v42  ;;  %2419 = vmatprep.subr.mxu1 %v1881_v25 }
 0x394   : > { %2420 = vmatpush2.msra.mxu1 %v1880_v27  ;;  %v6276_v27 = vld [vmem:[#allocation9 + $0x5] ss:$8 sm:$0xf] }
 0x395   : > { %v1801_v1 = vpop.permute.xlu1 %1800  ;;  %v1799_v30 = vpop.permute.xlu0 %1798 }
 0x396   : > { %v1807_v15 = vsel %vm521_vm15, %v1799_v30, %v1801_v1 }
 0x397   : > { %2350 = vmatprep.subr.mxu0 %v1807_v15 }
 0x399   : > { %v1805_v16 = vpop.permute.xlu1 %1804  ;;  %v1803_v45 = vpop.permute.xlu0 %1802 }
 0x39a   : > { %v1809_v7 = vsel %vm521_vm15, %v1803_v45, %v1805_v16  ;;  %v1808_v31 = vsel %vm521_vm15, %v1801_v1, %v1803_v45  ;;  %v2801_v1 = vrot.slane %v6276_v27, %v5192_v5 }
 0x39b   : > { %2421 = vmatprep.subr.mxu1 %v1809_v7 }
 0x39c   : > { %2422 = vmatpush2.msra.mxu1 %v1808_v31  ;;  %2812 = vrot.lane.b32.xlu1 %v2801_v1, %s4995_s9 }
 0x39d   : > { %v1727_v29 = vpop.permute.xlu1 %1726  ;;  %v1797_v46 = vpop.permute.xlu0 %1796 }
 0x39e   : > { %v1806_v52 = vsel %vm521_vm15, %v1797_v46, %v1799_v30  ;;  %v2797_v30 = vrot.slane %v6276_v27, %v5194_v6 }
 0x39f   : > { %2351 = vmatpush2.msra.mxu0 %v1806_v52 }
 0x3a0   : > { %2810 = vrot.lane.b32.xlu0 %v2797_v30, %s4995_s9 }
 0x3a1   : > { %v1731_v48 = vpop.permute.xlu1 %1730  ;;  %v1729_v35 = vpop.permute.xlu0 %1728 }
 0x3a2   : > { %v1735_v57 = vsel %vm7529_vm14, %v1727_v29, %v1729_v35  ;;  %v1736_v11 = vsel %vm7529_vm14, %v1729_v35, %v1731_v48 }
 0x3a3   : > { %2352 = vmatprep.subr.mxu0 %v1735_v57 }
 0x3a5   : > { %v1725_v10 = vpop.permute.xlu1 %1724  ;;  %v1733_v41 = vpop.permute.xlu0 %1732 }
 0x3a6   : > { %v1734_v43 = vsel %vm7529_vm14, %v1725_v10, %v1727_v29  ;;  %v1737_v62 = vsel %vm7529_vm14, %v1731_v48, %v1733_v41  ;;  %vm1554_vm14 = vcmask 375808   ;;  %v3502_v41 = vld [vmem:[#allocation9 + $0x27] ss:$8 sm:$0xf] }
 0x3a7   : > { %2353 = vmatpush2.msra.mxu0 %v1734_v43  ;;  %2423 = vmatprep.subr.mxu1 %v1737_v62  ;;  %v2805_v62 = vrot.slane %v6276_v27, %v5204_v13  ;;  %v3511_v21 = vrot.slane %v3502_v41, %v5192_v5 }
 0x3a8   : > { %2424 = vmatpush2.msra.mxu1 %v1736_v11  ;;  %v3507_v11 = vrot.slane %v3502_v41, %v5194_v6 }
 0x3a9   : > { %v1657_v39 = vpop.permute.xlu1 %1656  ;;  %v1655_v60 = vpop.permute.xlu0 %1654 }
 0x3aa   : > { %v1663_v36 = vsel %vm7530_vm13, %v1655_v60, %v1657_v39 }
 0x3ab   : > { %2354 = vmatprep.subr.mxu0 %v1663_v36  ;;  %v3519_v36 = vrot.slane %v3502_v41, %v5202_v12 }
 0x3ad   : > { %v1661_v38 = vpop.permute.xlu1 %1660  ;;  %v1659_v33 = vpop.permute.xlu0 %1658 }
 0x3ae   : > { %v1665_v32 = vsel %vm7530_vm13, %v1659_v33, %v1661_v38  ;;  %v1664_v24 = vsel %vm7530_vm13, %v1657_v39, %v1659_v33  ;;  %v3515_v39 = vrot.slane %v3502_v41, %v5204_v13  ;;  %v3360_v38 = vld [vmem:[#allocation9 + $0x25] ss:$8 sm:$0xf] }
 0x3af   : > { %2425 = vmatprep.subr.mxu1 %v1665_v32  ;;  %v3365_v28 = vrot.slane %v3360_v38, %v5194_v6  ;;  %v3369_v32 = vrot.slane %v3360_v38, %v5192_v5 }
 0x3b0   : > { %2426 = vmatpush2.msra.mxu1 %v1664_v24  ;;  %v3373_v24 = vrot.slane %v3360_v38, %v5204_v13 }
 0x3b1   : > { %v1547_v54 = vpop.permute.xlu1 %1546  ;;  %2427 = vmatprep.subr.mxu1 %v1597_v3  ;;  %v1653_v61 = vpop.permute.xlu0 %1652  ;;  %v3377_v3 = vrot.slane %v3360_v38, %v5202_v12 }
 0x3b2   : > { %2428 = vmatpush2.msra.mxu1 %v1596_v23  ;;  %v1662_v55 = vsel %vm7530_vm13, %v1653_v61, %v1655_v60  ;;  %vm1480_vm13 = vcmask 384000   ;;  %v3431_v60 = vld [vmem:[#allocation9 + $0x26] ss:$8 sm:$0xf]  ;;  %v3302_v23 = vrot.slane %v3289_v50, %v5204_v13  ;;  %v3223_v61 = vrot.slane %v3218_v20, %v5194_v6 }
 0x3b3   : > { %2355 = vmatpush2.msra.mxu0 %v1662_v55  ;;  %v3436_v8 = vrot.slane %v3431_v60, %v5194_v6  ;;  %v3440_v17 = vrot.slane %v3431_v60, %v5192_v5  ;;  %v3444_v0 = vrot.slane %v3431_v60, %v5204_v13  ;;  %v3448_v33 = vrot.slane %v3431_v60, %v5202_v12 }
 0x3b4   : > { %2356 = vmatprep.subr.mxu0 %v1595_v47  ;;  %v3227_v55 = vrot.slane %v3218_v20, %v5192_v5  ;;  %v3231_v47 = vrot.slane %v3218_v20, %v5204_v13 }
 0x3b5   : > { %v1551_v19 = vpop.permute.xlu1 %1550  ;;  %v1549_v4 = vpop.permute.xlu0 %1548  ;;  %2357 = vmatpush2.msra.mxu0 %v1594_v49  ;;  %v3147_v49 = vld [vmem:[#allocation9 + $0x22] ss:$8 sm:$0xf] }
 0x3b6   : > { %v1556_v37 = vsel %vm1554_vm14, %v1547_v54, %v1549_v4  ;;  %v1557_v53 = vsel %vm1554_vm14, %v1549_v4, %v1551_v19  ;;  %v3152_v4 = vrot.slane %v3147_v49, %v5194_v6 }
 0x3b7   : > { %2358 = vmatprep.subr.mxu0 %v1556_v37  ;;  %v3156_v37 = vrot.slane %v3147_v49, %v5192_v5 }
 0x3b9   : > { %v1545_v2 = vpop.permute.xlu1 %1544  ;;  %v1553_v26 = vpop.permute.xlu0 %1552 }
 0x3ba   : > { %v1555_v14 = vsel %vm1554_vm14, %v1545_v2, %v1547_v54  ;;  %v1558_v44 = vsel %vm1554_vm14, %v1551_v19, %v1553_v26  ;;  %v3306_v54 = vrot.slane %v3289_v50, %v5202_v12  ;;  %v3235_v19 = vrot.slane %v3218_v20, %v5202_v12  ;;  %v3076_v26 = vld [vmem:[#allocation9 + $0x21] ss:$8 sm:$0xf] }
 0x3bb   : > { %2359 = vmatpush2.msra.mxu0 %v1555_v14  ;;  %2429 = vmatprep.subr.mxu1 %v1558_v44  ;;  %v3160_v2 = vrot.slane %v3147_v49, %v5204_v13  ;;  %v3164_v14 = vrot.slane %v3147_v49, %v5202_v12  ;;  %v3081_v44 = vrot.slane %v3076_v26, %v5194_v6 }
 0x3bc   : > { %2430 = vmatpush2.msra.mxu1 %v1557_v53  ;;  %v3085_v53 = vrot.slane %v3076_v26, %v5192_v5 }
 0x3bd   : > { %v1475_v56 = vpop.permute.xlu1 %1474  ;;  %v1473_v40 = vpop.permute.xlu0 %1472 }
 0x3be   : > { %v1482_v18 = vsel %vm1480_vm13, %v1473_v40, %v1475_v56 }
 0x3bf   : > { %2360 = vmatprep.subr.mxu0 %v1482_v18  ;;  %v3093_v18 = vrot.slane %v3076_v26, %v5202_v12 }
 0x3c1   : > { %v1479_v51 = vpop.permute.xlu1 %1478  ;;  %v1477_v59 = vpop.permute.xlu0 %1476 }
 0x3c2   : > { %v1484_v34 = vsel %vm1480_vm13, %v1477_v59, %v1479_v51  ;;  %v1483_v58 = vsel %vm1480_vm13, %v1475_v56, %v1477_v59  ;;  %v3089_v56 = vrot.slane %v3076_v26, %v5204_v13 }
 0x3c3   : > { %2431 = vmatprep.subr.mxu1 %v1484_v34 }
 0x3c4   : > { %2432 = vmatpush2.msra.mxu1 %v1483_v58 }
 0x3c5   : > { %v1471_v42 = vpop.permute.xlu0 %1470  ;;  %2434 = vmatmul.mubr.f32.vlgmr.msra.gmra.mxu1 %v2178_v22 }
 0x3c6   : > { %v1481_v25 = vsel %vm1480_vm13, %v1471_v42, %v1473_v40  ;;  %v3005_v40 = vld [vmem:[#allocation9 + $0x20] ss:$8 sm:$0xf] }
 0x3c7   : > { %2361 = vmatpush2.msra.mxu0 %v1481_v25  ;;  %v3010_v59 = vrot.slane %v3005_v40, %v5194_v6  ;;  %v3014_v34 = vrot.slane %v3005_v40, %v5192_v5  ;;  %v3018_v58 = vrot.slane %v3005_v40, %v5204_v13  ;;  %v2934_v25 = vld [vmem:[#allocation9 + $0x7] ss:$8 sm:$0xf]  ;;  %v3022_v1 = vrot.slane %v3005_v40, %v5202_v12 }
 0x3c8   : > { %2363 = vmatmul.mubr.f32.vlgmr.msra.gmra.mxu0 %v2178_v22  ;;  %v2939_v30 = vrot.slane %v2934_v25, %v5194_v6 }
 0x3c9   : > { %v6345_v51 = vpop.permute.xlu0 %2526 }
 0x3cd   : > { %v6355_v42 = vpop.permute.xlu0 %2530 }
 0x3cf   : > { %v2292_v16 = vpop.permute.xlu1 %2291 }
 0x3d3   : > { %v6353_v22 = vpop.permute.xlu1 %2528 }
 0x485   : > { %v2435_v15 = vpop.f32.mrf.mxu1 }
 0x486   : > { %v2436_v48 = vadd.f32 %v2435_v15, %v2292_v16  ;;  %v2943_v15 = vrot.slane %v2934_v25, %v5192_v5 }
 0x487   : > { %v2437_v31 = vpop.f32.mrf.mxu1 }
 0x488   : > { %v2364_v45 = vpop.f32.mrf.mxu0  ;;  %v2438_v35 = vadd.f32 %v2437_v31, %v2292_v16  ;;  %v2442_v10 = vmax.f32 %v2436_v48, 0.0  ;;  %v2863_v31 = vld [vmem:[#allocation9 + $0x6] ss:$8 sm:$0xf] }
 0x489   : > { %v2365_v7 = vadd.f32 %v2364_v45, %v2292_v16  ;;  %v6365_v45 = vpop.permute.xlu0 %2599  ;;  %v2880_v41 = vrot.slane %v2863_v31, %v5202_v12 }
 0x48a   : > { %v2366_v29 = vpop.f32.mrf.mxu0  ;;  %v2443_v43 = vmax.f32 %v2438_v35, 0.0  ;;  %v2872_v35 = vrot.slane %v2863_v31, %v5192_v5 }
 0x48b   : > { %v2440_v46 = vmax.f32 %v2365_v7, 0.0  ;;  %v2367_v52 = vadd.f32 %v2366_v29, %v2292_v16  ;;  %v6363_v16 = vpop.permute.xlu1 %2532  ;;  %v2947_v7 = vrot.slane %v2934_v25, %v5204_v13  ;;  %v2951_v29 = vrot.slane %v2934_v25, %v5202_v12 }
 0x48d   : > { %v2441_v57 = vmax.f32 %v2367_v52, 0.0  ;;  %2448 = vrot.lane.b32.xlu0 %v2440_v46, %s4990_s21  ;;  %v2868_v52 = vrot.slane %v2863_v31, %v5194_v6  ;;  %v6375_v48 = vpop.permute.xlu0 %2603 }
 0x48f   : > { %2450 = vrot.lane.b32.xlu1 %v2441_v57, %s4990_s21  ;;  %v6372_v46 = vpop.permute.xlu1 %2597  ;;  %v2876_v57 = vrot.slane %v2863_v31, %v5204_v13 }
 0x491   : > { %2452 = vrot.lane.b32.xlu0 %v2442_v10, %s4990_s21 }
 0x493   : > { %2454 = vrot.lane.b32.xlu1 %v2443_v43, %s4990_s21  ;;  %v6382_v10 = vpop.permute.xlu1 %2601  ;;  %v6385_v43 = vpop.permute.xlu0 %2668 }
 0x495   : > { %2814 = vrot.lane.b32.xlu0 %v2805_v62, %s4995_s9  ;;  %v6387_v62 = vld [vmem:[#allocation9 + $0x62] ss:$8 sm:$0xf] }
 0x496   : > { %v4255_v60 = vrot.slane %v6387_v62, %v5192_v5 }
 0x497   : > { %3520 = vrot.lane.b32.xlu1 %v3507_v11, %s7603_s27  ;;  %v2809_v11 = vrot.slane %v6276_v27, %v5202_v12 }
 0x499   : > { %3522 = vrot.lane.b32.xlu0 %v3511_v21, %s7603_s27  ;;  %v4251_v21 = vrot.slane %v6387_v62, %v5194_v6 }
 0x49b   : > { %3524 = vrot.lane.b32.xlu1 %v3515_v39, %s7603_s27  ;;  %v6395_v39 = vpop.permute.xlu1 %2670 }
 0x49d   : > { %3526 = vrot.lane.b32.xlu0 %v3519_v36, %s7603_s27  ;;  %s7605_s27 = smov 72   ;;  %v6400_v36 = vpop.permute.xlu0 %2672 }
 0x49f   : > { %3449 = vrot.lane.b32.xlu1 %v3436_v8, %s7604_s26  ;;  %v6404_v8 = vpop.permute.xlu1 %2674 }
 0x4a1   : > { %3451 = vrot.lane.b32.xlu0 %v3440_v17, %s7604_s26  ;;  %v6406_v27 = vpop.permute.xlu0 %2741 }
 0x4a3   : > { %3453 = vrot.lane.b32.xlu1 %v3444_v0, %s7604_s26  ;;  %v6408_v17 = vpop.permute.xlu1 %2739 }
 0x4a5   : > { %3455 = vrot.lane.b32.xlu0 %v3448_v33, %s7604_s26  ;;  %s7609_s26 = smov 16   ;;  %v6410_v0 = vpop.permute.xlu0 %2745 }
 0x4a7   : > { %3378 = vrot.lane.b32.xlu1 %v3365_v28, %s4990_s21  ;;  %v6412_v38 = vpop.permute.xlu1 %2743 }
 0x4a9   : > { %3380 = vrot.lane.b32.xlu0 %v3369_v32, %s4990_s21  ;;  %v6414_v33 = vpop.permute.xlu0 %2810 }
 0x4ab   : > { %3382 = vrot.lane.b32.xlu1 %v3373_v24, %s4990_s21  ;;  %v6416_v28 = vpop.permute.xlu1 %2812 }
 0x4ad   : > { %3384 = vrot.lane.b32.xlu0 %v3377_v3, %s4990_s21  ;;  %s7606_s21 = smov 64  }
 0x4af   : > { %3307 = vrot.lane.b32.xlu1 %v3294_v63, %s7605_s27 }
 0x4b1   : > { %3309 = vrot.lane.b32.xlu0 %v3298_v9, %s7605_s27 }
 0x4b3   : > { %3311 = vrot.lane.b32.xlu1 %v3302_v23, %s7605_s27 }
 0x4b5   : > { %3313 = vrot.lane.b32.xlu0 %v3306_v54, %s7605_s27  ;;  %s7631_s27 = smov 56  }
 0x4b7   : > { %3236 = vrot.lane.b32.xlu1 %v3223_v61, %s5011_s29 }
 0x4b9   : > { %3238 = vrot.lane.b32.xlu0 %v3227_v55, %s5011_s29 }
 0x4bb   : > { %3240 = vrot.lane.b32.xlu1 %v3231_v47, %s5011_s29 }
 0x4bd   : > { %3242 = vrot.lane.b32.xlu0 %v3235_v19, %s5011_s29  ;;  %s7607_s29 = smov 18  }
 0x4bf   : > { %3165 = vrot.lane.b32.xlu1 %v3152_v4, %s5012_s30 }
 0x4c1   : > { %3167 = vrot.lane.b32.xlu0 %v3156_v37, %s5012_s30 }
 0x4c3   : > { %3169 = vrot.lane.b32.xlu1 %v3160_v2, %s5012_s30 }
 0x4c5   : > { %3171 = vrot.lane.b32.xlu0 %v3164_v14, %s5012_s30  ;;  %s7608_s30 = smov 17  }
 0x4c7   : > { %3094 = vrot.lane.b32.xlu1 %v3081_v44, %s7606_s21 }
 0x4c9   : > { %3096 = vrot.lane.b32.xlu0 %v3085_v53, %s7606_s21 }
 0x4cb   : > { %3098 = vrot.lane.b32.xlu1 %v3089_v56, %s7606_s21 }
 0x4cd   : > { %3100 = vrot.lane.b32.xlu0 %v3093_v18, %s7606_s21 }
 0x4cf   : > { %3023 = vrot.lane.b32.xlu1 %v3010_v59, %s7607_s29 }
 0x4d1   : > { %3025 = vrot.lane.b32.xlu0 %v3014_v34, %s7607_s29  ;;  %v2534_v34 = vsel %vm344_vm2, %v6345_v51, %v6353_v22 }
 0x4d3   : > { %3027 = vrot.lane.b32.xlu1 %v3018_v58, %s7607_s29  ;;  %v2535_v58 = vsel %vm344_vm2, %v6353_v22, %v6355_v42  ;;  %v2605_v22 = vsel %vm418_vm3, %v6372_v46, %v6365_v45 }
 0x4d5   : > { %3029 = vrot.lane.b32.xlu0 %v3022_v1, %s7607_s29 }
 0x4d7   : > { %2952 = vrot.lane.b32.xlu1 %v2939_v30, %s7608_s30 }
 0x4d9   : > { %2954 = vrot.lane.b32.xlu0 %v2943_v15, %s7608_s30 }
 0x4db   : > { %2956 = vrot.lane.b32.xlu1 %v2947_v7, %s7608_s30 }
 0x4dd   : > { %2958 = vrot.lane.b32.xlu0 %v2951_v29, %s7608_s30 }
 0x4df   : > { %2881 = vrot.lane.b32.xlu1 %v2868_v52, %s7609_s26 }
 0x4e1   : > { %2883 = vrot.lane.b32.xlu0 %v2872_v35, %s7609_s26 }
 0x4e3   : > { %2885 = vrot.lane.b32.xlu1 %v2876_v57, %s7609_s26 }
 0x4e5   : > { %2887 = vrot.lane.b32.xlu0 %v2880_v41, %s7609_s26 }
 0x4e7   : > { %2816 = vrot.lane.b32.xlu1 %v2809_v11, %s4995_s9 }
 0x4e9   : > { %4264 = vrot.lane.b32.xlu0 %v4251_v21, %s7607_s29 }
 0x4eb   : > { %4266 = vrot.lane.b32.xlu1 %v4255_v60, %s7607_s29 }
 0x4ff   : > { %v2449_v32 = vpop.permute.xlu0 %2448 }
 0x500   : > { %2464 = vst.msk [vmem:[#allocation2] sm:$0xff] %vm245_vm1, %v2449_v32  ;;  %vm7627_vm1 = vcmask 588800  }
 0x501   : > { %v2451_v24 = vpop.permute.xlu1 %2450 }
 0x502   : > { %v6420_v50 = vsel %vm243_vm0, %v2449_v32, %v2451_v24 }
 0x503   : > { %2465 = vst [vmem:[#allocation2 + $0x8] sm:$0xff] %v6420_v50  ;;  %v2453_v3 = vpop.permute.xlu0 %2452  ;;  %v2543_v1 = vmul.f32 %v2534_v34, %v6420_v50  ;;  %v2614_v29 = vmul.f32 %v2605_v22, %v6420_v50  ;;  %v4104_v34 = vld [vmem:[#allocation9 + $0x60] ss:$8 sm:$0xf] }
 0x504   : > { %v6424_v63 = vsel %vm243_vm0, %v2451_v24, %v2453_v3  ;;  %v4121_v22 = vrot.slane %v4104_v34, %v5202_v12 }
 0x505   : > { %2466 = vst [vmem:[#allocation2 + $0x10] sm:$0xff] %v6424_v63  ;;  %v2455_v9 = vpop.permute.xlu1 %2454  ;;  %v2544_v30 = vmul.f32 %v2535_v58, %v6424_v63  ;;  %v4113_v58 = vrot.slane %v4104_v34, %v5192_v5 }
 0x506   : > { %v6428_v23 = vsel %vm243_vm0, %v2453_v3, %v2455_v9  ;;  %2468 = vst.msk [vmem:[#allocation2 + $0x20] sm:$0xff] %vm243_vm0, %v2455_v9 }
 0x507   : > { %2467 = vst [vmem:[#allocation2 + $0x18] sm:$0xff] %v6428_v23  ;;  %v6432_v20 = vpop.permute.xlu0 %2814  ;;  %v6434_v54 = vld [vmem:[#allocation2] sm:$0xff] }
 0x508   : > { %v2613_v61 = vmul.f32 %v6434_v54, %v6372_v46  ;;  %v2542_v55 = vmul.f32 %v6434_v54, %v6345_v51  ;;  %v2755_v19 = vmul.f32 %v6434_v54, %v6408_v17  ;;  %v2684_v4 = vmul.f32 %v6434_v54, %v6385_v43 }
 0x509   : > { %v6440_v47 = vpop.permute.xlu1 %3520  ;;  %v2536_v51 = vsel %vm344_vm2, %v6355_v42, %v6363_v16  ;;  %v2606_v42 = vsel %vm418_vm3, %v6365_v45, %v6382_v10  ;;  %v2676_v45 = vsel %vm492_vm4, %v6385_v43, %v6395_v39  ;;  %v2678_v43 = vsel %vm492_vm4, %v6400_v36, %v6404_v8 }
 0x50a   : > { %2623 = vrot.lane.b32.xlu1 %v2613_v61, %s7581_s23  ;;  %2552 = vrot.lane.b32.xlu0 %v2542_v55, %s7582_s28  ;;  %v2545_v31 = vmul.f32 %v2536_v51, %v6428_v23  ;;  %v2615_v35 = vmul.f32 %v2606_v42, %v6424_v63  ;;  %v2685_v11 = vmul.f32 %v2676_v45, %v6420_v50 }
 0x50b   : > { %v6444_v49 = vpop.permute.xlu0 %3522  ;;  %v2687_v32 = vmul.f32 %v2678_v43, %v6428_v23  ;;  %v4263_v55 = vrot.slane %v6387_v62, %v5202_v12 }
 0x50d   : > { %v6450_v37 = vpop.permute.xlu1 %3524  ;;  %v6452_v2 = vld [vmem:[#allocation2 + $0x20] sm:$0xff] }
 0x50e   : > { %2765 = vrot.lane.b32.xlu1 %v2755_v19, %s7579_s10  ;;  %2694 = vrot.lane.b32.xlu0 %v2684_v4, %s7580_s11  ;;  %v2617_v14 = vmul.f32 %v6452_v2, %v6375_v48  ;;  %v2546_v44 = vmul.f32 %v6452_v2, %v6363_v16  ;;  %v2759_v40 = vmul.f32 %v6452_v2, %v6410_v0  ;;  %v4175_v4 = vld [vmem:[#allocation9 + $0x61] ss:$8 sm:$0xf] }
 0x50f   : > { %v6456_v26 = vpop.permute.xlu0 %3526  ;;  %v2688_v18 = vmul.f32 %v6452_v2, %v6404_v8  ;;  %v2607_v16 = vsel %vm418_vm3, %v6382_v10, %v6375_v48  ;;  %v2677_v48 = vsel %vm492_vm4, %v6395_v39, %v6400_v36  ;;  %v2747_v39 = vsel %vm566_vm5, %v6408_v17, %v6406_v27 }
 0x510   : > { %v2616_v57 = vmul.f32 %v2607_v16, %v6428_v23  ;;  %v2686_v21 = vmul.f32 %v2677_v48, %v6424_v63  ;;  %v2756_v24 = vmul.f32 %v2747_v39, %v6420_v50  ;;  %v2748_v36 = vsel %vm566_vm5, %v6406_v27, %v6412_v38 }
 0x511   : > { %v6462_v53 = vpop.permute.xlu1 %3449  ;;  %v2749_v8 = vsel %vm566_vm5, %v6412_v38, %v6410_v0  ;;  %v2757_v17 = vmul.f32 %v2748_v36, %v6424_v63  ;;  %v4259_v19 = vrot.slane %v6387_v62, %v5204_v13  ;;  %v4184_v0 = vrot.slane %v4175_v4, %v5192_v5 }
 0x512   : > { %2631 = vrot.lane.b32.xlu1 %v2617_v14, %s7581_s23  ;;  %2560 = vrot.lane.b32.xlu0 %v2546_v44, %s7582_s28  ;;  %v2758_v61 = vmul.f32 %v2749_v8, %v6428_v23  ;;  %v4180_v38 = vrot.slane %v4175_v4, %v5194_v6  ;;  %v4192_v62 = vrot.slane %v4175_v4, %v5202_v12 }
 0x513   : > { %v6466_v56 = vpop.permute.xlu0 %3451 }
 0x515   : > { %v6472_v59 = vpop.permute.xlu1 %3453 }
 0x516   : > { %2773 = vrot.lane.b32.xlu1 %v2759_v40, %s7579_s10  ;;  %2702 = vrot.lane.b32.xlu0 %v2688_v18, %s7580_s11  ;;  %v4188_v18 = vrot.slane %v4175_v4, %v5204_v13 }
 0x517   : > { %v6482_v25 = vpop.permute.xlu0 %3455 }
 0x519   : > { %v6486_v15 = vpop.permute.xlu1 %3378 }
 0x51a   : > { %2554 = vrot.lane.b32.xlu1 %v2543_v1, %s7582_s28  ;;  %2556 = vrot.lane.b32.xlu0 %v2544_v30, %s7582_s28  ;;  %v4109_v1 = vrot.slane %v4104_v34, %v5194_v6 }
 0x51b   : > { %v6496_v7 = vpop.permute.xlu0 %3380 }
 0x51d   : > { %v6500_v52 = vpop.permute.xlu1 %3382 }
 0x51e   : > { %2558 = vrot.lane.b32.xlu1 %v2545_v31, %s7582_s28  ;;  %2625 = vrot.lane.b32.xlu0 %v2614_v29, %s7581_s23  ;;  %v4117_v31 = vrot.slane %v4104_v34, %v5204_v13  ;;  %v4033_v29 = vld [vmem:[#allocation9 + $0x47] ss:$8 sm:$0xf] }
 0x51f   : > { %v6510_v46 = vpop.permute.xlu0 %3384  ;;  %v4050_v45 = vrot.slane %v4033_v29, %v5202_v12  ;;  %v4046_v48 = vrot.slane %v4033_v29, %v5204_v13 }
 0x521   : > { %v6514_v41 = vpop.permute.xlu1 %3307 }
 0x522   : > { %2627 = vrot.lane.b32.xlu1 %v2615_v35, %s7581_s23  ;;  %2629 = vrot.lane.b32.xlu0 %v2616_v57, %s7581_s23  ;;  %v4042_v35 = vrot.slane %v4033_v29, %v5192_v5  ;;  %v4038_v57 = vrot.slane %v4033_v29, %v5194_v6 }
 0x523   : > { %v6524_v10 = vpop.permute.xlu0 %3309 }
 0x525   : > { %v6528_v60 = vpop.permute.xlu1 %3311 }
 0x526   : > { %2696 = vrot.lane.b32.xlu1 %v2685_v11, %s7580_s11  ;;  %2698 = vrot.lane.b32.xlu0 %v2686_v21, %s7580_s11  ;;  %v3962_v11 = vld [vmem:[#allocation9 + $0x46] ss:$8 sm:$0xf] }
 0x527   : > { %v6540_v3 = vpop.permute.xlu0 %3313  ;;  %v3971_v39 = vrot.slane %v3962_v11, %v5192_v5  ;;  %v3979_v8 = vrot.slane %v3962_v11, %v5202_v12 }
 0x529   : > { %v6542_v9 = vpop.permute.xlu1 %3236 }
 0x52a   : > { %2700 = vrot.lane.b32.xlu1 %v2687_v32, %s7580_s11  ;;  %2767 = vrot.lane.b32.xlu0 %v2756_v24, %s7579_s10  ;;  %v3967_v32 = vrot.slane %v3962_v11, %v5194_v6 }
 0x52b   : > { %v6560_v27 = vpop.permute.xlu0 %3238 }
 0x52d   : > { %v6562_v14 = vpop.permute.xlu1 %3240 }
 0x52e   : > { %2769 = vrot.lane.b32.xlu1 %v2757_v17, %s7579_s10  ;;  %2771 = vrot.lane.b32.xlu0 %v2758_v61, %s7579_s10  ;;  %v3975_v17 = vrot.slane %v3962_v11, %v5204_v13  ;;  %v3891_v61 = vld [vmem:[#allocation9 + $0x45] ss:$8 sm:$0xf] }
 0x52f   : > { %v6568_v44 = vpop.permute.xlu0 %3242 }
 0x531   : > { %v6570_v40 = vpop.permute.xlu1 %3165 }
 0x532   : > { %4270 = vrot.lane.b32.xlu1 %v4263_v55, %s7607_s29  ;;  %4268 = vrot.lane.b32.xlu0 %v4259_v19, %s7607_s29  ;;  %v3900_v55 = vrot.slane %v3891_v61, %v5192_v5  ;;  %v3896_v19 = vrot.slane %v3891_v61, %v5194_v6  ;;  %s7635_s29 = smov 62  }
 0x533   : > { %v6580_v30 = vpop.permute.xlu0 %3167 }
 0x535   : > { %v6582_v51 = vpop.permute.xlu1 %3169 }
 0x536   : > { %4195 = vrot.lane.b32.xlu1 %v4184_v0, %s7608_s30  ;;  %4193 = vrot.lane.b32.xlu0 %v4180_v38, %s7608_s30  ;;  %v3908_v38 = vrot.slane %v3891_v61, %v5202_v12 }
 0x537   : > { %v6588_v42 = vpop.permute.xlu0 %3171 }
 0x539   : > { %v6590_v16 = vpop.permute.xlu1 %3094 }
 0x53a   : > { %4199 = vrot.lane.b32.xlu1 %v4192_v62, %s7608_s30  ;;  %4197 = vrot.lane.b32.xlu0 %v4188_v18, %s7608_s30  ;;  %v3904_v62 = vrot.slane %v3891_v61, %v5204_v13  ;;  %v3820_v18 = vld [vmem:[#allocation9 + $0x44] ss:$8 sm:$0xf]  ;;  %v3644_v61 = vld [vmem:[#allocation9 + $0x41] ss:$8 sm:$0xf] }
 0x53b   : > { %v6600_v21 = vpop.permute.xlu0 %3096  ;;  %v3833_v29 = vrot.slane %v3820_v18, %v5204_v13  ;;  %s7639_s30 = smov 63  }
 0x53d   : > { %v6602_v43 = vpop.permute.xlu1 %3098 }
 0x53e   : > { %4124 = vrot.lane.b32.xlu1 %v4113_v58, %s7609_s26  ;;  %4122 = vrot.lane.b32.xlu0 %v4109_v1, %s7609_s26  ;;  %v3829_v1 = vrot.slane %v3820_v18, %v5192_v5 }
 0x53f   : > { %v6608_v24 = vpop.permute.xlu0 %3100 }
 0x541   : > { %v6610_v36 = vpop.permute.xlu1 %3023 }
 0x542   : > { %4128 = vrot.lane.b32.xlu1 %v4121_v22, %s7609_s26  ;;  %4126 = vrot.lane.b32.xlu0 %v4117_v31, %s7609_s26  ;;  %v3825_v22 = vrot.slane %v3820_v18, %v5194_v6  ;;  %v3837_v31 = vrot.slane %v3820_v18, %v5202_v12  ;;  %v3661_v18 = vrot.slane %v3644_v61, %v5202_v12  ;;  %s7646_s26 = smov 110  }
 0x543   : > { %v6620_v4 = vpop.permute.xlu0 %3025 }
 0x545   : > { %v6622_v0 = vpop.permute.xlu1 %3027 }
 0x546   : > { %4053 = vrot.lane.b32.xlu1 %v4042_v35, %s4995_s9  ;;  %4051 = vrot.lane.b32.xlu0 %v4038_v57, %s4995_s9  ;;  %v3749_v35 = vld [vmem:[#allocation9 + $0x43] ss:$8 sm:$0xf] }
 0x547   : > { %v6628_v34 = vpop.permute.xlu0 %3029  ;;  %v3754_v11 = vrot.slane %v3749_v35, %v5194_v6 }
 0x549   : > { %v6630_v58 = vpop.permute.xlu1 %2952 }
 0x54a   : > { %4057 = vrot.lane.b32.xlu1 %v4050_v45, %s4995_s9  ;;  %4055 = vrot.lane.b32.xlu0 %v4046_v48, %s4995_s9  ;;  %v3758_v48 = vrot.slane %v3749_v35, %v5192_v5  ;;  %s7619_s9 = smov 54  }
 0x54b   : > { %v6640_v57 = vpop.permute.xlu0 %2954 }
 0x54d   : > { %v6642_v45 = vpop.permute.xlu1 %2956 }
 0x54e   : > { %3982 = vrot.lane.b32.xlu1 %v3971_v39, %s4994_s8  ;;  %3980 = vrot.lane.b32.xlu0 %v3967_v32, %s4994_s8 }
 0x54f   : > { %v6648_v39 = vpop.permute.xlu0 %2958 }
 0x551   : > { %v6650_v32 = vpop.permute.xlu1 %2881 }
 0x552   : > { %3986 = vrot.lane.b32.xlu1 %v3979_v8, %s4994_s8  ;;  %3984 = vrot.lane.b32.xlu0 %v3975_v17, %s4994_s8  ;;  %v3766_v8 = vrot.slane %v3749_v35, %v5202_v12  ;;  %v3762_v17 = vrot.slane %v3749_v35, %v5204_v13  ;;  %s7614_s8 = smov 48  }
 0x556   : > { %3911 = vrot.lane.b32.xlu1 %v3900_v55, %s4993_s7  ;;  %3909 = vrot.lane.b32.xlu0 %v3896_v19, %s4993_s7  ;;  %v3653_v55 = vrot.slane %v3644_v61, %v5192_v5  ;;  %v3649_v19 = vrot.slane %v3644_v61, %v5194_v6 }
 0x55a   : > { %3915 = vrot.lane.b32.xlu1 %v3908_v38, %s4993_s7  ;;  %3913 = vrot.lane.b32.xlu0 %v3904_v62, %s4993_s7  ;;  %v6660_v38 = vpop.permute.xlu0 %2883  ;;  %v6662_v62 = vpop.permute.xlu1 %2885  ;;  %s7611_s7 = smov 81  }
 0x55e   : > { %3840 = vrot.lane.b32.xlu1 %v3829_v1, %s4992_s5  ;;  %3838 = vrot.lane.b32.xlu0 %v3825_v22, %s4992_s5  ;;  %v3657_v1 = vrot.slane %v3644_v61, %v5204_v13  ;;  %v3573_v22 = vld [vmem:[#allocation9 + $0x40] ss:$8 sm:$0xf] }
 0x55f   : > { %v3582_v35 = vrot.slane %v3573_v22, %v5192_v5 }
 0x562   : > { %3844 = vrot.lane.b32.xlu1 %v3837_v31, %s4992_s5  ;;  %3842 = vrot.lane.b32.xlu0 %v3833_v29, %s4992_s5  ;;  %s7610_s5 = smov 82   ;;  %v6668_v31 = vpop.permute.xlu0 %2887  ;;  %v6670_v29 = vpop.permute.xlu1 %2816 }
 0x566   : > { %3769 = vrot.lane.b32.xlu1 %v3758_v48, %s7578_s14  ;;  %3767 = vrot.lane.b32.xlu0 %v3754_v11, %s7578_s14  ;;  %v3578_v48 = vrot.slane %v3573_v22, %v5194_v6  ;;  %v3590_v11 = vrot.slane %v3573_v22, %v5202_v12  ;;  %v6682_v61 = vpop.permute.xlu1 %4266 }
 0x56a   : > { %3773 = vrot.lane.b32.xlu1 %v3766_v8, %s7578_s14  ;;  %3771 = vrot.lane.b32.xlu0 %v3762_v17, %s7578_s14  ;;  %v3586_v8 = vrot.slane %v3573_v22, %v5204_v13  ;;  %v6680_v17 = vpop.permute.xlu0 %4264  ;;  %s7624_s14 = smov 55  }
 0x56e   : > { %3664 = vrot.lane.b32.xlu1 %v3653_v55, %s7610_s5  ;;  %3662 = vrot.lane.b32.xlu0 %v3649_v19, %s7610_s5  ;;  %v3528_v55 = vsel %vm1377_vm11, %v6440_v47, %v6444_v49  ;;  %v3529_v19 = vsel %vm1377_vm11, %v6444_v49, %v6450_v37 }
 0x572   : > { %3668 = vrot.lane.b32.xlu1 %v3661_v18, %s7610_s5  ;;  %3666 = vrot.lane.b32.xlu0 %v3657_v1, %s7610_s5  ;;  %v3537_v18 = vmul.f32 %v3528_v55, %v6420_v50  ;;  %v3538_v1 = vmul.f32 %v3529_v19, %v6424_v63  ;;  %v3457_v19 = vsel %vm1303_vm12, %v6462_v53, %v6466_v56  ;;  %s7654_s5 = smov 112  }
 0x576   : > { %3593 = vrot.lane.b32.xlu1 %v3582_v35, %s7611_s7  ;;  %3591 = vrot.lane.b32.xlu0 %v3578_v48, %s7611_s7  ;;  %v3530_v48 = vsel %vm1377_vm11, %v6450_v37, %v6456_v26  ;;  %v3536_v37 = vmul.f32 %v6440_v47, %v6434_v54 }
 0x577   : > { %v3539_v49 = vmul.f32 %v3530_v48, %v6428_v23  ;;  %v3458_v48 = vsel %vm1303_vm12, %v6466_v56, %v6472_v59  ;;  %v3465_v56 = vmul.f32 %v6434_v54, %v6462_v53 }
 0x578   : > { %v3467_v47 = vmul.f32 %v3458_v48, %v6424_v63  ;;  %v3387_v48 = vsel %vm243_vm0, %v6496_v7, %v6500_v52 }
 0x57a   : > { %3597 = vrot.lane.b32.xlu1 %v3590_v11, %s7611_s7  ;;  %3595 = vrot.lane.b32.xlu0 %v3586_v8, %s7611_s7  ;;  %v3540_v11 = vmul.f32 %v6456_v26, %v6452_v2  ;;  %s7658_s7 = smov 118  }
 0x57c   : > { %v6694_v22 = vpop.permute.xlu1 %2623  ;;  %v6696_v35 = vpop.permute.xlu0 %2552 }
 0x57d   : > { %7612 = vst [vmem:[#allocation22_spill] sm:$0xff] %v6694_v22  ;;  %7613 = vst [vmem:[#allocation25_spill] sm:$0xff] %v6696_v35  ;;  %v3459_v35 = vsel %vm1303_vm12, %v6472_v59, %v6482_v25  ;;  %v3469_v59 = vmul.f32 %v6452_v2, %v6482_v25  ;;  %v3396_v25 = vmul.f32 %v3387_v48, %v6424_v63  ;;  %vm7632_vm12 = vcmask 539648  }
 0x57e   : > { %3550 = vrot.lane.b32.xlu1 %v3538_v1, %s7614_s8  ;;  %3548 = vrot.lane.b32.xlu0 %v3537_v18, %s7614_s8  ;;  %v3466_v18 = vmul.f32 %v3457_v19, %v6420_v50  ;;  %v3315_v48 = vsel %vm7627_vm1, %v6514_v41, %v6524_v10 }
 0x580   : > { %v6706_v8 = vpop.permute.xlu1 %2765  ;;  %v6708_v55 = vpop.permute.xlu0 %2694 }
 0x581   : > { %7615 = vst [vmem:[#allocation35_spill] sm:$0xff] %v6706_v8  ;;  %7616 = vst [vmem:[#allocation34_spill] sm:$0xff] %v6708_v55 }
 0x582   : > { %3554 = vrot.lane.b32.xlu1 %v3540_v11, %s7614_s8  ;;  %3552 = vrot.lane.b32.xlu0 %v3539_v49, %s7614_s8  ;;  %v3468_v49 = vmul.f32 %v3459_v35, %v6428_v23  ;;  %v3386_v35 = vsel %vm243_vm0, %v6486_v15, %v6496_v7 }
 0x583   : > { %v3395_v53 = vmul.f32 %v3386_v35, %v6420_v50 }
 0x584   : > { %v6718_v1 = vpop.permute.xlu1 %2631  ;;  %v6720_v26 = vpop.permute.xlu0 %2560 }
 0x585   : > { %7617 = vst [vmem:[#allocation30_spill] sm:$0xff] %v6718_v1  ;;  %7618 = vst [vmem:[#allocation21_spill] sm:$0xff] %v6720_v26 }
 0x586   : > { %3477 = vrot.lane.b32.xlu1 %v3466_v18, %s7619_s9  ;;  %3546 = vrot.lane.b32.xlu0 %v3536_v37, %s7614_s8  ;;  %s4719_s8 = sshll.u32 %s5071_s19, 9 }
 0x588   : > { %v6732_v11 = vpop.permute.xlu1 %2773  ;;  %v6734_v19 = vpop.permute.xlu0 %2702 }
 0x58a   : > { %3481 = vrot.lane.b32.xlu1 %v3468_v49, %s7619_s9  ;;  %3479 = vrot.lane.b32.xlu0 %v3467_v47, %s7619_s9 }
 0x58c   : > { %v6742_v18 = vpop.permute.xlu1 %2554  ;;  %v6744_v37 = vpop.permute.xlu0 %2556 }
 0x58d   : > { %7620 = vst [vmem:[#allocation24_spill] sm:$0xff] %v6742_v18  ;;  %7621 = vst [vmem:[#allocation36_spill] sm:$0xff] %v6744_v37  ;;  %v3388_v18 = vsel %vm243_vm0, %v6500_v52, %v6510_v46  ;;  %v3394_v52 = vmul.f32 %v6434_v54, %v6486_v15 }
 0x58e   : > { %3475 = vrot.lane.b32.xlu1 %v3465_v56, %s7619_s9  ;;  %3483 = vrot.lane.b32.xlu0 %v3469_v59, %s7619_s9  ;;  %v3397_v7 = vmul.f32 %v3388_v18, %v6428_v23  ;;  %v3398_v56 = vmul.f32 %v6452_v2, %v6510_v46  ;;  %v3324_v18 = vmul.f32 %v3315_v48, %v6420_v50  ;;  %vm7629_vm0 = vmmov %vm7627_vm1 }
 0x58f   : > { %vm7630_vm11 = vmmov %vm7629_vm0 }
 0x590   : > { %v6756_v47 = vpop.permute.xlu1 %2558  ;;  %v6758_v49 = vpop.permute.xlu0 %2625  ;;  %v3317_v22 = vsel %vm7630_vm11, %v6528_v60, %v6540_v3  ;;  %vm7633_vm1 = vmmov %vm7632_vm12  ;;  %vm7636_vm11 = vcmask 531456  }
 0x591   : > { %7622 = vst [vmem:[#allocation28_spill] sm:$0xff] %v6756_v47  ;;  %7623 = vst [vmem:[#allocation31_spill] sm:$0xff] %v6758_v49 }
 0x592   : > { %3408 = vrot.lane.b32.xlu1 %v3396_v25, %s7624_s14  ;;  %3406 = vrot.lane.b32.xlu0 %v3395_v53, %s7624_s14  ;;  %v3316_v25 = vsel %vm7629_vm0, %v6524_v10, %v6528_v60  ;;  %v3323_v10 = vmul.f32 %v6434_v54, %v6514_v41  ;;  %v3327_v60 = vmul.f32 %v6452_v2, %v6540_v3  ;;  %vm7634_vm0 = vmmov %vm7633_vm1 }
 0x593   : > { %v3325_v15 = vmul.f32 %v3316_v25, %v6424_v63  ;;  %v3245_v25 = vsel %vm7633_vm1, %v6560_v27, %v6562_v14  ;;  %v3246_v37 = vsel %vm7634_vm0, %v6562_v14, %v6568_v44  ;;  %v3252_v14 = vmul.f32 %v6434_v54, %v6542_v9  ;;  %vm7638_vm1 = vmmov %vm7636_vm11 }
 0x594   : > { %v6768_v59 = vpop.permute.xlu1 %2627  ;;  %v6770_v35 = vpop.permute.xlu0 %2629  ;;  %v3254_v3 = vmul.f32 %v3245_v25, %v6424_v63  ;;  %v3173_v25 = vsel %vm7636_vm11, %v6570_v40, %v6580_v30  ;;  %v3175_v49 = vsel %vm7638_vm1, %v6582_v51, %v6588_v42  ;;  %vm7640_vm0 = vcmask 523264  }
 0x595   : > { %7625 = vst [vmem:[#allocation18_spill] sm:$0xff] %v6768_v59  ;;  %7626 = vst [vmem:[#allocation23_spill] sm:$0xff] %v6770_v35  ;;  %vm7643_vm1 = vcmask 146432   ;;  %v7025_v59 = vld [vmem:[#allocation2] sm:$0xff] }
 0x596   : > { %3412 = vrot.lane.b32.xlu1 %v3398_v56, %s7624_s14  ;;  %3410 = vrot.lane.b32.xlu0 %v3397_v7, %s7624_s14  ;;  %v3326_v7 = vmul.f32 %v3317_v22, %v6428_v23  ;;  %v3244_v22 = vsel %vm7632_vm12, %v6542_v9, %v6560_v27  ;;  %v3255_v27 = vmul.f32 %v3246_v37, %v6428_v23  ;;  %vm7637_vm12 = vmmov %vm7636_vm11 }
 0x597   : > { %v3253_v41 = vmul.f32 %v3244_v22, %v6420_v50  ;;  %v3182_v37 = vmul.f32 %v3173_v25, %v6420_v50  ;;  %vm7641_vm11 = vmmov %vm7640_vm0 }
 0x598   : > { %v6780_v53 = vpop.permute.xlu1 %2696  ;;  %v6782_v46 = vpop.permute.xlu0 %2698 }
 0x599   : > { %7628 = vst [vmem:[#allocation32_spill] sm:$0xff] %v6780_v53 }
 0x59a   : > { %3335 = vrot.lane.b32.xlu1 %v3324_v18, %s7631_s27  ;;  %3404 = vrot.lane.b32.xlu0 %v3394_v52, %s7624_s14 }
 0x59c   : > { %v6794_v56 = vpop.permute.xlu1 %2700  ;;  %v6796_v48 = vpop.permute.xlu0 %2767 }
 0x59e   : > { %3339 = vrot.lane.b32.xlu1 %v3326_v7, %s7631_s27  ;;  %3337 = vrot.lane.b32.xlu0 %v3325_v15, %s7631_s27 }
 0x5a0   : > { %v6804_v18 = vpop.permute.xlu1 %2769  ;;  %v6806_v52 = vpop.permute.xlu0 %2771 }
 0x5a2   : > { %3333 = vrot.lane.b32.xlu1 %v3323_v10, %s7631_s27  ;;  %3341 = vrot.lane.b32.xlu0 %v3327_v60, %s7631_s27  ;;  %v3256_v10 = vmul.f32 %v6452_v2, %v6568_v44 }
 0x5a4   : > { %v6818_v15 = vpop.permute.xlu1 %4270  ;;  %v6820_v7 = vpop.permute.xlu0 %4268 }
 0x5a6   : > { %3266 = vrot.lane.b32.xlu1 %v3254_v3, %s7635_s29  ;;  %3264 = vrot.lane.b32.xlu0 %v3253_v41, %s7635_s29  ;;  %v3174_v3 = vsel %vm7637_vm12, %v6580_v30, %v6582_v51  ;;  %v3181_v30 = vmul.f32 %v6434_v54, %v6570_v40  ;;  %v3185_v51 = vmul.f32 %v6452_v2, %v6588_v42  ;;  %vm7642_vm12 = vmmov %vm7640_vm0 }
 0x5a7   : > { %v3183_v9 = vmul.f32 %v3174_v3, %v6424_v63  ;;  %v3103_v3 = vsel %vm7641_vm11, %v6600_v21, %v6602_v43  ;;  %v3104_v5 = vsel %vm7642_vm12, %v6602_v43, %v6608_v24  ;;  %v3110_v43 = vmul.f32 %v6434_v54, %v6590_v16 }
 0x5a8   : > { %v6830_v60 = vpop.permute.xlu1 %4195  ;;  %v6832_v22 = vpop.permute.xlu0 %4193  ;;  %v3112_v42 = vmul.f32 %v3103_v3, %v6424_v63  ;;  %v3031_v3 = vsel %vm7643_vm1, %v6610_v36, %v6620_v4  ;;  %vm7647_vm12 = vcmask 138240  }
 0x5aa   : > { %3270 = vrot.lane.b32.xlu1 %v3256_v10, %s7635_s29  ;;  %3268 = vrot.lane.b32.xlu0 %v3255_v27, %s7635_s29  ;;  %v3184_v27 = vmul.f32 %v3175_v49, %v6428_v23  ;;  %v3102_v49 = vsel %vm7640_vm0, %v6590_v16, %v6600_v21  ;;  %v3113_v21 = vmul.f32 %v3104_v5, %v6428_v23  ;;  %vm7644_vm0 = vmmov %vm7643_vm1 }
 0x5ab   : > { %v3111_v40 = vmul.f32 %v3102_v49, %v6420_v50  ;;  %v3040_v5 = vmul.f32 %v3031_v3, %v6420_v50  ;;  %vm7645_vm11 = vmmov %vm7644_vm0 }
 0x5ac   : > { %v6842_v41 = vpop.permute.xlu1 %4199  ;;  %v6844_v44 = vpop.permute.xlu0 %4197  ;;  %v3033_v47 = vsel %vm7645_vm11, %v6622_v0, %v6628_v34  ;;  %vm7648_vm1 = vmmov %vm7647_vm12  ;;  %vm7651_vm11 = vcmask 130048  }
 0x5ae   : > { %3193 = vrot.lane.b32.xlu1 %v3182_v37, %s7639_s30  ;;  %3262 = vrot.lane.b32.xlu0 %v3252_v14, %s7635_s29  ;;  %s4604_s29 = scalar_lea.hbm %s7445_s4, %s4719_s8 }
 0x5b0   : > { %v6856_v10 = vpop.permute.xlu1 %4124  ;;  %v6858_v25 = vpop.permute.xlu0 %4122 }
 0x5b2   : > { %3197 = vrot.lane.b32.xlu1 %v3184_v27, %s7639_s30  ;;  %3195 = vrot.lane.b32.xlu0 %v3183_v9, %s7639_s30 }
 0x5b4   : > { %v6866_v37 = vpop.permute.xlu1 %4128  ;;  %v6868_v14 = vpop.permute.xlu0 %4126 }
 0x5b6   : > { %3191 = vrot.lane.b32.xlu1 %v3181_v30, %s7639_s30  ;;  %3199 = vrot.lane.b32.xlu0 %v3185_v51, %s7639_s30  ;;  %v3114_v30 = vmul.f32 %v6452_v2, %v6608_v24 }
 0x5b8   : > { %v6880_v9 = vpop.permute.xlu1 %4053  ;;  %v6882_v27 = vpop.permute.xlu0 %4051 }
 0x5ba   : > { %3124 = vrot.lane.b32.xlu1 %v3112_v42, %s7606_s21  ;;  %3122 = vrot.lane.b32.xlu0 %v3111_v40, %s7606_s21  ;;  %v3032_v42 = vsel %vm7644_vm0, %v6620_v4, %v6622_v0  ;;  %v3039_v4 = vmul.f32 %v6434_v54, %v6610_v36  ;;  %v3043_v0 = vmul.f32 %v6452_v2, %v6628_v34  ;;  %vm7649_vm0 = vmmov %vm7648_vm1 }
 0x5bb   : > { %v3041_v16 = vmul.f32 %v3032_v42, %v6424_v63  ;;  %v2961_v42 = vsel %vm7648_vm1, %v6640_v57, %v6642_v45  ;;  %v2962_v26 = vsel %vm7649_vm0, %v6642_v45, %v6648_v39  ;;  %v2968_v45 = vmul.f32 %v6434_v54, %v6630_v58  ;;  %vm7653_vm1 = vmmov %vm7651_vm11 }
 0x5bc   : > { %v6892_v51 = vpop.permute.xlu1 %4057  ;;  %v6894_v49 = vpop.permute.xlu0 %4055  ;;  %v2970_v34 = vmul.f32 %v2961_v42, %v6424_v63  ;;  %v2889_v42 = vsel %vm7651_vm11, %v6650_v32, %v6660_v38  ;;  %v2891_v55 = vsel %vm7653_vm1, %v6662_v62, %v6668_v31  ;;  %vm7655_vm0 = vcmask 80896  }
 0x5bd   : > { %vm7659_vm1 = vcmask 146432  }
 0x5be   : > { %3128 = vrot.lane.b32.xlu1 %v3114_v30, %s7606_s21  ;;  %3126 = vrot.lane.b32.xlu0 %v3113_v21, %s7606_s21  ;;  %v3042_v21 = vmul.f32 %v3033_v47, %v6428_v23  ;;  %v2960_v47 = vsel %vm7647_vm12, %v6630_v58, %v6640_v57  ;;  %v2971_v57 = vmul.f32 %v2962_v26, %v6428_v23  ;;  %vm7652_vm12 = vmmov %vm7651_vm11 }
 0x5bf   : > { %v2969_v36 = vmul.f32 %v2960_v47, %v6420_v50  ;;  %v2898_v26 = vmul.f32 %v2889_v42, %v6420_v50  ;;  %vm7656_vm11 = vmmov %vm7655_vm0 }
 0x5c0   : > { %v6904_v40 = vpop.permute.xlu1 %3982  ;;  %v6906_v24 = vpop.permute.xlu0 %3980 }
 0x5c2   : > { %3051 = vrot.lane.b32.xlu1 %v3040_v5, %s7646_s26  ;;  %3120 = vrot.lane.b32.xlu0 %v3110_v43, %s7606_s21  ;;  %s7650_s21 = smov 111  }
 0x5c4   : > { %v6918_v30 = vpop.permute.xlu1 %3986  ;;  %v6920_v3 = vpop.permute.xlu0 %3984 }
 0x5c6   : > { %3055 = vrot.lane.b32.xlu1 %v3042_v21, %s7646_s26  ;;  %3053 = vrot.lane.b32.xlu0 %v3041_v16, %s7646_s26 }
 0x5c8   : > { %v6928_v5 = vpop.permute.xlu1 %3911  ;;  %v6930_v43 = vpop.permute.xlu0 %3909 }
 0x5ca   : > { %3049 = vrot.lane.b32.xlu1 %v3039_v4, %s7646_s26  ;;  %3057 = vrot.lane.b32.xlu0 %v3043_v0, %s7646_s26  ;;  %v2972_v4 = vmul.f32 %v6452_v2, %v6648_v39 }
 0x5cc   : > { %v6942_v16 = vpop.permute.xlu1 %3915  ;;  %v6944_v21 = vpop.permute.xlu0 %3913 }
 0x5ce   : > { %2982 = vrot.lane.b32.xlu1 %v2970_v34, %s7650_s21  ;;  %2980 = vrot.lane.b32.xlu0 %v2969_v36, %s7650_s21  ;;  %v2890_v34 = vsel %vm7652_vm12, %v6660_v38, %v6662_v62  ;;  %v2897_v38 = vmul.f32 %v6434_v54, %v6650_v32  ;;  %v2901_v62 = vmul.f32 %v6452_v2, %v6668_v31  ;;  %vm7657_vm12 = vmmov %vm7655_vm0 }
 0x5cf   : > { %v2899_v58 = vmul.f32 %v2890_v34, %v6424_v63  ;;  %v6997_v34 = vld [vmem:[#allocation2 + $0x8] sm:$0xff]  ;;  %v2818_v54 = vsel %vm7656_vm11, %v6414_v33, %v6416_v28  ;;  %v2820_v6 = vsel %vm7657_vm12, %v6432_v20, %v6670_v29  ;;  %vm7662_vm12 = vcmask 138240  }
 0x5d0   : > { %v6954_v0 = vpop.permute.xlu1 %3840  ;;  %v6956_v47 = vpop.permute.xlu0 %3838 }
 0x5d2   : > { %2986 = vrot.lane.b32.xlu1 %v2972_v4, %s7650_s21  ;;  %2984 = vrot.lane.b32.xlu0 %v2971_v57, %s7650_s21  ;;  %v2900_v57 = vmul.f32 %v2891_v55, %v6428_v23  ;;  %v2819_v55 = vsel %vm7655_vm0, %v6416_v28, %v6432_v20  ;;  %v2830_v28 = vmul.f32 %v6452_v2, %v6670_v29  ;;  %vm7660_vm0 = vmmov %vm7659_vm1 }
 0x5d3   : > { %v2828_v32 = vmul.f32 %v2819_v55, %v6424_v63  ;;  %v2826_v29 = vmul.f32 %v7025_v59, %v6414_v33  ;;  %vm7661_vm11 = vmmov %vm7660_vm0  ;;  %v7050_v33 = vld [vmem:[#allocation2 + $0x28] sm:$0xff] }
 0x5d4   : > { %v6966_v36 = vpop.permute.xlu1 %3844  ;;  %v6968_v39 = vpop.permute.xlu0 %3842  ;;  %v4274_v53 = vsel %vm7661_vm11, %v6820_v7, %v6818_v15 }
 0x5d6   : > { %2909 = vrot.lane.b32.xlu1 %v2898_v26, %s7654_s5  ;;  %2978 = vrot.lane.b32.xlu0 %v2968_v45, %s7650_s21 }
 0x5d8   : > { %v6980_v4 = vpop.permute.xlu1 %3769  ;;  %v6982_v42 = vpop.permute.xlu0 %3767 }
 0x5da   : > { %2913 = vrot.lane.b32.xlu1 %v2900_v57, %s7654_s5  ;;  %2911 = vrot.lane.b32.xlu0 %v2899_v58, %s7654_s5  ;;  %v2827_v57 = vmul.f32 %v6997_v34, %v2818_v54  ;;  %v4272_v54 = vsel %vm7659_vm1, %v6680_v17, %v6682_v61  ;;  %vm7663_vm1 = vmmov %vm7662_vm12 }
 0x5db   : > { %v4281_v20 = vmul.f32 %v4272_v54, %v6424_v63  ;;  %vm7665_vm11 = vmmov %vm7663_vm1 }
 0x5dc   : > { %v6990_v26 = vpop.permute.xlu1 %3773  ;;  %v6992_v45 = vpop.permute.xlu0 %3771  ;;  %v4203_v1 = vsel %vm7665_vm11, %v6844_v44, %v6842_v41 }
 0x5de   : > { %2907 = vrot.lane.b32.xlu1 %v2897_v38, %s7654_s5  ;;  %2915 = vrot.lane.b32.xlu0 %v2901_v62, %s7654_s5  ;;  %v2829_v38 = vmul.f32 %v2820_v6, %v6428_v23 }
 0x5e0   : > { %v7005_v31 = vpop.permute.xlu1 %3664  ;;  %v7007_v58 = vpop.permute.xlu0 %3662 }
 0x5e2   : > { %2840 = vrot.lane.b32.xlu1 %v2828_v32, %s7658_s7  ;;  %2838 = vrot.lane.b32.xlu0 %v2827_v57, %s7658_s7  ;;  %v4273_v57 = vsel %vm7660_vm0, %v6682_v61, %v6820_v7  ;;  %v4280_v61 = vmul.f32 %v6680_v17, %v6420_v50  ;;  %v4284_v7 = vmul.f32 %v6818_v15, %v7050_v33  ;;  %vm7664_vm0 = vcmask 392192  }
 0x5e4   : > { %v7018_v62 = vpop.permute.xlu1 %3668  ;;  %v7020_v55 = vpop.permute.xlu0 %3666 }
 0x5e6   : > { %2844 = vrot.lane.b32.xlu1 %v2830_v28, %s7658_s7  ;;  %2842 = vrot.lane.b32.xlu0 %v2829_v38, %s7658_s7  ;;  %v4282_v38 = vmul.f32 %v4273_v57, %v6428_v23  ;;  %v4283_v28 = vmul.f32 %v4274_v53, %v6452_v2  ;;  %v4201_v53 = vsel %vm7662_vm12, %v6832_v22, %v6830_v60  ;;  %vm7666_vm12 = vmmov %vm7664_vm0 }
 0x5e7   : > { %v4202_v57 = vsel %vm7663_vm1, %v6830_v60, %v6844_v44  ;;  %v4210_v17 = vmul.f32 %v4201_v53, %v6424_v63  ;;  %vm7667_vm1 = vmmov %vm7664_vm0 }
 0x5e8   : > { %v7030_v6 = vpop.permute.xlu1 %3593  ;;  %v7032_v32 = vpop.permute.xlu0 %3591  ;;  %v4211_v15 = vmul.f32 %v4202_v57, %v6428_v23  ;;  %vm7669_vm11 = vmmov %vm7667_vm1 }
 0x5ea   : > { %4292 = vrot.lane.b32.xlu1 %v4281_v20, %s7646_s26  ;;  %2836 = vrot.lane.b32.xlu0 %v2826_v29, %s7658_s7 }
 0x5ec   : > { %v7046_v54 = vpop.permute.xlu1 %3597  ;;  %v7048_v13 = vpop.permute.xlu0 %3595 }
 0x5ee   : > { %4296 = vrot.lane.b32.xlu1 %v4283_v28, %s7646_s26  ;;  %4294 = vrot.lane.b32.xlu0 %v4282_v38, %s7646_s26 }
 0x5f0   : > { %v3551_v20 = vpop.permute.xlu1 %3550  ;;  %v3549_v29 = vpop.permute.xlu0 %3548 }
 0x5f1   : > { %v3557_v28 = vsel %vm7664_vm0, %v3549_v29, %v3551_v20  ;;  %vm7668_vm0 = vcmask 130048  }
 0x5f2   : > { %4290 = vrot.lane.b32.xlu1 %v4280_v61, %s7646_s26  ;;  %4298 = vrot.lane.b32.xlu0 %v4284_v7, %s7646_s26  ;;  %v4213_v61 = vmul.f32 %v7050_v33, %v6842_v41  ;;  %v4212_v7 = vmul.f32 %v4203_v1, %v6452_v2  ;;  %v4130_v44 = vsel %vm7668_vm0, %v6858_v25, %v6856_v10  ;;  %s5024_s26 = smov [#allocation10]  }
 0x5f3   : > { %4433 = vmatprep.subr.mxu0 %v3557_v28  ;;  %s4916_s19 = sshll.u32 %s5024_s26, 4  ;;  %s4917_s19 = int_to_ptr.vmem [resolvable:$false] %s4916_s19 }
 0x5f4   : > { %v3555_v38 = vpop.permute.xlu1 %3554  ;;  %v3553_v35 = vpop.permute.xlu0 %3552 }
 0x5f5   : > { %v3559_v8 = vsel %vm7666_vm12, %v3553_v35, %v3555_v38  ;;  %v3558_v60 = vsel %vm7667_vm1, %v3551_v20, %v3553_v35  ;;  %v4139_v35 = vmul.f32 %v4130_v44, %v6424_v63  ;;  %vm7670_vm12 = vmmov %vm7668_vm0 }
 0x5f6   : > { %4221 = vrot.lane.b32.xlu0 %v4210_v17, %s7650_s21  ;;  %4223 = vrot.lane.b32.xlu1 %v4211_v15, %s7650_s21  ;;  %v4131_v20 = vsel %vm7670_vm12, %v6856_v10, %v6868_v14  ;;  %vm7671_vm1 = vmmov %vm7668_vm0  ;;  %vm7672_vm0 = vcmask 441344  }
 0x5f7   : > { %4504 = vmatprep.subr.mxu1 %v3559_v8  ;;  %v4209_v8 = vmul.f32 %v6832_v22, %v6420_v50  ;;  %v4140_v22 = vmul.f32 %v4131_v20, %v6428_v23  ;;  %vm7674_vm12 = vmmov %vm7672_vm0 }
 0x5f8   : > { %4505 = vmatpush1.msra.mxu1 %v3558_v60  ;;  %v3478_v53 = vpop.permute.xlu1 %3477  ;;  %v3547_v57 = vpop.permute.xlu0 %3546 }
 0x5f9   : > { %v3556_v28 = vsel %vm7669_vm11, %v3547_v57, %v3549_v29  ;;  %v4132_v29 = vsel %vm7671_vm1, %v6868_v14, %v6866_v37  ;;  %vm7673_vm11 = vmmov %vm7672_vm0  ;;  %v4142_v57 = vmul.f32 %v7050_v33, %v6866_v37 }
 0x5fa   : > { %4225 = vrot.lane.b32.xlu0 %v4212_v7, %s7650_s21  ;;  %4227 = vrot.lane.b32.xlu1 %v4213_v61, %s7650_s21  ;;  %v4141_v15 = vmul.f32 %v4132_v29, %v6452_v2  ;;  %vm7675_vm1 = vmmov %vm7672_vm0  ;;  %v4138_v7 = vmul.f32 %v6858_v25, %v6420_v50 }
 0x5fb   : > { %4434 = vmatpush1.msra.mxu0 %v3556_v28 }
 0x5fc   : > { %v3482_v1 = vpop.permute.xlu1 %3481  ;;  %v3480_v41 = vpop.permute.xlu0 %3479 }
 0x5fd   : > { %v3486_v17 = vsel %vm7672_vm0, %v3478_v53, %v3480_v41  ;;  %v3487_v14 = vsel %vm7675_vm1, %v3480_v41, %v3482_v1  ;;  %vm7676_vm0 = vcmask 80896  }
 0x5fe   : > { %4219 = vrot.lane.b32.xlu0 %v4209_v8, %s7650_s21  ;;  %4150 = vrot.lane.b32.xlu1 %v4139_v35, %s7654_s5  ;;  %vm7679_vm1 = vmmov %vm7676_vm0  ;;  %s4918_s21 = scalar_lea.vmem %s4917_s19, 1024 }
 0x5ff   : > { %4435 = vmatprep.subr.mxu0 %v3486_v17  ;;  %v4061_v20 = vsel %vm7679_vm1, %v6894_v49, %v6892_v51  ;;  %v4071_v17 = vmul.f32 %v7050_v33, %v6892_v51  ;;  %vm7683_vm1 = vcmask 457728  }
 0x600   : > { %v3476_v38 = vpop.permute.xlu1 %3475  ;;  %v3484_v60 = vpop.permute.xlu0 %3483 }
 0x601   : > { %v3485_v61 = vsel %vm7673_vm11, %v3476_v38, %v3478_v53  ;;  %v3488_v10 = vsel %vm7674_vm12, %v3482_v1, %v3484_v60  ;;  %v4059_v53 = vsel %vm7676_vm0, %v6882_v27, %v6880_v9  ;;  %vm7677_vm11 = vmmov %vm7676_vm0  ;;  %vm7678_vm12 = vcmask 449536  }
 0x602   : > { %4154 = vrot.lane.b32.xlu1 %v4141_v15, %s7654_s5  ;;  %4152 = vrot.lane.b32.xlu0 %v4140_v22, %s7654_s5  ;;  %v4060_v8 = vsel %vm7677_vm11, %v6880_v9, %v6894_v49  ;;  %v4068_v25 = vmul.f32 %v4059_v53, %v6424_v63  ;;  %vm7680_vm0 = vmmov %vm7678_vm12  ;;  %v4070_v22 = vmul.f32 %v4061_v20, %v6452_v2 }
 0x603   : > { %4436 = vmatpush1.msra.mxu0 %v3485_v61  ;;  %4506 = vmatprep.subr.mxu1 %v3488_v10  ;;  %v4069_v37 = vmul.f32 %v4060_v8, %v6428_v23  ;;  %vm7681_vm11 = vmmov %vm7680_vm0  ;;  %v3988_v49 = vsel %vm566_vm5, %v6906_v24, %v6904_v40  ;;  %v4067_v61 = vmul.f32 %v6882_v27, %v6420_v50 }
 0x604   : > { %4507 = vmatpush1.msra.mxu1 %v3487_v14  ;;  %v3409_v44 = vpop.permute.xlu1 %3408  ;;  %v3407_v28 = vpop.permute.xlu0 %3406  ;;  %v3997_v51 = vmul.f32 %v3988_v49, %v6424_v63 }
 0x605   : > { %v3415_v35 = vsel %vm7678_vm12, %v3407_v28, %v3409_v44  ;;  %vm7682_vm12 = vmmov %vm7680_vm0 }
 0x606   : > { %4148 = vrot.lane.b32.xlu1 %v4138_v7, %s7654_s5  ;;  %4156 = vrot.lane.b32.xlu0 %v4142_v57, %s7654_s5  ;;  %v3989_v7 = vsel %vm566_vm5, %v6904_v40, %v6920_v3  ;;  %v3990_v57 = vsel %vm566_vm5, %v6920_v3, %v6918_v30 }
 0x607   : > { %4437 = vmatprep.subr.mxu0 %v3415_v35  ;;  %v3998_v27 = vmul.f32 %v3989_v7, %v6428_v23  ;;  %v3999_v63 = vmul.f32 %v3990_v57, %v6452_v2  ;;  %v3996_v35 = vmul.f32 %v6906_v24, %v6420_v50  ;;  %v4000_v23 = vmul.f32 %v7050_v33, %v6918_v30  ;;  %v4828_v50 = vld [vmem:[#allocation2 + $0x10] sm:$0xff]  ;;  %v4829_v30 = vld [vmem:[#allocation2 + $0x18] sm:$0xff] }
 0x608   : > { %v3413_v1 = vpop.permute.xlu1 %3412  ;;  %v3411_v41 = vpop.permute.xlu0 %3410  ;;  %v3847_v57 = vsel %vm418_vm3, %v6954_v0, %v6968_v39 }
 0x609   : > { %v3416_v29 = vsel %vm7680_vm0, %v3409_v44, %v3411_v41  ;;  %v3417_v9 = vsel %vm7681_vm11, %v3411_v41, %v3413_v1  ;;  %vm7684_vm0 = vmmov %vm7683_vm1  ;;  %v3917_v1 = vsel %vm492_vm4, %v6930_v43, %v6928_v5  ;;  %v3918_v41 = vsel %vm492_vm4, %v6928_v5, %v6944_v21 }
 0x60a   : > { %4079 = vrot.lane.b32.xlu0 %v4068_v25, %s7658_s7  ;;  %4081 = vrot.lane.b32.xlu1 %v4069_v37, %s7658_s7  ;;  %vm7685_vm11 = vmmov %vm7684_vm0  ;;  %v3926_v24 = vmul.f32 %v4828_v50, %v3917_v1  ;;  %v3776_v1 = vsel %vm344_vm2, %v6980_v4, %v6992_v45 }
 0x60b   : > { %4508 = vmatprep.subr.mxu1 %v3417_v9  ;;  %vm7686_vm5 = vmmov %vm7684_vm0 }
 0x60c   : > { %4509 = vmatpush1.msra.mxu1 %v3416_v29  ;;  %v3336_v15 = vpop.permute.xlu1 %3335  ;;  %v3405_v38 = vpop.permute.xlu0 %3404  ;;  %v3927_v29 = vmul.f32 %v4829_v30, %v3918_v41 }
 0x60d   : > { %v3414_v60 = vsel %vm7682_vm12, %v3405_v38, %v3407_v28  ;;  %vm7687_vm12 = vcmask 506880   ;;  %v3929_v38 = vmul.f32 %v7050_v33, %v6942_v16 }
 0x60e   : > { %4083 = vrot.lane.b32.xlu0 %v4070_v22, %s7658_s7  ;;  %4085 = vrot.lane.b32.xlu1 %v4071_v17, %s7658_s7  ;;  %v3919_v22 = vsel %vm492_vm4, %v6944_v21, %v6942_v16  ;;  %v3846_v21 = vsel %vm418_vm3, %v6956_v47, %v6954_v0 }
 0x60f   : > { %4438 = vmatpush1.msra.mxu0 %v3414_v60  ;;  %v3928_v49 = vmul.f32 %v3919_v22, %v6452_v2  ;;  %v3855_v16 = vmul.f32 %v4828_v50, %v3846_v21 }
 0x610   : > { %v3340_v10 = vpop.permute.xlu1 %3339  ;;  %v3338_v14 = vpop.permute.xlu0 %3337 }
 0x611   : > { %v3344_v44 = vsel %vm7683_vm1, %v3336_v15, %v3338_v14  ;;  %v3345_v3 = vsel %vm7686_vm5, %v3338_v14, %v3340_v10  ;;  %vm7688_vm1 = vmmov %vm7687_vm12 }
 0x612   : > { %4008 = vrot.lane.b32.xlu1 %v3997_v51, %s7579_s10  ;;  %4077 = vrot.lane.b32.xlu0 %v4067_v61, %s7658_s7 }
 0x613   : > { %4439 = vmatprep.subr.mxu0 %v3344_v44  ;;  %v3848_v44 = vsel %vm418_vm3, %v6968_v39, %v6966_v36 }
 0x614   : > { %v3334_v28 = vpop.permute.xlu1 %3333  ;;  %v3342_v53 = vpop.permute.xlu0 %3341 }
 0x615   : > { %v3343_v8 = vsel %vm7684_vm0, %v3334_v28, %v3336_v15  ;;  %v3346_v40 = vsel %vm7685_vm11, %v3340_v10, %v3342_v53  ;;  %vm7689_vm0 = vmmov %vm7688_vm1  ;;  %v4830_v10 = vld [vmem:[#allocation2 + $0x8] sm:$0xff]  ;;  %vm7691_vm11 = vcmask 515072  }
 0x616   : > { %4012 = vrot.lane.b32.xlu1 %v3999_v63, %s7579_s10  ;;  %4010 = vrot.lane.b32.xlu0 %v3998_v27, %s7579_s10  ;;  %vm7690_vm4 = vmmov %vm7689_vm0  ;;  %v3925_v14 = vmul.f32 %v4830_v10, %v6930_v43  ;;  %v3856_v63 = vmul.f32 %v4829_v30, %v3847_v57  ;;  %v4831_v43 = vld [vmem:[#allocation2 + $0x20] sm:$0xff]  ;;  %v4314_v57 = vld [vmem:[#allocation7 + $0x18] sm:$0xff] }
 0x617   : > { %4440 = vmatpush1.msra.mxu0 %v3343_v8  ;;  %4510 = vmatprep.subr.mxu1 %v3346_v40  ;;  %v3857_v28 = vmul.f32 %v4831_v43, %v3848_v44  ;;  %vm7692_vm5 = vmmov %vm7691_vm11  ;;  %v3678_v44 = vmul.f32 %v7007_v58, %v7025_v59 }
 0x618   : > { %4511 = vmatpush1.msra.mxu1 %v3345_v3  ;;  %v3267_v25 = vpop.permute.xlu1 %3266  ;;  %v3265_v37 = vpop.permute.xlu0 %3264  ;;  %vm7694_vm3 = vmmov %vm7692_vm5  ;;  %v3854_v3 = vmul.f32 %v4830_v10, %v6956_v47  ;;  %v7210_v47 = vld [vmem:[#allocation2 + $0x10] sm:$0xff] }
 0x619   : > { %v3273_v20 = vsel %vm7687_vm12, %v3265_v37, %v3267_v25  ;;  %vm7693_vm12 = vmmov %vm7692_vm5 }
 0x61a   : > { %4006 = vrot.lane.b32.xlu1 %v3996_v35, %s7579_s10  ;;  %4014 = vrot.lane.b32.xlu0 %v4000_v23, %s7579_s10  ;;  %v3858_v35 = vmul.f32 %v7050_v33, %v6966_v36  ;;  %v7212_v36 = vld [vmem:[#allocation2 + $0x18] sm:$0xff]  ;;  %s7702_s10 = smov 46  }
 0x61b   : > { %4441 = vmatprep.subr.mxu0 %v3273_v20  ;;  %v3785_v50 = vmul.f32 %v3776_v1, %v7212_v36 }
 0x61c   : > { %v3271_v9 = vpop.permute.xlu1 %3270  ;;  %v3269_v17 = vpop.permute.xlu0 %3268 }
 0x61d   : > { %v3274_v15 = vsel %vm7688_vm1, %v3267_v25, %v3269_v17  ;;  %v3275_v5 = vsel %vm7689_vm0, %v3269_v17, %v3271_v9  ;;  %vm7695_vm1 = vcmask 523264   ;;  %v3787_v17 = vmul.f32 %v7050_v33, %v6990_v26 }
 0x61e   : > { %3939 = vrot.lane.b32.xlu1 %v3927_v29, %s7580_s11  ;;  %3937 = vrot.lane.b32.xlu0 %v3926_v24, %s7580_s11  ;;  %vm7696_vm0 = vmmov %vm7695_vm1 }
 0x61f   : > { %4512 = vmatprep.subr.mxu1 %v3275_v5 }
 0x620   : > { %4513 = vmatpush1.msra.mxu1 %v3274_v15  ;;  %v3194_v60 = vpop.permute.xlu1 %3193  ;;  %v3263_v61 = vpop.permute.xlu0 %3262 }
 0x621   : > { %v3272_v51 = vsel %vm7690_vm4, %v3263_v61, %v3265_v37  ;;  %v3775_v37 = vsel %vm344_vm2, %v6982_v42, %v6980_v4  ;;  %v3777_v4 = vsel %vm344_vm2, %v6992_v45, %v6990_v26  ;;  %vm7697_vm4 = vmmov %vm7696_vm0 }
 0x622   : > { %3943 = vrot.lane.b32.xlu1 %v3929_v38, %s7580_s11  ;;  %3941 = vrot.lane.b32.xlu0 %v3928_v49, %s7580_s11  ;;  %v3784_v20 = vmul.f32 %v3775_v37, %v7210_v47  ;;  %v3786_v22 = vmul.f32 %v4831_v43, %v3777_v4  ;;  %vm7699_vm2 = vmmov %vm7696_vm0  ;;  %v3783_v49 = vmul.f32 %v6982_v42, %v6997_v34 }
 0x623   : > { %4442 = vmatpush1.msra.mxu0 %v3272_v51 }
 0x624   : > { %v3198_v7 = vpop.permute.xlu1 %3197  ;;  %v3196_v2 = vpop.permute.xlu0 %3195 }
 0x625   : > { %v3202_v27 = vsel %vm7691_vm11, %v3194_v60, %v3196_v2  ;;  %v3203_v39 = vsel %vm7694_vm3, %v3196_v2, %v3198_v7  ;;  %vm7698_vm11 = vcmask 670720   ;;  %vm7703_vm3 = vcmask 719872  }
 0x626   : > { %3866 = vrot.lane.b32.xlu1 %v3855_v16, %s7581_s23  ;;  %3935 = vrot.lane.b32.xlu0 %v3925_v14, %s7580_s11  ;;  %v3670_v45 = vsel %vm7698_vm11, %v7007_v58, %v7005_v31 }
 0x627   : > { %4443 = vmatprep.subr.mxu0 %v3202_v27  ;;  %v3679_v26 = vmul.f32 %v6997_v34, %v3670_v45  ;;  %4712 = vmatprep.mubr.msk.f32.mxu1 %vm7703_vm3, %v4314_v57 }
 0x628   : > { %v3192_v53 = vpop.permute.xlu1 %3191  ;;  %v3200_v8 = vpop.permute.xlu0 %3199 }
 0x629   : > { %v3201_v40 = vsel %vm7692_vm5, %v3192_v53, %v3194_v60  ;;  %v3204_v0 = vsel %vm7693_vm12, %v3198_v7, %v3200_v8  ;;  %vm7700_vm5 = vmmov %vm7698_vm11 }
 0x62a   : > { %3870 = vrot.lane.b32.xlu1 %v3857_v28, %s7581_s23  ;;  %3868 = vrot.lane.b32.xlu0 %v3856_v63, %s7581_s23  ;;  %v3671_v61 = vsel %vm7700_vm5, %v7005_v31, %v7020_v55  ;;  %vm7701_vm12 = vmmov %vm7700_vm5 }
 0x62b   : > { %4444 = vmatpush1.msra.mxu0 %v3201_v40  ;;  %4514 = vmatprep.subr.mxu1 %v3204_v0  ;;  %v3672_v21 = vsel %vm7701_vm12, %v7020_v55, %v7018_v62  ;;  %v3680_v42 = vmul.f32 %v7210_v47, %v3671_v61  ;;  %v7249_v55 = vld [vmem:[#allocation2 + $0x20] sm:$0xff]  ;;  %vm7720_vm12 = vcmask 1039360  }
 0x62c   : > { %4515 = vmatpush1.msra.mxu1 %v3203_v39  ;;  %v3125_v23 = vpop.permute.xlu1 %3124  ;;  %v3123_v25 = vpop.permute.xlu0 %3122  ;;  %v3681_v10 = vmul.f32 %v7212_v36, %v3672_v21  ;;  %v3682_v27 = vmul.f32 %v7018_v62, %v7249_v55  ;;  %v2707_v21 = vsel %vm521_vm15, %v6794_v56, %v6734_v19  ;;  %v7709_v19 = vld [vmem:[#allocation30_spill] sm:$0xff] }
 0x62d   : > { %v3131_v41 = vsel %vm7695_vm1, %v3123_v25, %v3125_v23  ;;  %vm7704_vm1 = vcmask 662528  }
 0x62e   : > { %3864 = vrot.lane.b32.xlu1 %v3854_v3, %s7581_s23  ;;  %3872 = vrot.lane.b32.xlu0 %v3858_v35, %s7581_s23  ;;  %v3599_v28 = vsel %vm7704_vm1, %v7032_v32, %v7030_v6  ;;  %v3611_v35 = vmul.f32 %v7249_v55, %v7046_v54 }
 0x62f   : > { %4445 = vmatprep.subr.mxu0 %v3131_v41  ;;  %v3608_v58 = vmul.f32 %v6997_v34, %v3599_v28  ;;  %v3607_v41 = vmul.f32 %v7025_v59, %v7032_v32  ;;  %v7717_v28 = vld [vmem:[#allocation34_spill] sm:$0xff] }
 0x630   : > { %v3129_v24 = vpop.permute.xlu1 %3128  ;;  %v3127_v30 = vpop.permute.xlu0 %3126 }
 0x631   : > { %v3132_v29 = vsel %vm7696_vm0, %v3125_v23, %v3127_v30  ;;  %v3133_v9 = vsel %vm7697_vm4, %v3127_v30, %v3129_v24  ;;  %vm7705_vm0 = vmmov %vm7704_vm1 }
 0x632   : > { %3797 = vrot.lane.b32.xlu1 %v3785_v50, %s7582_s28  ;;  %3795 = vrot.lane.b32.xlu0 %v3784_v20, %s7582_s28  ;;  %v3600_v53 = vsel %vm7705_vm0, %v7030_v6, %v7048_v13  ;;  %vm7706_vm4 = vmmov %vm7703_vm3 }
 0x633   : > { %4516 = vmatprep.subr.mxu1 %v3133_v9  ;;  %4711 = vmatprep.mubr.msk.f32.mxu0 %vm7706_vm4, %v4314_v57  ;;  %v3609_v62 = vmul.f32 %v7210_v47, %v3600_v53  ;;  %vm7707_vm11 = vmmov %vm7705_vm0 }
 0x634   : > { %4517 = vmatpush1.msra.mxu1 %v3132_v29  ;;  %v3052_v15 = vpop.permute.xlu1 %3051  ;;  %v3121_v5 = vpop.permute.xlu0 %3120  ;;  %v3601_v39 = vsel %vm7707_vm11, %v7048_v13, %v7046_v54  ;;  %v4710_v13 = vld [vmem:[%s7443_s2 + $0x8] sm:$0xff]  ;;  %vm7725_vm1 = vmmov %vm7720_vm12 }
 0x635   : > { %v3130_v38 = vsel %vm7699_vm2, %v3121_v5, %v3123_v25  ;;  %v3610_v23 = vmul.f32 %v7212_v36, %v3601_v39  ;;  %vm7711_vm2 = vcmask 1031168   ;;  %vm7729_vm4 = vmmov %vm7725_vm1 }
 0x636   : > { %3801 = vrot.lane.b32.xlu1 %v3787_v17, %s7582_s28  ;;  %3799 = vrot.lane.b32.xlu0 %v3786_v22, %s7582_s28  ;;  %vm7715_vm5 = vmmov %vm7711_vm2 }
 0x637   : > { %4446 = vmatpush1.msra.mxu0 %v3130_v38  ;;  %vm7723_vm3 = vmmov %vm7711_vm2 }
 0x638   : > { %v3056_v33 = vpop.permute.xlu1 %3055  ;;  %v3054_v60 = vpop.permute.xlu0 %3053  ;;  %vm7727_vm0 = vmmov %vm7711_vm2 }
 0x639   : > { %v3060_v51 = vsel %vm890_vm9, %v3052_v15, %v3054_v60  ;;  %v3061_v2 = vsel %vm890_vm9, %v3054_v60, %v3056_v33  ;;  %v2777_v60 = vsel %vm595_vm10, %v6804_v18, %v6806_v52  ;;  %vm7731_vm11 = vmmov %vm7725_vm1 }
 0x63a   : > { %3690 = vrot.lane.b32.xlu1 %v3679_v26, %s7702_s10  ;;  %3793 = vrot.lane.b32.xlu0 %v3783_v49, %s7582_s28  ;;  %v2778_v49 = vsel %vm595_vm10, %v6806_v52, %v6732_v11  ;;  %v2776_v11 = vsel %vm595_vm10, %v6796_v48, %v6804_v18 }
 0x63b   : > { %4447 = vmatprep.subr.mxu0 %v3060_v51  ;;  %v2473_v51 = vld [vmem:[#allocation9] ss:$8 sm:$0xf] }
 0x63c   : > { %v3050_v14 = vpop.permute.xlu1 %3049  ;;  %v3058_v16 = vpop.permute.xlu0 %3057  ;;  %v2490_v52 = vrot.slane %v2473_v51, %v5202_v12 }
 0x63d   : > { %v3059_v7 = vsel %vm890_vm9, %v3050_v14, %v3052_v15  ;;  %v3062_v31 = vsel %vm890_vm9, %v3056_v33, %v3058_v16  ;;  %v7710_v16 = vld [vmem:[#allocation23_spill] sm:$0xff] }
 0x63e   : > { %3694 = vrot.lane.b32.xlu1 %v3681_v10, %s7702_s10  ;;  %3692 = vrot.lane.b32.xlu0 %v3680_v42, %s7702_s10  ;;  %v2706_v42 = vsel %vm521_vm15, %v6782_v46, %v6794_v56  ;;  %v7708_v10 = vld [vmem:[#allocation35_spill] sm:$0xff]  ;;  %v7713_v56 = vld [vmem:[#allocation32_spill] sm:$0xff] }
 0x63f   : > { %4448 = vmatpush1.msra.mxu0 %v3059_v7  ;;  %4518 = vmatprep.subr.mxu1 %v3062_v31  ;;  %v2775_v14 = vsel %vm595_vm10, %v7708_v10, %v6796_v48  ;;  %v2636_v7 = vsel %vm7711_vm2, %v7710_v16, %v7709_v19  ;;  %v7712_v31 = vld [vmem:[#allocation16_spill] sm:$0xff]  ;;  %v2704_v53 = vsel %vm521_vm15, %v7717_v28, %v7713_v56  ;;  %vm7738_vm2 = vmmov %vm7725_vm1 }
 0x640   : > { %4519 = vmatpush1.msra.mxu1 %v3061_v2  ;;  %v2983_v63 = vpop.permute.xlu1 %2982  ;;  %v2981_v43 = vpop.permute.xlu0 %2980  ;;  %v2486_v2 = vrot.slane %v2473_v51, %v7712_v31 }
 0x641   : > { %v2989_v8 = vsel %vm817_vm7, %v2981_v43, %v2983_v63 }
 0x642   : > { %3688 = vrot.lane.b32.xlu1 %v3678_v44, %s7702_s10  ;;  %3696 = vrot.lane.b32.xlu0 %v3682_v27, %s7702_s10  ;;  %v2705_v44 = vsel %vm521_vm15, %v7713_v56, %v6782_v46  ;;  %v7714_v27 = vld [vmem:[#allocation18_spill] sm:$0xff]  ;;  %v7722_v46 = vld [vmem:[#allocation31_spill] sm:$0xff] }
 0x643   : > { %4449 = vmatprep.subr.mxu0 %v2989_v8  ;;  %v7718_v8 = vld [vmem:[#allocation21_spill] sm:$0xff]  ;;  %v2634_v39 = vsel %vm7723_vm3, %v7722_v46, %v7714_v27 }
 0x644   : > { %v2987_v40 = vpop.permute.xlu1 %2986  ;;  %v2985_v0 = vpop.permute.xlu0 %2984 }
 0x645   : > { %v2990_v6 = vsel %vm817_vm7, %v2983_v63, %v2985_v0  ;;  %v2991_v3 = vsel %vm817_vm7, %v2985_v0, %v2987_v40  ;;  %v2635_v63 = vsel %vm7715_vm5, %v7714_v27, %v7710_v16  ;;  %v7721_v40 = vld [vmem:[#allocation14_spill] sm:$0xff]  ;;  %vm7739_vm5 = vmmov %vm7725_vm1 }
 0x646   : > { %3621 = vrot.lane.b32.xlu1 %v3609_v62, %s5023_s20  ;;  %3619 = vrot.lane.b32.xlu0 %v3608_v58, %s5023_s20  ;;  %v7719_v58 = vld [vmem:[#allocation28_spill] sm:$0xff]  ;;  %v2482_v0 = vrot.slane %v2473_v51, %v7721_v40 }
 0x647   : > { %4520 = vmatprep.subr.mxu1 %v2991_v3  ;;  %v2565_v62 = vsel %vm7720_vm12, %v7719_v58, %v7718_v8 }
 0x648   : > { %4521 = vmatpush1.msra.mxu1 %v2990_v6  ;;  %v2910_v25 = vpop.permute.xlu1 %2909  ;;  %v2979_v37 = vpop.permute.xlu0 %2978  ;;  %v7724_v6 = vld [vmem:[#allocation36_spill] sm:$0xff] }
 0x649   : > { %v2988_v1 = vsel %vm817_vm7, %v2979_v37, %v2981_v43  ;;  %v7716_v43 = vld [vmem:[#allocation15_spill] sm:$0xff]  ;;  %v2564_v3 = vsel %vm7725_vm1, %v7724_v6, %v7719_v58  ;;  %v2497_v37 = vmul.f32 %v7210_v47, %v2486_v2 }
 0x64a   : > { %3625 = vrot.lane.b32.xlu1 %v3611_v35, %s5023_s20  ;;  %3623 = vrot.lane.b32.xlu0 %v3610_v23, %s5023_s20  ;;  %v2478_v48 = vrot.slane %v2473_v51, %v7716_v43  ;;  %v2498_v35 = vmul.f32 %v7212_v36, %v2490_v52  ;;  %v7726_v23 = vld [vmem:[#allocation22_spill] sm:$0xff] }
 0x64b   : > { %4450 = vmatpush1.msra.mxu0 %v2988_v1 }
 0x64c   : > { %v2914_v54 = vpop.permute.xlu1 %2913  ;;  %v2912_v20 = vpop.permute.xlu0 %2911 }
 0x64d   : > { %v2918_v50 = vsel %vm743_vm6, %v2910_v25, %v2912_v20  ;;  %v2919_v9 = vsel %vm743_vm6, %v2912_v20, %v2914_v54  ;;  %v7730_v20 = vld [vmem:[#allocation25_spill] sm:$0xff] }
 0x64e   : > { %4427 = vperm.xlu1 %4826, %v4710_v13   ;;  %3617 = vrot.lane.b32.xlu0 %v3607_v41, %s5023_s20  ;;  %v7728_v41 = vld [vmem:[#allocation24_spill] sm:$0xff]  ;;  %s7740_s20 = sshll.u32 %s5168_s6, 5 }
 0x64f   : > { %4451 = vmatprep.subr.mxu0 %v2918_v50  ;;  %v2562_v50 = vsel %vm7731_vm11, %v7730_v20, %v7728_v41  ;;  %s242_s11 = scalar_lea.vmem [#allocation10], %s7740_s20 }
 0x650   : > { %v2908_v24 = vpop.permute.xlu1 %2907  ;;  %v2916_v30 = vpop.permute.xlu0 %2915  ;;  %s4606_s9 = sshll.u32 %s242_s11, 4  ;;  %s4607_s9 = int_to_ptr.vmem [resolvable:$true] %s4606_s9 }
 0x651   : > { %v2917_v4 = vsel %vm743_vm6, %v2908_v24, %v2910_v25  ;;  %v2920_v29 = vsel %vm743_vm6, %v2914_v54, %v2916_v30  ;;  %v2633_v25 = vsel %vm7727_vm0, %v7726_v23, %v7722_v46  ;;  %v2563_v54 = vsel %vm7729_vm4, %v7728_v41, %v7724_v6  ;;  %s4912_s30 = scalar_lea.vmem %s4607_s9, 512  ;;  %p4919_p6 = scmp.lt.s32.totalorder %s4607_s9, %s4917_s19 }
 0x652   : > { %4452 = vmatpush1.msra.mxu0 %v2917_v4  ;;  %4522 = vmatprep.subr.mxu1 %v2920_v29  ;;  %v2496_v30 = vmul.f32 %v6997_v34, %v2482_v0  ;;  %v2495_v29 = vmul.f32 %v7025_v59, %v2478_v48  ;;  %p4913_p11 = scmp.ne.s32.totalorder %s4607_s9, %s4912_s30  ;;  %p4920_p12 = scmp.lt.s32.totalorder %s4918_s21, %s4912_s30 }
 0x653   : > { %4523 = vmatpush1.msra.mxu1 %v2919_v9 }
 0x654   : > { %v2841_v32 = vpop.permute.xlu1 %2840  ;;  %v2839_v17 = vpop.permute.xlu0 %2838  ;;  %p4914_p1 = pnand %p4913_p11, %p7741_p0  ;;  %p4921_p3 = por %p4920_p12, %p4919_p6 }
 0x655   : > { %v2847_v22 = vsel %vm669_vm8, %v2839_v17, %v2841_v32 }
 0x656   : > { %4453 = vmatprep.subr.mxu0 %v2847_v22  ;;  %p4915_p2 = pneg %p4914_p1 }
 0x658   : > { %v2845_v15 = vpop.permute.xlu1 %2844  ;;  %v2843_v5 = vpop.permute.xlu0 %2842  ;;  %p4922_p9 = pnand %p4921_p3, %p4915_p2 }
 0x659   : > { %v2848_v45 = vsel %vm669_vm8, %v2841_v32, %v2843_v5  ;;  %v2849_v38 = vsel %vm669_vm8, %v2843_v5, %v2845_v15 }
 0x65a   : > { %4524 = vmatprep.subr.mxu1 %v2849_v38 }
 0x65b   : > { %4525 = vmatpush1.msra.mxu1 %v2848_v45 }
 0x65c   : > { %v4293_v26 = vpop.permute.xlu1 %4292  ;;  %4526 = vmatprep.subr.mxu1 %v2778_v49  ;;  %v2837_v33 = vpop.permute.xlu0 %2836 }
 0x65d   : > { %v2846_v61 = vsel %vm669_vm8, %v2837_v33, %v2839_v17  ;;  %4527 = vmatpush1.msra.mxu1 %v2777_v60 }
 0x65e   : > { %4454 = vmatpush1.msra.mxu0 %v2846_v61  ;;  %4528 = vmatprep.subr.mxu1 %v2707_v21 }
 0x65f   : > { %4455 = vmatprep.subr.mxu0 %v2776_v11  ;;  %4529 = vmatpush1.msra.mxu1 %v2706_v42 }
 0x660   : > { %v4297_v57 = vpop.permute.xlu1 %4296  ;;  %4456 = vmatpush1.msra.mxu0 %v2775_v14  ;;  %4530 = vmatprep.subr.mxu1 %v2636_v7  ;;  %v4295_v18 = vpop.permute.xlu0 %4294 }
 0x661   : > { %4457 = vmatprep.subr.mxu0 %v2705_v44  ;;  %4531 = vmatpush1.msra.mxu1 %v2635_v63  ;;  %v4302_v4 = vsel %vm890_vm9, %v4295_v18, %v4297_v57  ;;  %v4301_v17 = vsel %vm890_vm9, %v4293_v26, %v4295_v18 }
 0x662   : > { %4458 = vmatpush1.msra.mxu0 %v2704_v53  ;;  %4532 = vmatprep.subr.mxu1 %v2565_v62 }
 0x663   : > { %4459 = vmatprep.subr.mxu0 %v2634_v39  ;;  %4533 = vmatpush1.msra.mxu1 %v2564_v3 }
 0x664   : > { %v4291_v1 = vpop.permute.xlu1 %4290  ;;  %4460 = vmatpush1.msra.mxu0 %v2633_v25  ;;  %4534 = vmatprep.subr.mxu1 %v2498_v35  ;;  %v4299_v13 = vpop.permute.xlu0 %4298 }
 0x665   : > { %4461 = vmatprep.subr.mxu0 %v2563_v54  ;;  %4535 = vmatpush1.msra.mxu1 %v2497_v37  ;;  %v4303_v24 = vsel %vm890_vm9, %v4297_v57, %v4299_v13  ;;  %v4300_v22 = vsel %vm890_vm9, %v4291_v1, %v4293_v26  ;;  %vm7735_vm9 = vmmov %vm7727_vm0 }
 0x666   : > { %4462 = vmatpush1.msra.mxu0 %v2562_v50  ;;  %4546 = vmatprep.subr.mxu1 %v4303_v24 }
 0x667   : > { %4463 = vmatprep.subr.mxu0 %v2496_v30  ;;  %4547 = vmatpush2.msra.mxu1 %v4302_v4 }
 0x668   : > { %v4224_v9 = vpop.permute.xlu1 %4223  ;;  %4464 = vmatpush1.msra.mxu0 %v2495_v29  ;;  %v4222_v32 = vpop.permute.xlu0 %4221 }
 0x669   : > { %4475 = vmatprep.subr.mxu0 %v4301_v17  ;;  %v4230_v15 = vsel %vm817_vm7, %v4222_v32, %v4224_v9 }
 0x66a   : > { %4476 = vmatpush2.msra.mxu0 %v4300_v22  ;;  %v3714_v22 = vld [vmem:[#allocation9 + $0x42] ss:$8 sm:$0xf] }
 0x66b   : > { %4477 = vmatprep.subr.mxu0 %v4230_v15  ;;  %v3731_v15 = vrot.slane %v3714_v22, %v5202_v12 }
 0x66c   : > { %v4228_v5 = vpop.permute.xlu1 %4227  ;;  %v4226_v45 = vpop.permute.xlu0 %4225 }
 0x66d   : > { %v4231_v38 = vsel %vm817_vm7, %v4224_v9, %v4226_v45  ;;  %v4232_v59 = vsel %vm817_vm7, %v4226_v45, %v4228_v5  ;;  %v3727_v5 = vrot.slane %v3714_v22, %v7712_v31 }
 0x66e   : > { %4548 = vmatprep.subr.mxu1 %v4232_v59 }
 0x66f   : > { %4549 = vmatpush2.msra.mxu1 %v4231_v38 }
 0x670   : > { %v4151_v49 = vpop.permute.xlu1 %4150  ;;  %v4220_v33 = vpop.permute.xlu0 %4219 }
 0x671   : > { %v4229_v60 = vsel %vm817_vm7, %v4220_v33, %v4222_v32  ;;  %vm7733_vm7 = vmmov %vm7727_vm0  ;;  %v3723_v33 = vrot.slane %v3714_v22, %v7721_v40 }
 0x672   : > { %4478 = vmatpush2.msra.mxu0 %v4229_v60  ;;  %v3739_v60 = vmul.f32 %v3731_v15, %v7249_v55 }
 0x674   : > { %v4155_v61 = vpop.permute.xlu1 %4154  ;;  %v4153_v26 = vpop.permute.xlu0 %4152 }
 0x675   : > { %v4159_v21 = vsel %vm743_vm6, %v4151_v49, %v4153_v26  ;;  %v4160_v10 = vsel %vm743_vm6, %v4153_v26, %v4155_v61  ;;  %v3738_v26 = vmul.f32 %v7212_v36, %v3727_v5 }
 0x676   : > { %4479 = vmatprep.subr.mxu0 %v4159_v21 }
 0x678   : > { %v4149_v51 = vpop.permute.xlu1 %4148  ;;  %v4157_v11 = vpop.permute.xlu0 %4156 }
 0x679   : > { %v4158_v42 = vsel %vm743_vm6, %v4149_v51, %v4151_v49  ;;  %v4161_v52 = vsel %vm743_vm6, %v4155_v61, %v4157_v11  ;;  %vm7732_vm6 = vmmov %vm7727_vm0  ;;  %v3719_v61 = vrot.slane %v3714_v22, %v7716_v43  ;;  %v3737_v51 = vmul.f32 %v7210_v47, %v3723_v33 }
 0x67a   : > { %4480 = vmatpush2.msra.mxu0 %v4158_v42  ;;  %4550 = vmatprep.subr.mxu1 %v4161_v52 }
 0x67b   : > { %4551 = vmatpush2.msra.mxu1 %v4160_v10  ;;  %v3736_v11 = vmul.f32 %v6997_v34, %v3719_v61 }
 0x67c   : > { %v4082_v14 = vpop.permute.xlu1 %4081  ;;  %v4080_v19 = vpop.permute.xlu0 %4079 }
 0x67d   : > { %v4088_v16 = vsel %vm669_vm8, %v4080_v19, %v4082_v14 }
 0x67e   : > { %4481 = vmatprep.subr.mxu0 %v4088_v16 }
 0x680   : > { %v4086_v7 = vpop.permute.xlu1 %4085  ;;  %v4084_v2 = vpop.permute.xlu0 %4083 }
 0x681   : > { %v4089_v57 = vsel %vm669_vm8, %v4082_v14, %v4084_v2  ;;  %v4090_v18 = vsel %vm669_vm8, %v4084_v2, %v4086_v7 }
 0x682   : > { %4552 = vmatprep.subr.mxu1 %v4090_v18  ;;  %v4313_v18 = vld [vmem:[#allocation7 + $0x10] sm:$0xff] }
 0x683   : > { %4553 = vmatpush2.msra.mxu1 %v4089_v57 }
 0x684   : > { %v4009_v56 = vpop.permute.xlu1 %4008  ;;  %v4078_v44 = vpop.permute.xlu0 %4077 }
 0x685   : > { %v4087_v27 = vsel %vm669_vm8, %v4078_v44, %v4080_v19  ;;  %vm7734_vm8 = vmmov %vm7727_vm0 }
 0x686   : > { %4482 = vmatpush2.msra.mxu0 %v4087_v27 }
 0x688   : > { %v4013_v63 = vpop.permute.xlu1 %4012  ;;  %v4011_v48 = vpop.permute.xlu0 %4010 }
 0x689   : > { %v4017_v28 = vsel %vm595_vm10, %v4009_v56, %v4011_v48  ;;  %v4018_v0 = vsel %vm595_vm10, %v4011_v48, %v4013_v63  ;;  %v4577_v48 = vld [vmem:[%s5174_s12 + $0x10] sm:$0xff] }
 0x68a   : > { %4483 = vmatprep.subr.mxu0 %v4017_v28 }
 0x68c   : > { %v4007_v53 = vpop.permute.xlu1 %4006  ;;  %v4015_v8 = vpop.permute.xlu0 %4014 }
 0x68d   : > { %v4016_v58 = vsel %vm595_vm10, %v4007_v53, %v4009_v56  ;;  %v4019_v62 = vsel %vm595_vm10, %v4013_v63, %v4015_v8  ;;  %vm7736_vm10 = vmmov %vm7725_vm1  ;;  %v4578_v8 = vld [vmem:[%s5174_s12 + $0x18] sm:$0xff] }
 0x68e   : > { %4484 = vmatpush2.msra.mxu0 %v4016_v58  ;;  %4554 = vmatprep.subr.mxu1 %v4019_v62 }
 0x68f   : > { %4555 = vmatpush2.msra.mxu1 %v4018_v0 }
 0x690   : > { %v3940_v46 = vpop.permute.xlu1 %3939  ;;  %v3938_v39 = vpop.permute.xlu0 %3937 }
 0x691   : > { %v3946_v6 = vsel %vm521_vm15, %v3938_v39, %v3940_v46 }
 0x692   : > { %4485 = vmatprep.subr.mxu0 %v3946_v6 }
 0x694   : > { %v3944_v3 = vpop.permute.xlu1 %3943  ;;  %v3942_v35 = vpop.permute.xlu0 %3941 }
 0x695   : > { %v3947_v23 = vsel %vm521_vm15, %v3940_v46, %v3942_v35  ;;  %v3948_v25 = vsel %vm521_vm15, %v3942_v35, %v3944_v3  ;;  %v4575_v46 = vld [vmem:[%s5174_s12] sm:$0xff] }
 0x696   : > { %4556 = vmatprep.subr.mxu1 %v3948_v25 }
 0x697   : > { %4557 = vmatpush2.msra.mxu1 %v3947_v23  ;;  %v4576_v23 = vld [vmem:[%s5174_s12 + $0x8] sm:$0xff]  ;;  %s4592_s12 = scalar_lea.sflag [#allocation6], %s5168_s6 }
 0x698   : > { %v3867_v37 = vpop.permute.xlu1 %3866  ;;  %v3936_v1 = vpop.permute.xlu0 %3935 }
 0x699   : > { %v3945_v13 = vsel %vm521_vm15, %v3936_v1, %v3938_v39  ;;  %vm7737_vm15 = vmmov %vm7725_vm1 }
 0x69a   : > { %4486 = vmatpush2.msra.mxu0 %v3945_v13 }
 0x69c   : > { %v3871_v41 = vpop.permute.xlu1 %3870  ;;  %v3869_v54 = vpop.permute.xlu0 %3868 }
 0x69d   : > { %v3875_v20 = vsel %vm7732_vm6, %v3867_v37, %v3869_v54  ;;  %v3876_v29 = vsel %vm7735_vm9, %v3869_v54, %v3871_v41 }
 0x69e   : > { %4487 = vmatprep.subr.mxu0 %v3875_v20 }
 0x6a0   : > { %v3865_v50 = vpop.permute.xlu1 %3864  ;;  %v3873_v24 = vpop.permute.xlu0 %3872 }
 0x6a1   : > { %v3874_v30 = vsel %vm7733_vm7, %v3865_v50, %v3867_v37  ;;  %v3877_v4 = vsel %vm7734_vm8, %v3871_v41, %v3873_v24 }
 0x6a2   : > { %4488 = vmatpush2.msra.mxu0 %v3874_v30  ;;  %4558 = vmatprep.subr.mxu1 %v3877_v4 }
 0x6a3   : > { %4559 = vmatpush2.msra.mxu1 %v3876_v29 }
 0x6a4   : > { %v3798_v9 = vpop.permute.xlu1 %3797  ;;  %v3796_v32 = vpop.permute.xlu0 %3795 }
 0x6a5   : > { %v3804_v17 = vsel %vm7736_vm10, %v3796_v32, %v3798_v9 }
 0x6a6   : > { %4489 = vmatprep.subr.mxu0 %v3804_v17 }
 0x6a8   : > { %v3802_v45 = vpop.permute.xlu1 %3801  ;;  %v3800_v38 = vpop.permute.xlu0 %3799 }
 0x6a9   : > { %v3805_v59 = vsel %vm7737_vm15, %v3798_v9, %v3800_v38  ;;  %v3806_v49 = vsel %vm7738_vm2, %v3800_v38, %v3802_v45 }
 0x6aa   : > { %4560 = vmatprep.subr.mxu1 %v3806_v49 }
 0x6ab   : > { %4561 = vmatpush2.msra.mxu1 %v3805_v59 }
 0x6ac   : > { %v3691_v21 = vpop.permute.xlu1 %3690  ;;  %4562 = vmatprep.subr.mxu1 %v3739_v60  ;;  %v3794_v12 = vpop.permute.xlu0 %3793 }
 0x6ad   : > { %v3803_v31 = vsel %vm7739_vm5, %v3794_v12, %v3796_v32  ;;  %4563 = vmatpush2.msra.mxu1 %v3738_v26 }
 0x6ae   : > { %4490 = vmatpush2.msra.mxu0 %v3803_v31 }
 0x6af   : > { %4491 = vmatprep.subr.mxu0 %v3737_v51 }
 0x6b0   : > { %v3695_v40 = vpop.permute.xlu1 %3694  ;;  %4492 = vmatpush2.msra.mxu0 %v3736_v11  ;;  %v3693_v55 = vpop.permute.xlu0 %3692 }
 0x6b1   : > { %v3699_v43 = vsel %vm1554_vm14, %v3691_v21, %v3693_v55  ;;  %v3700_v14 = vsel %vm1554_vm14, %v3693_v55, %v3695_v40 }
 0x6b2   : > { %4493 = vmatprep.subr.mxu0 %v3699_v43 }
 0x6b4   : > { %v3689_v42 = vpop.permute.xlu1 %3688  ;;  %v3697_v36 = vpop.permute.xlu0 %3696 }
 0x6b5   : > { %v3698_v52 = vsel %vm1554_vm14, %v3689_v42, %v3691_v21  ;;  %v3701_v10 = vsel %vm1554_vm14, %v3695_v40, %v3697_v36 }
 0x6b6   : > { %4494 = vmatpush2.msra.mxu0 %v3698_v52  ;;  %4564 = vmatprep.subr.mxu1 %v3701_v10 }
 0x6b7   : > { %4565 = vmatpush2.msra.mxu1 %v3700_v14 }
 0x6b8   : > { %v3622_v47 = vpop.permute.xlu1 %3621  ;;  %v3620_v34 = vpop.permute.xlu0 %3619 }
 0x6b9   : > { %v3628_v19 = vsel %vm1480_vm13, %v3620_v34, %v3622_v47 }
 0x6ba   : > { %4495 = vmatprep.subr.mxu0 %v3628_v19 }
 0x6bc   : > { %v3626_v16 = vpop.permute.xlu1 %3625  ;;  %v3624_v7 = vpop.permute.xlu0 %3623 }
 0x6bd   : > { %v3629_v2 = vsel %vm1480_vm13, %v3622_v47, %v3624_v7  ;;  %v3630_v57 = vsel %vm1480_vm13, %v3624_v7, %v3626_v16 }
 0x6be   : > { %4566 = vmatprep.subr.mxu1 %v3630_v57 }
 0x6bf   : > { %4567 = vmatpush2.msra.mxu1 %v3629_v2 }
 0x6c0   : > { %4569 = vmatmul.mubr.f32.vlgmr.msra.gmra.mxu1 %v4313_v18  ;;  %v3618_v56 = vpop.permute.xlu0 %3617 }
 0x6c1   : > { %v3627_v44 = vsel %vm1480_vm13, %v3618_v56, %v3620_v34 }
 0x6c2   : > { %4496 = vmatpush2.msra.mxu0 %v3627_v44 }
 0x6c3   : > { %4498 = vmatmul.mubr.f32.vlgmr.msra.gmra.mxu0 %v4313_v18 }
 0x6c9   : > { %v4428_v27 = vpop.permute.xlu1 %4427 }
 0x780   : > { %v4570_v63 = vpop.f32.mrf.mxu1 }
 0x781   : > { %v4571_v28 = vadd.f32 %v4570_v63, %v4428_v27 }
 0x782   : > { %v4572_v53 = vpop.f32.mrf.mxu1 }
 0x783   : > { %v4581_v58 = vadd.f32 %v4577_v48, %v4571_v28  ;;  %v4573_v62 = vadd.f32 %v4572_v53, %v4428_v27  ;;  %v4499_v0 = vpop.f32.mrf.mxu0 }
 0x784   : > { %v4500_v39 = vadd.f32 %v4499_v0, %v4428_v27 }
 0x785   : > { %v4585_v6 = vmax.f32 %v4581_v58, 0.0  ;;  %v4582_v3 = vadd.f32 %v4578_v8, %v4573_v62  ;;  %v4501_v35 = vpop.f32.mrf.mxu0 }
 0x786   : > { %v4579_v25 = vadd.f32 %v4575_v46, %v4500_v39  ;;  %v4502_v37 = vadd.f32 %v4501_v35, %v4428_v27 }
 0x787   : > { %4589 = vst [vmem:[%s242_s11 + $0x10] sm:$0xff] %v4585_v6  ;;  %v4586_v1 = vmax.f32 %v4582_v3, 0.0 }
 0x788   : > { %v4583_v13 = vmax.f32 %v4579_v25, 0.0  ;;  %v4580_v41 = vadd.f32 %v4576_v23, %v4502_v37 }
 0x789   : > { %4590 = vst [vmem:[%s242_s11 + $0x18] sm:$0xff] %v4586_v1 }
 0x78a   : > { %4587 = vst [vmem:[%s242_s11] sm:$0xff] %v4583_v13  ;;  %v4584_v54 = vmax.f32 %v4580_v41, 0.0 }
 0x78c   : > { %4588 = vst [vmem:[%s242_s11 + $0x8] sm:$0xff] %v4584_v54 }
 0x78d   : > { %4925 = shalt.err (!%p4922_p9)
}
 0x78e   : > { %s4926_s5 = scalar_lea.hbm %s4604_s29, 512  ;;  %s4930_s10 = scalar_lea.hbm %s7445_s4, 1024 }
 0x78f   : > { %p4927_p13 = scmp.ne.s32.totalorder %s4604_s29, %s4926_s5  ;;  %p4931_p4 = scmp.lt.s32.totalorder %s4604_s29, %s7445_s4 }
 0x790   : > { %p4932_p8 = scmp.lt.s32.totalorder %s4930_s10, %s4926_s5 }
 0x791   : > { %p4928_p5 = pnand %p4927_p13, %p7741_p0 }
 0x792   : > { %p4933_p7 = por %p4932_p8, %p4931_p4 }
 0x793   : > { %p4929_p10 = pneg %p4928_p5 }
 0x795   : > { %p4934_p11 = pnand %p4933_p7, %p4929_p10 }
 0x797   : > { %4937 = shalt.err (!%p4934_p11)
}
 0x798   : > { %4730 = dma.vmem_to_hbm [thread:$0]  (%p7741_p0), %s4607_s9, 512, %s4604_s29, %s4592_s12  }
 0x799 PF: > { %s4618_s20 = sand.u32 1, %s4968_s15   ;;  %p7742_p1 = scmp.ne.s32.totalorder %s7545_s22, 0 }
 0x79a   : > { %p7743_p2 = scmp.ge.s32.totalorder %s4980_s18, 2  ;;  %s4619_s11 = scalar_lea.sflag [#allocation6], %s4618_s20 }
 0x79c   : > { %p4744_p6 = pnand %p7743_p2, %p7742_p1 }
 0x79e   : > { %p4745_p12 = pneg %p4744_p6 }
 0x7a0   : > { %4963 = dma.done.wait (%p4745_p12), %s4619_s11, 512  }
 0x7a1   : > { %4965 = vsyncadd (%p4745_p12), %s4619_s11, 4294966784  ;;  %p18_p3 = scmp.ge.s32.totalorder %s5122_s13, 4   ;;  %s7744_s15 = smov %s4972_s16 }
 0x7a2   : > { %s7745_s16 = smov %s4976_s17  ;;  %s7746_s17 = smov %s5131_s24 }
 0x7a3   : > { %s7747_s18 = smov %s5122_s13  ;;  %20 = sbr.rel (!%p18_p3) target bundleno = 6 (0x6), region = 117 }
 0x7a8   :  { %4624 = vsyncpa [#allocation5], 1 }
 0x7a9   :  { %4626 = vsyncpa [#allocation5 + $0x1], 1 }
 0x7aa   :  { %4627 = vsyncpa [#allocation8], 1 }
 0x7ab   :  { %4628 = vsyncpa [#allocation6], 1 }
 0x7ac   :  { %4630 = vsyncpa [#allocation6 + $0x1], 1 }

</bundles_post_ra>
